<compile_context>
chip_gen: v7x
topology: tpu7x:2x2x1
jax: 0.10.0
libtpu: 0.0.40
codegen_flags: <defaults>
</compile_context>

<pallas_src>
import functools

import jax
import jax.numpy as jnp
from jax import lax
from jax.experimental import pallas as pl
from jax.experimental.pallas import tpu as pltpu

EPS = 1e-5   # PyTorch BatchNorm2d default eps
LANE = 128


def _rup(x, m):
    return ((x + m - 1) // m) * m


def _pick_tm(m):
    for t in (256, 128):
        if m % t == 0:
            return t
    return 128  # will pad M up to a multiple of 128


# --------------------- matmul + BN-partial-stats kernel ---------------------

def _mm_stats_kernel(*args, prologue, m_valid, tm):
    if prologue:
        x_ref, w_ref, ps_ref, pt_ref, y_ref, s_ref, acc_ref = args
    else:
        x_ref, w_ref, y_ref, s_ref, acc_ref = args

    k = pl.program_id(2)

    @pl.when(k == 0)
    def _():
        acc_ref[...] = jnp.zeros_like(acc_ref)

    x = x_ref[...]
    if prologue:  # fused BN+ReLU of the previous layer (f32 math on the VPU)
        x = jnp.maximum(x.astype(jnp.float32) * ps_ref[...] + pt_ref[...], 0.0)
    acc_ref[...] += jnp.dot(x.astype(w_ref.dtype), w_ref[...],
                            preferred_element_type=jnp.float32)

    @pl.when(k == pl.num_programs(2) - 1)
    def _():
        y = acc_ref[...]
        y_ref[...] = y.astype(y_ref.dtype)
        if m_valid is not None:  # mask padded rows out of the statistics
            rows = (pl.program_id(0) * tm
                    + lax.broadcasted_iota(jnp.int32, (tm, 1), 0))
            y = jnp.where(rows < m_valid, y, 0.0)
        s_ref[0] = jnp.concatenate(
            [jnp.sum(y, axis=0, keepdims=True),
             jnp.sum(y * y, axis=0, keepdims=True)], axis=0)


def pallas_mm_stats(x, w, prologue=None):
    """x:(M,K) @ w:(K,N) -> y:(Mp,N) f32, stats:(Mp//tm, 2, N) f32.

    Optionally applies relu(x*ps + pt) column-wise before the matmul (fused
    BN+ReLU prologue of the previous layer)."""
    M, K = x.shape
    Kw, N = w.shape
    assert K == Kw and N % LANE == 0 and K % LANE == 0
    tm = _pick_tm(M)
    Mp = _rup(M, tm)
    tk = K if K <= 1024 else 512
    Kp = _rup(K, tk)
    tn = N if N <= 512 else (256 if N % 256 == 0 else 128)
    nm, nn, nk = Mp // tm, N // tn, Kp // tk

    if (Mp, Kp) != (M, K):
        x = jnp.pad(x, ((0, Mp - M), (0, Kp - K)))
    if Kp != K:
        w = jnp.pad(w, ((0, Kp - K), (0, 0)))

    in_specs = [pl.BlockSpec((tm, tk), lambda m, n, k: (m, k)),
                pl.BlockSpec((tk, tn), lambda m, n, k: (k, n))]
    operands = [x, w]
    if prologue is not None:
        ps, pt = prologue
        if Kp != K:
            ps = jnp.pad(ps, ((0, 0), (0, Kp - K)))
            pt = jnp.pad(pt, ((0, 0), (0, Kp - K)))
        in_specs += [pl.BlockSpec((1, tk), lambda m, n, k: (0, k)),
                     pl.BlockSpec((1, tk), lambda m, n, k: (0, k))]
        operands += [ps, pt]

    kernel = functools.partial(_mm_stats_kernel,
                               prologue=prologue is not None,
                               m_valid=M if Mp != M else None, tm=tm)
    y, stats = pl.pallas_call(
        kernel,
        out_shape=(jax.ShapeDtypeStruct((Mp, N), jnp.float32),
                   jax.ShapeDtypeStruct((nm, 2, N), jnp.float32)),
        grid=(nm, nn, nk),
        in_specs=in_specs,
        out_specs=(pl.BlockSpec((tm, tn), lambda m, n, k: (m, n)),
                   pl.BlockSpec((1, 2, tn), lambda m, n, k: (m, 0, n))),
        scratch_shapes=[pltpu.VMEM((tm, tn), jnp.float32)],
        compiler_params=pltpu.CompilerParams(
            dimension_semantics=("parallel", "parallel", "arbitrary")),
    )(*operands)
    return y, stats


# -------------------- 3x3 conv (9 shifted-window matmuls) -------------------

def _conv3x3_kernel(x_ref, w_ref, y_ref, s_ref, *, taps, ho, wo):
    c = x_ref.shape[-1]
    acc = None
    for t, (p, h0, w0) in enumerate(taps):
        win = x_ref[p, pl.ds(h0, ho), pl.ds(w0, wo), :].reshape(ho * wo, c)
        d = jnp.dot(win, w_ref[t], preferred_element_type=jnp.float32)
        acc = d if acc is None else acc + d
    y_ref[...] = acc
    s_ref[0] = jnp.concatenate(
        [jnp.sum(acc, axis=0, keepdims=True),
         jnp.sum(acc * acc, axis=0, keepdims=True)], axis=0)


def pallas_conv3x3_stats(xprep, w9, taps, n_img, ho, wo):
    npl, hq, wq, c = xprep.shape
    p = npl // n_img
    cout = w9.shape[-1]
    kernel = functools.partial(_conv3x3_kernel, taps=tuple(taps), ho=ho, wo=wo)
    y, stats = pl.pallas_call(
        kernel,
        out_shape=(jax.ShapeDtypeStruct((n_img * ho * wo, cout), jnp.float32),
                   jax.ShapeDtypeStruct((n_img, 2, cout), jnp.float32)),
        grid=(n_img,),
        in_specs=[pl.BlockSpec((p, hq, wq, c), lambda i: (i, 0, 0, 0)),
                  pl.BlockSpec((9, c, cout), lambda i: (0, 0, 0))],
        out_specs=(pl.BlockSpec((ho * wo, cout), lambda i: (i, 0)),
                   pl.BlockSpec((1, 2, cout), lambda i: (i, 0, 0))),
        compiler_params=pltpu.CompilerParams(
            dimension_semantics=("parallel",)),
    )(xprep, w9)
    return y, stats


# ------------------------- BN apply / epilogue kernels -----------------------

def _bn_relu_kernel(y_ref, s_ref, t_ref, o_ref):
    o_ref[...] = jnp.maximum(
        y_ref[...] * s_ref[...] + t_ref[...], 0.0).astype(o_ref.dtype)


def pallas_bn_relu(y, scale, shift, out_dtype):
    m, c = y.shape
    tm = _pick_tm(m)
    alias = {0: 0} if y.dtype == out_dtype else {}
    return pl.pallas_call(
        _bn_relu_kernel,
        out_shape=jax.ShapeDtypeStruct((m, c), out_dtype),
        grid=(m // tm,),
        in_specs=[pl.BlockSpec((tm, c), lambda i: (i, 0)),
                  pl.BlockSpec((1, c), lambda i: (0, 0)),
                  pl.BlockSpec((1, c), lambda i: (0, 0))],
        out_specs=pl.BlockSpec((tm, c), lambda i: (i, 0)),
        input_output_aliases=alias,
        compiler_params=pltpu.CompilerParams(
            dimension_semantics=("parallel",)),
    )(y, scale, shift)


def _bn_add_relu_kernel(y_ref, r_ref, s1_ref, t1_ref, s2_ref, t2_ref, o_ref):
    a = y_ref[...] * s1_ref[...] + t1_ref[...]
    b = r_ref[...].astype(jnp.float32) * s2_ref[...] + t2_ref[...]
    o_ref[...] = jnp.maximum(a + b, 0.0)


def pallas_bn_add_relu(y, res, s1, t1, s2, t2):
    m, c = y.shape
    tm = _pick_tm(m)
    return pl.pallas_call(
        _bn_add_relu_kernel,
        out_shape=jax.ShapeDtypeStruct((m, c), jnp.float32),
        grid=(m // tm,),
        in_specs=[pl.BlockSpec((tm, c), lambda i: (i, 0)),
                  pl.BlockSpec((tm, c), lambda i: (i, 0)),
                  pl.BlockSpec((1, c), lambda i: (0, 0)),
                  pl.BlockSpec((1, c), lambda i: (0, 0)),
                  pl.BlockSpec((1, c), lambda i: (0, 0)),
                  pl.BlockSpec((1, c), lambda i: (0, 0))],
        out_specs=pl.BlockSpec((tm, c), lambda i: (i, 0)),
        input_output_aliases={0: 0},  # write the result in place of y3
        compiler_params=pltpu.CompilerParams(
            dimension_semantics=("parallel",)),
    )(y, res, s1, t1, s2, t2)


# ------------------------------- glue (JAX) ---------------------------------

def _bn_coeffs(stats, m_true, gamma, beta):
    """Reduce per-tile (sum, sumsq) partials into BN scale/shift (tiny)."""
    tot = jnp.sum(stats[:, 0, :], axis=0)
    totsq = jnp.sum(stats[:, 1, :], axis=0)
    mean = tot / m_true
    var = jnp.maximum(totsq / m_true - mean * mean, 0.0)
    scale = gamma.reshape(-1) * lax.rsqrt(var + EPS)
    shift = beta.reshape(-1) - mean * scale
    return scale.reshape(1, -1), shift.reshape(1, -1)


def _prep_conv2_input(h_img, stride):
    """Spatial pad (+ parity split for stride 2) so that every 3x3 tap becomes
    a contiguous in-kernel window.  Returns ((N*P, Hq, Wq, C), taps, Ho, Wo)."""
    n, h, w, c = h_img.shape
    xp = jnp.pad(h_img, ((0, 0), (1, 1), (1, 1), (0, 0)))
    ho = (h - 1) // stride + 1
    wo = (w - 1) // stride + 1
    if stride == 1:
        taps = [(0, dy, dx) for dy in range(3) for dx in range(3)]
        return xp, taps, ho, wo
    # stride 2: one-pass space-to-depth of the padded image
    hp, wp = h + 2, w + 2
    hp2, wp2 = _rup(hp, 2), _rup(wp, 2)
    xp = jnp.pad(xp, ((0, 0), (0, hp2 - hp), (0, wp2 - wp), (0, 0)))
    xp = xp.reshape(n, hp2 // 2, 2, wp2 // 2, 2, c)
    xp = xp.transpose(0, 2, 4, 1, 3, 5).reshape(n * 4, hp2 // 2, wp2 // 2, c)
    taps = [((dy % 2) * 2 + (dx % 2), dy // 2, dx // 2)
            for dy in range(3) for dx in range(3)]
    return xp, taps, ho, wo


@functools.partial(jax.jit, static_argnames=("down", "compute_dtype"))
def bottleneck_forward(x_nchw, params, down, compute_dtype=jnp.float32):
    f32 = jnp.float32
    x = jnp.transpose(x_nchw, (0, 2, 3, 1)).astype(f32)  # NHWC
    n, h, w, cin = x.shape
    planes = params["w1"].shape[-1]
    outpl = params["w3"].shape[-1]
    cin_p, cmid_p, cout_p = _rup(cin, LANE), _rup(planes, LANE), _rup(outpl, LANE)

    # lane-dense channel zero-padding, done once up front
    x = jnp.pad(x, ((0, 0), (0, 0), (0, 0), (0, cin_p - cin)))
    m1 = n * h * w
    x2d = x.reshape(m1, cin_p)

    # padded / flattened weights (matmul inputs cast to compute_dtype)
    w1 = jnp.pad(params["w1"].reshape(cin, planes),
                 ((0, cin_p - cin), (0, cmid_p - planes))).astype(compute_dtype)
    w2 = jnp.pad(params["w2"],
                 ((0, 0), (0, 0), (0, cmid_p - planes), (0, cmid_p - planes)))
    w2 = w2.reshape(9, cmid_p, cmid_p).astype(compute_dtype)
    w3 = jnp.pad(params["w3"].reshape(planes, outpl),
                 ((0, cmid_p - planes), (0, cout_p - outpl))).astype(compute_dtype)

    def padv(v, cp, fill):
        v = v.reshape(1, -1).astype(f32)
        return jnp.pad(v, ((0, 0), (0, cp - v.shape[1])), constant_values=fill)

    g1, b1 = padv(params["g1"], cmid_p, 1.0), padv(params["b1"], cmid_p, 0.0)
    g2, b2 = padv(params["g2"], cmid_p, 1.0), padv(params["b2"], cmid_p, 0.0)
    g3, b3 = padv(params["g3"], cout_p, 1.0), padv(params["b3"], cout_p, 0.0)

    # conv1 (1x1) + BN1 partial stats fused into the matmul epilogue
    y1, st1 = pallas_mm_stats(x2d.astype(compute_dtype), w1)
    s1, t1 = _bn_coeffs(st1, m1, g1, b1)
    # TODO(synk): bn1+relu could also be fused into conv2 by masking the spatial
    # zero-pad border inside the 3x3 kernel; kept as a tiled apply pass.
    h1 = pallas_bn_relu(y1, s1, t1, out_dtype=compute_dtype)

    # conv2 (3x3, stride 2 if down else 'same') via in-kernel shifted windows
    stride = 2 if down else 1
    h1_img = h1[:m1].reshape(n, h, w, cmid_p)
    xprep, taps, ho, wo = _prep_conv2_input(h1_img, stride)
    y2, st2 = pallas_conv3x3_stats(xprep, w2, taps, n, ho, wo)
    m2 = n * ho * wo
    s2, t2 = _bn_coeffs(st2, m2, g2, b2)

    # conv3 (1x1) with BN2+ReLU fused into its prologue
    y3, st3 = pallas_mm_stats(y2, w3, prologue=(s2, t2))
    s3, t3 = _bn_coeffs(st3, m2, g3, b3)
    mp = y3.shape[0]

    # identity / downsample branch (its BN is folded into the final kernel)
    if down:
        wd = jnp.pad(params["wd"].reshape(cin, outpl),
                     ((0, cin_p - cin), (0, cout_p - outpl))).astype(compute_dtype)
        gd, bd = padv(params["gd"], cout_p, 1.0), padv(params["bd"], cout_p, 0.0)
        # TODO(synk): fold this strided spatial subsample into a Pallas index_map.
        xs = x[:, ::2, ::2, :].reshape(m2, cin_p)
        res, std = pallas_mm_stats(xs.astype(compute_dtype), wd)
        sr, tr = _bn_coeffs(std, m2, gd, bd)
    else:
        assert cin_p == cout_p, "identity path requires inplanes == outplanes"
        res = x2d
        if res.shape[0] != mp:
            res = jnp.pad(res, ((0, mp - res.shape[0]), (0, 0)))
        sr = jnp.ones((1, cout_p), f32)
        tr = jnp.zeros((1, cout_p), f32)

    # fused BN3 + (BN_downsample or identity) + residual add + ReLU, in place
    out2d = pallas_bn_add_relu(y3, res, s3, t3, sr, tr)
    out = out2d[:m2, :outpl].reshape(n, ho, wo, outpl)
    return jnp.transpose(out, (0, 3, 1, 2))  # back to NCHW


# ------------------------- pure-JAX reference check --------------------------

def ref_forward(x_nchw, params, down):
    x = jnp.transpose(x_nchw, (0, 2, 3, 1)).astype(jnp.float32)

    def conv(t, wgt, stride, pad):
        return lax.conv_general_dilated(
            t, wgt, (stride, stride), pad,
            dimension_numbers=("NHWC", "HWIO", "NHWC"))

    def bn(y, g, b):
        mean = jnp.mean(y, axis=(0, 1, 2), keepdims=True)
        var = jnp.mean(jnp.square(y - mean), axis=(0, 1, 2), keepdims=True)
        return ((y - mean) * lax.rsqrt(var + EPS) * g.reshape(1, 1, 1, -1)
                + b.reshape(1, 1, 1, -1))

    out = jnp.maximum(bn(conv(x, params["w1"], 1, "VALID"),
                         params["g1"], params["b1"]), 0.0)
    s = 2 if down else 1
    out = jnp.maximum(bn(conv(out, params["w2"], s, [(1, 1), (1, 1)]),
                         params["g2"], params["b2"]), 0.0)
    out = bn(conv(out, params["w3"], 1, "VALID"), params["g3"], params["b3"])
    if down:
        identity = bn(conv(x, params["wd"], 2, "VALID"),
                      params["gd"], params["bd"])
    else:
        identity = x
    out = jnp.maximum(out + identity, 0.0)
    return jnp.transpose(out, (0, 3, 1, 2))


# ---------------------------------- params -----------------------------------

def init_params(key, inplanes, planes, outplanes, down):
    ks = jax.random.split(key, 16)
    f32 = jnp.float32
    p = {
        "w1": jax.random.normal(ks[0], (1, 1, inplanes, planes), f32) * 0.1,
        "g1": 1.0 + 0.1 * jax.random.normal(ks[1], (1, planes), f32),
        "b1": 0.1 * jax.random.normal(ks[2], (1, planes), f32),
        "w2": jax.random.normal(ks[3], (3, 3, planes, planes), f32) * 0.1,
        "g2": 1.0 + 0.1 * jax.random.normal(ks[4], (1, planes), f32),
        "b2": 0.1 * jax.random.normal(ks[5], (1, planes), f32),
        "w3": jax.random.normal(ks[6], (1, 1, planes, outplanes), f32) * 0.1,
        "g3": 1.0 + 0.1 * jax.random.normal(ks[7], (1, outplanes), f32),
        "b3": 0.1 * jax.random.normal(ks[8], (1, outplanes), f32),
    }
    if down:
        p["wd"] = jax.random.normal(ks[9], (1, 1, inplanes, outplanes), f32) * 0.1
        p["gd"] = 1.0 + 0.1 * jax.random.normal(ks[10], (1, outplanes), f32)
        p["bd"] = 0.1 * jax.random.normal(ks[11], (1, outplanes), f32)
    return p


if __name__ == "__main__":
    key = jax.random.PRNGKey(0)
    k_x, k_p, k_x2, k_p2 = jax.random.split(key, 4)

    # Case 1: down=True (stride-2 3x3 conv + 1x1 stride-2 downsample branch)
    x = jax.random.normal(k_x, (2, 4, 16, 16), jnp.float32)        # NCHW
    params = init_params(k_p, inplanes=4, planes=8, outplanes=16, down=True)
    out = jax.block_until_ready(bottleneck_forward(x, params, down=True))
    ref = jax.block_until_ready(ref_forward(x, params, down=True))
    assert out.shape == (2, 16, 8, 8), out.shape
    assert jnp.allclose(out, ref, rtol=1e-3, atol=1e-3), (
        "down=True mismatch", float(jnp.max(jnp.abs(out - ref))))

    # Case 2: down=False (identity skip; inplanes == outplanes)
    x2 = jax.random.normal(k_x2, (2, 16, 16, 16), jnp.float32)     # NCHW
    params2 = init_params(k_p2, inplanes=16, planes=8, outplanes=16, down=False)
    out2 = jax.block_until_ready(bottleneck_forward(x2, params2, down=False))
    ref2 = jax.block_until_ready(ref_forward(x2, params2, down=False))
    assert out2.shape == (2, 16, 16, 16), out2.shape
    assert jnp.allclose(out2, ref2, rtol=1e-3, atol=1e-3), (
        "down=False mismatch", float(jnp.max(jnp.abs(out2 - ref2))))

    # bf16 MXU-input mode (f32 accumulation + f32 BN math): loose check
    out_bf = jax.block_until_ready(
        bottleneck_forward(x, params, down=True, compute_dtype=jnp.bfloat16))
    err = float(jnp.max(jnp.abs(out_bf.astype(jnp.float32) - ref)))
    assert err < 0.25, ("bf16 mismatch", err)

    print("KERNEL_OK")
</pallas_src>

<mosaic_0001>
module attributes {stable_mosaic.version = 11 : i64} {
  func.func @_mm_stats_kernel(%arg0: i32, %arg1: i32, %arg2: i32, %arg3: memref<256x128xf32, #tpu.memory_space<vmem>>, %arg4: memref<128x128xf32, #tpu.memory_space<vmem>>, %arg5: memref<256x128xf32, #tpu.memory_space<vmem>>, %arg6: memref<1x2x128xf32, #tpu.memory_space<vmem>>, %arg7: memref<256x128xf32, #tpu.memory_space<vmem>>) attributes {dimension_semantics = [#tpu.dimension_semantics<parallel>, #tpu.dimension_semantics<parallel>, #tpu.dimension_semantics<arbitrary>], iteration_bounds = array<i64: 2, 1, 1>, scalar_prefetch = 0 : i64, scratch_operands = 1 : i64, tpu.core_type = #tpu.core_type<tc>, window_params = [{transform_indices = @transform_0, window_bounds = array<i64: 256, 128>}, {transform_indices = @transform_1, window_bounds = array<i64: 128, 128>}, {transform_indices = @transform_2, window_bounds = array<i64: 256, 128>}, {transform_indices = @transform_3, window_bounds = array<i64: 1, 2, 128>}]} {
    %c0_i32 = arith.constant 0 : i32
    %0 = arith.cmpi eq, %arg2, %c0_i32 : i32
    %1 = arith.extui %0 : i1 to i32
    %c0_i32_0 = arith.constant 0 : i32
    %2 = arith.cmpi ne, %1, %c0_i32_0 : i32
    scf.if %2 {
      %cst_10 = arith.constant 0.000000e+00 : f32
      %12 = vector.broadcast %cst_10 : f32 to vector<256x128xf32>
      %c0_11 = arith.constant 0 : index
      %c0_12 = arith.constant 0 : index
      %13 = vector.load %arg7[%c0_11, %c0_12] : memref<256x128xf32, #tpu.memory_space<vmem>>, vector<256x128xf32>
      tpu.vector_store %arg7[%c0_11, %c0_12], %12 {strides = array<i32>} : memref<256x128xf32, #tpu.memory_space<vmem>>, vector<256x128xf32>,
    } else {
    }
    %c0 = arith.constant 0 : index
    %c0_1 = arith.constant 0 : index
    %3 = vector.load %arg3[%c0, %c0_1] : memref<256x128xf32, #tpu.memory_space<vmem>>, vector<256x128xf32>
    %c0_2 = arith.constant 0 : index
    %c0_3 = arith.constant 0 : index
    %4 = vector.load %arg7[%c0_2, %c0_3] : memref<256x128xf32, #tpu.memory_space<vmem>>, vector<256x128xf32>
    %c0_4 = arith.constant 0 : index
    %c0_5 = arith.constant 0 : index
    %5 = vector.load %arg4[%c0_4, %c0_5] : memref<128x128xf32, #tpu.memory_space<vmem>>, vector<128x128xf32>
    %cst = arith.constant dense<0.000000e+00> : vector<256x128xf32>
    %6 = tpu.matmul %3, %5, %cst {dimension_numbers = #tpu.dot_dimension_numbers<[1], [0], [0], [1], [0, 0, 1, 1], [], []>} : vector<256x128xf32>, vector<128x128xf32>, vector<256x128xf32> -> vector<256x128xf32>
    %7 = arith.addf %4, %6 : vector<256x128xf32>
    %c0_6 = arith.constant 0 : index
    %c0_7 = arith.constant 0 : index
    %8 = vector.load %arg7[%c0_6, %c0_7] : memref<256x128xf32, #tpu.memory_space<vmem>>, vector<256x128xf32>
    tpu.vector_store %arg7[%c0_6, %c0_7], %7 {strides = array<i32>} : memref<256x128xf32, #tpu.memory_space<vmem>>, vector<256x128xf32>,
    %c0_i32_8 = arith.constant 0 : i32
    %9 = arith.cmpi eq, %arg2, %c0_i32_8 : i32
    %10 = arith.extui %9 : i1 to i32
    %c0_i32_9 = arith.constant 0 : i32
    %11 = arith.cmpi ne, %10, %c0_i32_9 : i32
    scf.if %11 {
      %c0_10 = arith.constant 0 : index
      %c0_11 = arith.constant 0 : index
      %12 = vector.load %arg7[%c0_10, %c0_11] : memref<256x128xf32, #tpu.memory_space<vmem>>, vector<256x128xf32>
      %c0_12 = arith.constant 0 : index
      %c0_13 = arith.constant 0 : index
      %13 = vector.load %arg5[%c0_12, %c0_13] : memref<256x128xf32, #tpu.memory_space<vmem>>, vector<256x128xf32>
      tpu.vector_store %arg5[%c0_12, %c0_13], %12 {strides = array<i32>} : memref<256x128xf32, #tpu.memory_space<vmem>>, vector<256x128xf32>,
      %cst_14 = arith.constant dense<0.000000e+00> : vector<128xf32>
      %14 = vector.multi_reduction <add>, %12, %cst_14 [0] : vector<256x128xf32> to vector<128xf32>
      %15 = vector.shape_cast %14 : vector<128xf32> to vector<1x128xf32>
      %16 = arith.mulf %12, %12 : vector<256x128xf32>
      %cst_15 = arith.constant dense<0.000000e+00> : vector<128xf32>
      %17 = vector.multi_reduction <add>, %16, %cst_15 [0] : vector<256x128xf32> to vector<128xf32>
      %18 = vector.shape_cast %17 : vector<128xf32> to vector<1x128xf32>
      %19 = tpu.concatenate %15, %18 in 0 : vector<1x128xf32>, vector<1x128xf32> -> vector<2x128xf32>
      %c0_16 = arith.constant 0 : index
      %c0_17 = arith.constant 0 : index
      %c0_18 = arith.constant 0 : index
      %20 = vector.load %arg6[%c0_16, %c0_17, %c0_18] : memref<1x2x128xf32, #tpu.memory_space<vmem>>, vector<1x2x128xf32>
      %21 = vector.shape_cast %20 : vector<1x2x128xf32> to vector<2x128xf32>
      %22 = vector.shape_cast %19 : vector<2x128xf32> to vector<1x2x128xf32>
      tpu.vector_store %arg6[%c0_16, %c0_17, %c0_18], %22 {strides = array<i32>} : memref<1x2x128xf32, #tpu.memory_space<vmem>>, vector<1x2x128xf32>,
    } else {
    }
    return
  }
  func.func @transform_0(%arg0: i32, %arg1: i32, %arg2: i32) -> (i32, i32) {
    %c0_i32 = arith.constant 0 : i32
    return %arg0, %arg2 : i32, i32
  }
  func.func @transform_1(%arg0: i32, %arg1: i32, %arg2: i32) -> (i32, i32) {
    %c0_i32 = arith.constant 0 : i32
    return %arg2, %arg1 : i32, i32
  }
  func.func @transform_2(%arg0: i32, %arg1: i32, %arg2: i32) -> (i32, i32) {
    %c0_i32 = arith.constant 0 : i32
    return %arg0, %arg1 : i32, i32
  }
  func.func @transform_3(%arg0: i32, %arg1: i32, %arg2: i32) -> (i32, i32, i32) {
    %c0_i32 = arith.constant 0 : i32
    %c0_i32_0 = arith.constant 0 : i32
    return %arg0, %c0_i32, %arg1 : i32, i32, i32
  }
}

module attributes {stable_mosaic.version = 11 : i64} {
  func.func @_bn_relu_kernel(%arg0: i32, %arg1: memref<256x128xf32, #tpu.memory_space<vmem>>, %arg2: memref<1x128xf32, #tpu.memory_space<vmem>>, %arg3: memref<1x128xf32, #tpu.memory_space<vmem>>, %arg4: memref<256x128xf32, #tpu.memory_space<vmem>>) attributes {dimension_semantics = [#tpu.dimension_semantics<parallel>], iteration_bounds = array<i64: 2>, scalar_prefetch = 0 : i64, scratch_operands = 0 : i64, tpu.core_type = #tpu.core_type<tc>, window_params = [{transform_indices = @transform_0, window_bounds = array<i64: 256, 128>}, {pipeline_mode = #tpu.pipeline_mode<synchronous>, transform_indices = @transform_1, window_bounds = array<i64: 1, 128>}, {pipeline_mode = #tpu.pipeline_mode<synchronous>, transform_indices = @transform_2, window_bounds = array<i64: 1, 128>}, {transform_indices = @transform_3, window_bounds = array<i64: 256, 128>}]} {
    %c0 = arith.constant 0 : index
    %c0_0 = arith.constant 0 : index
    %0 = vector.load %arg1[%c0, %c0_0] : memref<256x128xf32, #tpu.memory_space<vmem>>, vector<256x128xf32>
    %c0_1 = arith.constant 0 : index
    %c0_2 = arith.constant 0 : index
    %1 = vector.load %arg2[%c0_1, %c0_2] : memref<1x128xf32, #tpu.memory_space<vmem>>, vector<1x128xf32>
    %2 = vector.broadcast %1 : vector<1x128xf32> to vector<256x128xf32>
    %3 = arith.mulf %0, %2 : vector<256x128xf32>
    %c0_3 = arith.constant 0 : index
    %c0_4 = arith.constant 0 : index
    %4 = vector.load %arg3[%c0_3, %c0_4] : memref<1x128xf32, #tpu.memory_space<vmem>>, vector<1x128xf32>
    %5 = vector.broadcast %4 : vector<1x128xf32> to vector<256x128xf32>
    %6 = arith.addf %3, %5 : vector<256x128xf32>
    %cst = arith.constant 0.000000e+00 : f32
    %7 = vector.broadcast %cst : f32 to vector<256x128xf32>
    %8 = arith.maximumf %6, %7 : vector<256x128xf32>
    %c0_5 = arith.constant 0 : index
    %c0_6 = arith.constant 0 : index
    %9 = vector.load %arg4[%c0_5, %c0_6] : memref<256x128xf32, #tpu.memory_space<vmem>>, vector<256x128xf32>
    tpu.vector_store %arg4[%c0_5, %c0_6], %8 {strides = array<i32>} : memref<256x128xf32, #tpu.memory_space<vmem>>, vector<256x128xf32>,
    return
  }
  func.func @transform_0(%arg0: i32) -> (i32, i32) {
    %c0_i32 = arith.constant 0 : i32
    %c0_i32_0 = arith.constant 0 : i32
    return %arg0, %c0_i32 : i32, i32
  }
  func.func @transform_1(%arg0: i32) -> (i32, i32) {
    %c0_i32 = arith.constant 0 : i32
    %c0_i32_0 = arith.constant 0 : i32
    %c0_i32_1 = arith.constant 0 : i32
    return %c0_i32, %c0_i32_0 : i32, i32
  }
  func.func @transform_2(%arg0: i32) -> (i32, i32) {
    %c0_i32 = arith.constant 0 : i32
    %c0_i32_0 = arith.constant 0 : i32
    %c0_i32_1 = arith.constant 0 : i32
    return %c0_i32, %c0_i32_0 : i32, i32
  }
  func.func @transform_3(%arg0: i32) -> (i32, i32) {
    %c0_i32 = arith.constant 0 : i32
    %c0_i32_0 = arith.constant 0 : i32
    return %arg0, %c0_i32 : i32, i32
  }
}

module attributes {stable_mosaic.version = 11 : i64} {
  func.func @_conv3x3_kernel(%arg0: i32, %arg1: memref<4x9x9x128xf32, #tpu.memory_space<vmem>>, %arg2: memref<9x128x128xf32, #tpu.memory_space<vmem>>, %arg3: memref<64x128xf32, #tpu.memory_space<vmem>>, %arg4: memref<1x2x128xf32, #tpu.memory_space<vmem>>) attributes {dimension_semantics = [#tpu.dimension_semantics<parallel>], iteration_bounds = array<i64: 2>, scalar_prefetch = 0 : i64, scratch_operands = 0 : i64, tpu.core_type = #tpu.core_type<tc>, window_params = [{transform_indices = @transform_0, window_bounds = array<i64: 4, 9, 9, 128>}, {pipeline_mode = #tpu.pipeline_mode<synchronous>, transform_indices = @transform_1, window_bounds = array<i64: 9, 128, 128>}, {transform_indices = @transform_2, window_bounds = array<i64: 64, 128>}, {transform_indices = @transform_3, window_bounds = array<i64: 1, 2, 128>}]} {
    %c0 = arith.constant 0 : index
    %c0_0 = arith.constant 0 : index
    %c0_1 = arith.constant 0 : index
    %c0_2 = arith.constant 0 : index
    %0 = vector.load %arg1[%c0, %c0_0, %c0_1, %c0_2] : memref<4x9x9x128xf32, #tpu.memory_space<vmem>>, vector<1x8x8x128xf32>
    %1 = vector.shape_cast %0 : vector<1x8x8x128xf32> to vector<8x8x128xf32>
    %2 = vector.shape_cast %1 : vector<8x8x128xf32> to vector<64x128xf32>
    %c0_3 = arith.constant 0 : index
    %c0_4 = arith.constant 0 : index
    %c0_5 = arith.constant 0 : index
    %3 = vector.load %arg2[%c0_3, %c0_4, %c0_5] : memref<9x128x128xf32, #tpu.memory_space<vmem>>, vector<1x128x128xf32>
    %4 = vector.shape_cast %3 : vector<1x128x128xf32> to vector<128x128xf32>
    %cst = arith.constant dense<0.000000e+00> : vector<64x128xf32>
    %5 = tpu.matmul %2, %4, %cst {dimension_numbers = #tpu.dot_dimension_numbers<[1], [0], [0], [1], [0, 0, 1, 1], [], []>} : vector<64x128xf32>, vector<128x128xf32>, vector<64x128xf32> -> vector<64x128xf32>
    %c1 = arith.constant 1 : index
    %c0_6 = arith.constant 0 : index
    %c0_7 = arith.constant 0 : index
    %c0_8 = arith.constant 0 : index
    %6 = vector.load %arg1[%c1, %c0_6, %c0_7, %c0_8] : memref<4x9x9x128xf32, #tpu.memory_space<vmem>>, vector<1x8x8x128xf32>
    %7 = vector.shape_cast %6 : vector<1x8x8x128xf32> to vector<8x8x128xf32>
    %8 = vector.shape_cast %7 : vector<8x8x128xf32> to vector<64x128xf32>
    %c1_9 = arith.constant 1 : index
    %c0_10 = arith.constant 0 : index
    %c0_11 = arith.constant 0 : index
    %9 = vector.load %arg2[%c1_9, %c0_10, %c0_11] : memref<9x128x128xf32, #tpu.memory_space<vmem>>, vector<1x128x128xf32>
    %10 = vector.shape_cast %9 : vector<1x128x128xf32> to vector<128x128xf32>
    %cst_12 = arith.constant dense<0.000000e+00> : vector<64x128xf32>
    %11 = tpu.matmul %8, %10, %cst_12 {dimension_numbers = #tpu.dot_dimension_numbers<[1], [0], [0], [1], [0, 0, 1, 1], [], []>} : vector<64x128xf32>, vector<128x128xf32>, vector<64x128xf32> -> vector<64x128xf32>
    %12 = arith.addf %5, %11 : vector<64x128xf32>
    %c0_13 = arith.constant 0 : index
    %c0_14 = arith.constant 0 : index
    %c1_15 = arith.constant 1 : index
    %c0_16 = arith.constant 0 : index
    %13 = vector.load %arg1[%c0_13, %c0_14, %c1_15, %c0_16] : memref<4x9x9x128xf32, #tpu.memory_space<vmem>>, vector<1x8x8x128xf32>
    %14 = vector.shape_cast %13 : vector<1x8x8x128xf32> to vector<8x8x128xf32>
    %15 = vector.shape_cast %14 : vector<8x8x128xf32> to vector<64x128xf32>
    %c2 = arith.constant 2 : index
    %c0_17 = arith.constant 0 : index
    %c0_18 = arith.constant 0 : index
    %16 = vector.load %arg2[%c2, %c0_17, %c0_18] : memref<9x128x128xf32, #tpu.memory_space<vmem>>, vector<1x128x128xf32>
    %17 = vector.shape_cast %16 : vector<1x128x128xf32> to vector<128x128xf32>
    %cst_19 = arith.constant dense<0.000000e+00> : vector<64x128xf32>
    %18 = tpu.matmul %15, %17, %cst_19 {dimension_numbers = #tpu.dot_dimension_numbers<[1], [0], [0], [1], [0, 0, 1, 1], [], []>} : vector<64x128xf32>, vector<128x128xf32>, vector<64x128xf32> -> vector<64x128xf32>
    %19 = arith.addf %12, %18 : vector<64x128xf32>
    %c2_20 = arith.constant 2 : index
    %c0_21 = arith.constant 0 : index
    %c0_22 = arith.constant 0 : index
    %c0_23 = arith.constant 0 : index
    %20 = vector.load %arg1[%c2_20, %c0_21, %c0_22, %c0_23] : memref<4x9x9x128xf32, #tpu.memory_space<vmem>>, vector<1x8x8x128xf32>
    %21 = vector.shape_cast %20 : vector<1x8x8x128xf32> to vector<8x8x128xf32>
    %22 = vector.shape_cast %21 : vector<8x8x128xf32> to vector<64x128xf32>
    %c3 = arith.constant 3 : index
    %c0_24 = arith.constant 0 : index
    %c0_25 = arith.constant 0 : index
    %23 = vector.load %arg2[%c3, %c0_24, %c0_25] : memref<9x128x128xf32, #tpu.memory_space<vmem>>, vector<1x128x128xf32>
    %24 = vector.shape_cast %23 : vector<1x128x128xf32> to vector<128x128xf32>
    %cst_26 = arith.constant dense<0.000000e+00> : vector<64x128xf32>
    %25 = tpu.matmul %22, %24, %cst_26 {dimension_numbers = #tpu.dot_dimension_numbers<[1], [0], [0], [1], [0, 0, 1, 1], [], []>} : vector<64x128xf32>, vector<128x128xf32>, vector<64x128xf32> -> vector<64x128xf32>
    %26 = arith.addf %19, %25 : vector<64x128xf32>
    %c3_27 = arith.constant 3 : index
    %c0_28 = arith.constant 0 : index
    %c0_29 = arith.constant 0 : index
    %c0_30 = arith.constant 0 : index
    %27 = vector.load %arg1[%c3_27, %c0_28, %c0_29, %c0_30] : memref<4x9x9x128xf32, #tpu.memory_space<vmem>>, vector<1x8x8x128xf32>
    %28 = vector.shape_cast %27 : vector<1x8x8x128xf32> to vector<8x8x128xf32>
    %29 = vector.shape_cast %28 : vector<8x8x128xf32> to vector<64x128xf32>
    %c4 = arith.constant 4 : index
    %c0_31 = arith.constant 0 : index
    %c0_32 = arith.constant 0 : index
    %30 = vector.load %arg2[%c4, %c0_31, %c0_32] : memref<9x128x128xf32, #tpu.memory_space<vmem>>, vector<1x128x128xf32>
    %31 = vector.shape_cast %30 : vector<1x128x128xf32> to vector<128x128xf32>
    %cst_33 = arith.constant dense<0.000000e+00> : vector<64x128xf32>
    %32 = tpu.matmul %29, %31, %cst_33 {dimension_numbers = #tpu.dot_dimension_numbers<[1], [0], [0], [1], [0, 0, 1, 1], [], []>} : vector<64x128xf32>, vector<128x128xf32>, vector<64x128xf32> -> vector<64x128xf32>
    %33 = arith.addf %26, %32 : vector<64x128xf32>
    %c2_34 = arith.constant 2 : index
    %c0_35 = arith.constant 0 : index
    %c1_36 = arith.constant 1 : index
    %c0_37 = arith.constant 0 : index
    %34 = vector.load %arg1[%c2_34, %c0_35, %c1_36, %c0_37] : memref<4x9x9x128xf32, #tpu.memory_space<vmem>>, vector<1x8x8x128xf32>
    %35 = vector.shape_cast %34 : vector<1x8x8x128xf32> to vector<8x8x128xf32>
    %36 = vector.shape_cast %35 : vector<8x8x128xf32> to vector<64x128xf32>
    %c5 = arith.constant 5 : index
    %c0_38 = arith.constant 0 : index
    %c0_39 = arith.constant 0 : index
    %37 = vector.load %arg2[%c5, %c0_38, %c0_39] : memref<9x128x128xf32, #tpu.memory_space<vmem>>, vector<1x128x128xf32>
    %38 = vector.shape_cast %37 : vector<1x128x128xf32> to vector<128x128xf32>
    %cst_40 = arith.constant dense<0.000000e+00> : vector<64x128xf32>
    %39 = tpu.matmul %36, %38, %cst_40 {dimension_numbers = #tpu.dot_dimension_numbers<[1], [0], [0], [1], [0, 0, 1, 1], [], []>} : vector<64x128xf32>, vector<128x128xf32>, vector<64x128xf32> -> vector<64x128xf32>
    %40 = arith.addf %33, %39 : vector<64x128xf32>
    %c0_41 = arith.constant 0 : index
    %c1_42 = arith.constant 1 : index
    %c0_43 = arith.constant 0 : index
    %c0_44 = arith.constant 0 : index
    %41 = vector.load %arg1[%c0_41, %c1_42, %c0_43, %c0_44] : memref<4x9x9x128xf32, #tpu.memory_space<vmem>>, vector<1x8x8x128xf32>
    %42 = vector.shape_cast %41 : vector<1x8x8x128xf32> to vector<8x8x128xf32>
    %43 = vector.shape_cast %42 : vector<8x8x128xf32> to vector<64x128xf32>
    %c6 = arith.constant 6 : index
    %c0_45 = arith.constant 0 : index
    %c0_46 = arith.constant 0 : index
    %44 = vector.load %arg2[%c6, %c0_45, %c0_46] : memref<9x128x128xf32, #tpu.memory_space<vmem>>, vector<1x128x128xf32>
    %45 = vector.shape_cast %44 : vector<1x128x128xf32> to vector<128x128xf32>
    %cst_47 = arith.constant dense<0.000000e+00> : vector<64x128xf32>
    %46 = tpu.matmul %43, %45, %cst_47 {dimension_numbers = #tpu.dot_dimension_numbers<[1], [0], [0], [1], [0, 0, 1, 1], [], []>} : vector<64x128xf32>, vector<128x128xf32>, vector<64x128xf32> -> vector<64x128xf32>
    %47 = arith.addf %40, %46 : vector<64x128xf32>
    %c1_48 = arith.constant 1 : index
    %c1_49 = arith.constant 1 : index
    %c0_50 = arith.constant 0 : index
    %c0_51 = arith.constant 0 : index
    %48 = vector.load %arg1[%c1_48, %c1_49, %c0_50, %c0_51] : memref<4x9x9x128xf32, #tpu.memory_space<vmem>>, vector<1x8x8x128xf32>
    %49 = vector.shape_cast %48 : vector<1x8x8x128xf32> to vector<8x8x128xf32>
    %50 = vector.shape_cast %49 : vector<8x8x128xf32> to vector<64x128xf32>
    %c7 = arith.constant 7 : index
    %c0_52 = arith.constant 0 : index
    %c0_53 = arith.constant 0 : index
    %51 = vector.load %arg2[%c7, %c0_52, %c0_53] : memref<9x128x128xf32, #tpu.memory_space<vmem>>, vector<1x128x128xf32>
    %52 = vector.shape_cast %51 : vector<1x128x128xf32> to vector<128x128xf32>
    %cst_54 = arith.constant dense<0.000000e+00> : vector<64x128xf32>
    %53 = tpu.matmul %50, %52, %cst_54 {dimension_numbers = #tpu.dot_dimension_numbers<[1], [0], [0], [1], [0, 0, 1, 1], [], []>} : vector<64x128xf32>, vector<128x128xf32>, vector<64x128xf32> -> vector<64x128xf32>
    %54 = arith.addf %47, %53 : vector<64x128xf32>
    %c0_55 = arith.constant 0 : index
    %c1_56 = arith.constant 1 : index
    %c1_57 = arith.constant 1 : index
    %c0_58 = arith.constant 0 : index
    %55 = vector.load %arg1[%c0_55, %c1_56, %c1_57, %c0_58] : memref<4x9x9x128xf32, #tpu.memory_space<vmem>>, vector<1x8x8x128xf32>
    %56 = vector.shape_cast %55 : vector<1x8x8x128xf32> to vector<8x8x128xf32>
    %57 = vector.shape_cast %56 : vector<8x8x128xf32> to vector<64x128xf32>
    %c8 = arith.constant 8 : index
    %c0_59 = arith.constant 0 : index
    %c0_60 = arith.constant 0 : index
    %58 = vector.load %arg2[%c8, %c0_59, %c0_60] : memref<9x128x128xf32, #tpu.memory_space<vmem>>, vector<1x128x128xf32>
    %59 = vector.shape_cast %58 : vector<1x128x128xf32> to vector<128x128xf32>
    %cst_61 = arith.constant dense<0.000000e+00> : vector<64x128xf32>
    %60 = tpu.matmul %57, %59, %cst_61 {dimension_numbers = #tpu.dot_dimension_numbers<[1], [0], [0], [1], [0, 0, 1, 1], [], []>} : vector<64x128xf32>, vector<128x128xf32>, vector<64x128xf32> -> vector<64x128xf32>
    %61 = arith.addf %54, %60 : vector<64x128xf32>
    %c0_62 = arith.constant 0 : index
    %c0_63 = arith.constant 0 : index
    %62 = vector.load %arg3[%c0_62, %c0_63] : memref<64x128xf32, #tpu.memory_space<vmem>>, vector<64x128xf32>
    tpu.vector_store %arg3[%c0_62, %c0_63], %61 {strides = array<i32>} : memref<64x128xf32, #tpu.memory_space<vmem>>, vector<64x128xf32>,
    %cst_64 = arith.constant dense<0.000000e+00> : vector<128xf32>
    %63 = vector.multi_reduction <add>, %61, %cst_64 [0] : vector<64x128xf32> to vector<128xf32>
    %64 = vector.shape_cast %63 : vector<128xf32> to vector<1x128xf32>
    %65 = arith.mulf %61, %61 : vector<64x128xf32>
    %cst_65 = arith.constant dense<0.000000e+00> : vector<128xf32>
    %66 = vector.multi_reduction <add>, %65, %cst_65 [0] : vector<64x128xf32> to vector<128xf32>
    %67 = vector.shape_cast %66 : vector<128xf32> to vector<1x128xf32>
    %68 = tpu.concatenate %64, %67 in 0 : vector<1x128xf32>, vector<1x128xf32> -> vector<2x128xf32>
    %c0_66 = arith.constant 0 : index
    %c0_67 = arith.constant 0 : index
    %c0_68 = arith.constant 0 : index
    %69 = vector.load %arg4[%c0_66, %c0_67, %c0_68] : memref<1x2x128xf32, #tpu.memory_space<vmem>>, vector<1x2x128xf32>
    %70 = vector.shape_cast %69 : vector<1x2x128xf32> to vector<2x128xf32>
    %71 = vector.shape_cast %68 : vector<2x128xf32> to vector<1x2x128xf32>
    tpu.vector_store %arg4[%c0_66, %c0_67, %c0_68], %71 {strides = array<i32>} : memref<1x2x128xf32, #tpu.memory_space<vmem>>, vector<1x2x128xf32>,
    return
  }
  func.func @transform_0(%arg0: i32) -> (i32, i32, i32, i32) {
    %c0_i32 = arith.constant 0 : i32
    %c0_i32_0 = arith.constant 0 : i32
    %c0_i32_1 = arith.constant 0 : i32
    %c0_i32_2 = arith.constant 0 : i32
    return %arg0, %c0_i32, %c0_i32_0, %c0_i32_1 : i32, i32, i32, i32
  }
  func.func @transform_1(%arg0: i32) -> (i32, i32, i32) {
    %c0_i32 = arith.constant 0 : i32
    %c0_i32_0 = arith.constant 0 : i32
    %c0_i32_1 = arith.constant 0 : i32
    %c0_i32_2 = arith.constant 0 : i32
    return %c0_i32, %c0_i32_0, %c0_i32_1 : i32, i32, i32
  }
  func.func @transform_2(%arg0: i32) -> (i32, i32) {
    %c0_i32 = arith.constant 0 : i32
    %c0_i32_0 = arith.constant 0 : i32
    return %arg0, %c0_i32 : i32, i32
  }
  func.func @transform_3(%arg0: i32) -> (i32, i32, i32) {
    %c0_i32 = arith.constant 0 : i32
    %c0_i32_0 = arith.constant 0 : i32
    %c0_i32_1 = arith.constant 0 : i32
    return %arg0, %c0_i32, %c0_i32_0 : i32, i32, i32
  }
}

module attributes {stable_mosaic.version = 11 : i64} {
  func.func @_mm_stats_kernel(%arg0: i32, %arg1: i32, %arg2: i32, %arg3: memref<128x128xf32, #tpu.memory_space<vmem>>, %arg4: memref<128x128xf32, #tpu.memory_space<vmem>>, %arg5: memref<1x128xf32, #tpu.memory_space<vmem>>, %arg6: memref<1x128xf32, #tpu.memory_space<vmem>>, %arg7: memref<128x128xf32, #tpu.memory_space<vmem>>, %arg8: memref<1x2x128xf32, #tpu.memory_space<vmem>>, %arg9: memref<128x128xf32, #tpu.memory_space<vmem>>) attributes {dimension_semantics = [#tpu.dimension_semantics<parallel>, #tpu.dimension_semantics<parallel>, #tpu.dimension_semantics<arbitrary>], iteration_bounds = array<i64: 1, 1, 1>, scalar_prefetch = 0 : i64, scratch_operands = 1 : i64, tpu.core_type = #tpu.core_type<tc>, window_params = [{transform_indices = @transform_0, window_bounds = array<i64: 128, 128>}, {transform_indices = @transform_1, window_bounds = array<i64: 128, 128>}, {transform_indices = @transform_2, window_bounds = array<i64: 1, 128>}, {transform_indices = @transform_3, window_bounds = array<i64: 1, 128>}, {transform_indices = @transform_4, window_bounds = array<i64: 128, 128>}, {transform_indices = @transform_5, window_bounds = array<i64: 1, 2, 128>}]} {
    %c0_i32 = arith.constant 0 : i32
    %0 = arith.cmpi eq, %arg2, %c0_i32 : i32
    %1 = arith.extui %0 : i1 to i32
    %c0_i32_0 = arith.constant 0 : i32
    %2 = arith.cmpi ne, %1, %c0_i32_0 : i32
    scf.if %2 {
      %cst_15 = arith.constant 0.000000e+00 : f32
      %20 = vector.broadcast %cst_15 : f32 to vector<128x128xf32>
      %c0_16 = arith.constant 0 : index
      %c0_17 = arith.constant 0 : index
      %21 = vector.load %arg9[%c0_16, %c0_17] : memref<128x128xf32, #tpu.memory_space<vmem>>, vector<128x128xf32>
      tpu.vector_store %arg9[%c0_16, %c0_17], %20 {strides = array<i32>} : memref<128x128xf32, #tpu.memory_space<vmem>>, vector<128x128xf32>,
    } else {
    }
    %c0 = arith.constant 0 : index
    %c0_1 = arith.constant 0 : index
    %3 = vector.load %arg3[%c0, %c0_1] : memref<128x128xf32, #tpu.memory_space<vmem>>, vector<128x128xf32>
    %c0_2 = arith.constant 0 : index
    %c0_3 = arith.constant 0 : index
    %4 = vector.load %arg5[%c0_2, %c0_3] : memref<1x128xf32, #tpu.memory_space<vmem>>, vector<1x128xf32>
    %5 = vector.broadcast %4 : vector<1x128xf32> to vector<128x128xf32>
    %6 = arith.mulf %3, %5 : vector<128x128xf32>
    %c0_4 = arith.constant 0 : index
    %c0_5 = arith.constant 0 : index
    %7 = vector.load %arg6[%c0_4, %c0_5] : memref<1x128xf32, #tpu.memory_space<vmem>>, vector<1x128xf32>
    %8 = vector.broadcast %7 : vector<1x128xf32> to vector<128x128xf32>
    %9 = arith.addf %6, %8 : vector<128x128xf32>
    %cst = arith.constant 0.000000e+00 : f32
    %10 = vector.broadcast %cst : f32 to vector<128x128xf32>
    %11 = arith.maximumf %9, %10 : vector<128x128xf32>
    %c0_6 = arith.constant 0 : index
    %c0_7 = arith.constant 0 : index
    %12 = vector.load %arg9[%c0_6, %c0_7] : memref<128x128xf32, #tpu.memory_space<vmem>>, vector<128x128xf32>
    %c0_8 = arith.constant 0 : index
    %c0_9 = arith.constant 0 : index
    %13 = vector.load %arg4[%c0_8, %c0_9] : memref<128x128xf32, #tpu.memory_space<vmem>>, vector<128x128xf32>
    %cst_10 = arith.constant dense<0.000000e+00> : vector<128x128xf32>
    %14 = tpu.matmul %11, %13, %cst_10 {dimension_numbers = #tpu.dot_dimension_numbers<[1], [0], [0], [1], [0, 0, 1, 1], [], []>} : vector<128x128xf32>, vector<128x128xf32>, vector<128x128xf32> -> vector<128x128xf32>
    %15 = arith.addf %12, %14 : vector<128x128xf32>
    %c0_11 = arith.constant 0 : index
    %c0_12 = arith.constant 0 : index
    %16 = vector.load %arg9[%c0_11, %c0_12] : memref<128x128xf32, #tpu.memory_space<vmem>>, vector<128x128xf32>
    tpu.vector_store %arg9[%c0_11, %c0_12], %15 {strides = array<i32>} : memref<128x128xf32, #tpu.memory_space<vmem>>, vector<128x128xf32>,
    %c0_i32_13 = arith.constant 0 : i32
    %17 = arith.cmpi eq, %arg2, %c0_i32_13 : i32
    %18 = arith.extui %17 : i1 to i32
    %c0_i32_14 = arith.constant 0 : i32
    %19 = arith.cmpi ne, %18, %c0_i32_14 : i32
    scf.if %19 {
      %c0_15 = arith.constant 0 : index
      %c0_16 = arith.constant 0 : index
      %20 = vector.load %arg9[%c0_15, %c0_16] : memref<128x128xf32, #tpu.memory_space<vmem>>, vector<128x128xf32>
      %c0_17 = arith.constant 0 : index
      %c0_18 = arith.constant 0 : index
      %21 = vector.load %arg7[%c0_17, %c0_18] : memref<128x128xf32, #tpu.memory_space<vmem>>, vector<128x128xf32>
      tpu.vector_store %arg7[%c0_17, %c0_18], %20 {strides = array<i32>} : memref<128x128xf32, #tpu.memory_space<vmem>>, vector<128x128xf32>,
      %cst_19 = arith.constant dense<0.000000e+00> : vector<128xf32>
      %22 = vector.multi_reduction <add>, %20, %cst_19 [0] : vector<128x128xf32> to vector<128xf32>
      %23 = vector.shape_cast %22 : vector<128xf32> to vector<1x128xf32>
      %24 = arith.mulf %20, %20 : vector<128x128xf32>
      %cst_20 = arith.constant dense<0.000000e+00> : vector<128xf32>
      %25 = vector.multi_reduction <add>, %24, %cst_20 [0] : vector<128x128xf32> to vector<128xf32>
      %26 = vector.shape_cast %25 : vector<128xf32> to vector<1x128xf32>
      %27 = tpu.concatenate %23, %26 in 0 : vector<1x128xf32>, vector<1x128xf32> -> vector<2x128xf32>
      %c0_21 = arith.constant 0 : index
      %c0_22 = arith.constant 0 : index
      %c0_23 = arith.constant 0 : index
      %28 = vector.load %arg8[%c0_21, %c0_22, %c0_23] : memref<1x2x128xf32, #tpu.memory_space<vmem>>, vector<1x2x128xf32>
      %29 = vector.shape_cast %28 : vector<1x2x128xf32> to vector<2x128xf32>
      %30 = vector.shape_cast %27 : vector<2x128xf32> to vector<1x2x128xf32>
      tpu.vector_store %arg8[%c0_21, %c0_22, %c0_23], %30 {strides = array<i32>} : memref<1x2x128xf32, #tpu.memory_space<vmem>>, vector<1x2x128xf32>,
    } else {
    }
    return
  }
  func.func @transform_0(%arg0: i32, %arg1: i32, %arg2: i32) -> (i32, i32) {
    %c0_i32 = arith.constant 0 : i32
    return %arg0, %arg2 : i32, i32
  }
  func.func @transform_1(%arg0: i32, %arg1: i32, %arg2: i32) -> (i32, i32) {
    %c0_i32 = arith.constant 0 : i32
    return %arg2, %arg1 : i32, i32
  }
  func.func @transform_2(%arg0: i32, %arg1: i32, %arg2: i32) -> (i32, i32) {
    %c0_i32 = arith.constant 0 : i32
    %c0_i32_0 = arith.constant 0 : i32
    return %c0_i32, %arg2 : i32, i32
  }
  func.func @transform_3(%arg0: i32, %arg1: i32, %arg2: i32) -> (i32, i32) {
    %c0_i32 = arith.constant 0 : i32
    %c0_i32_0 = arith.constant 0 : i32
    return %c0_i32, %arg2 : i32, i32
  }
  func.func @transform_4(%arg0: i32, %arg1: i32, %arg2: i32) -> (i32, i32) {
    %c0_i32 = arith.constant 0 : i32
    return %arg0, %arg1 : i32, i32
  }
  func.func @transform_5(%arg0: i32, %arg1: i32, %arg2: i32) -> (i32, i32, i32) {
    %c0_i32 = arith.constant 0 : i32
    %c0_i32_0 = arith.constant 0 : i32
    return %arg0, %c0_i32, %arg1 : i32, i32, i32
  }
}

module attributes {stable_mosaic.version = 11 : i64} {
  func.func @_mm_stats_kernel(%arg0: i32, %arg1: i32, %arg2: i32, %arg3: memref<128x128xf32, #tpu.memory_space<vmem>>, %arg4: memref<128x128xf32, #tpu.memory_space<vmem>>, %arg5: memref<128x128xf32, #tpu.memory_space<vmem>>, %arg6: memref<1x2x128xf32, #tpu.memory_space<vmem>>, %arg7: memref<128x128xf32, #tpu.memory_space<vmem>>) attributes {dimension_semantics = [#tpu.dimension_semantics<parallel>, #tpu.dimension_semantics<parallel>, #tpu.dimension_semantics<arbitrary>], iteration_bounds = array<i64: 1, 1, 1>, scalar_prefetch = 0 : i64, scratch_operands = 1 : i64, tpu.core_type = #tpu.core_type<tc>, window_params = [{transform_indices = @transform_0, window_bounds = array<i64: 128, 128>}, {transform_indices = @transform_1, window_bounds = array<i64: 128, 128>}, {transform_indices = @transform_2, window_bounds = array<i64: 128, 128>}, {transform_indices = @transform_3, window_bounds = array<i64: 1, 2, 128>}]} {
    %c0_i32 = arith.constant 0 : i32
    %0 = arith.cmpi eq, %arg2, %c0_i32 : i32
    %1 = arith.extui %0 : i1 to i32
    %c0_i32_0 = arith.constant 0 : i32
    %2 = arith.cmpi ne, %1, %c0_i32_0 : i32
    scf.if %2 {
      %cst_10 = arith.constant 0.000000e+00 : f32
      %12 = vector.broadcast %cst_10 : f32 to vector<128x128xf32>
      %c0_11 = arith.constant 0 : index
      %c0_12 = arith.constant 0 : index
      %13 = vector.load %arg7[%c0_11, %c0_12] : memref<128x128xf32, #tpu.memory_space<vmem>>, vector<128x128xf32>
      tpu.vector_store %arg7[%c0_11, %c0_12], %12 {strides = array<i32>} : memref<128x128xf32, #tpu.memory_space<vmem>>, vector<128x128xf32>,
    } else {
    }
    %c0 = arith.constant 0 : index
    %c0_1 = arith.constant 0 : index
    %3 = vector.load %arg3[%c0, %c0_1] : memref<128x128xf32, #tpu.memory_space<vmem>>, vector<128x128xf32>
    %c0_2 = arith.constant 0 : index
    %c0_3 = arith.constant 0 : index
    %4 = vector.load %arg7[%c0_2, %c0_3] : memref<128x128xf32, #tpu.memory_space<vmem>>, vector<128x128xf32>
    %c0_4 = arith.constant 0 : index
    %c0_5 = arith.constant 0 : index
    %5 = vector.load %arg4[%c0_4, %c0_5] : memref<128x128xf32, #tpu.memory_space<vmem>>, vector<128x128xf32>
    %cst = arith.constant dense<0.000000e+00> : vector<128x128xf32>
    %6 = tpu.matmul %3, %5, %cst {dimension_numbers = #tpu.dot_dimension_numbers<[1], [0], [0], [1], [0, 0, 1, 1], [], []>} : vector<128x128xf32>, vector<128x128xf32>, vector<128x128xf32> -> vector<128x128xf32>
    %7 = arith.addf %4, %6 : vector<128x128xf32>
    %c0_6 = arith.constant 0 : index
    %c0_7 = arith.constant 0 : index
    %8 = vector.load %arg7[%c0_6, %c0_7] : memref<128x128xf32, #tpu.memory_space<vmem>>, vector<128x128xf32>
    tpu.vector_store %arg7[%c0_6, %c0_7], %7 {strides = array<i32>} : memref<128x128xf32, #tpu.memory_space<vmem>>, vector<128x128xf32>,
    %c0_i32_8 = arith.constant 0 : i32
    %9 = arith.cmpi eq, %arg2, %c0_i32_8 : i32
    %10 = arith.extui %9 : i1 to i32
    %c0_i32_9 = arith.constant 0 : i32
    %11 = arith.cmpi ne, %10, %c0_i32_9 : i32
    scf.if %11 {
      %c0_10 = arith.constant 0 : index
      %c0_11 = arith.constant 0 : index
      %12 = vector.load %arg7[%c0_10, %c0_11] : memref<128x128xf32, #tpu.memory_space<vmem>>, vector<128x128xf32>
      %c0_12 = arith.constant 0 : index
      %c0_13 = arith.constant 0 : index
      %13 = vector.load %arg5[%c0_12, %c0_13] : memref<128x128xf32, #tpu.memory_space<vmem>>, vector<128x128xf32>
      tpu.vector_store %arg5[%c0_12, %c0_13], %12 {strides = array<i32>} : memref<128x128xf32, #tpu.memory_space<vmem>>, vector<128x128xf32>,
      %cst_14 = arith.constant dense<0.000000e+00> : vector<128xf32>
      %14 = vector.multi_reduction <add>, %12, %cst_14 [0] : vector<128x128xf32> to vector<128xf32>
      %15 = vector.shape_cast %14 : vector<128xf32> to vector<1x128xf32>
      %16 = arith.mulf %12, %12 : vector<128x128xf32>
      %cst_15 = arith.constant dense<0.000000e+00> : vector<128xf32>
      %17 = vector.multi_reduction <add>, %16, %cst_15 [0] : vector<128x128xf32> to vector<128xf32>
      %18 = vector.shape_cast %17 : vector<128xf32> to vector<1x128xf32>
      %19 = tpu.concatenate %15, %18 in 0 : vector<1x128xf32>, vector<1x128xf32> -> vector<2x128xf32>
      %c0_16 = arith.constant 0 : index
      %c0_17 = arith.constant 0 : index
      %c0_18 = arith.constant 0 : index
      %20 = vector.load %arg6[%c0_16, %c0_17, %c0_18] : memref<1x2x128xf32, #tpu.memory_space<vmem>>, vector<1x2x128xf32>
      %21 = vector.shape_cast %20 : vector<1x2x128xf32> to vector<2x128xf32>
      %22 = vector.shape_cast %19 : vector<2x128xf32> to vector<1x2x128xf32>
      tpu.vector_store %arg6[%c0_16, %c0_17, %c0_18], %22 {strides = array<i32>} : memref<1x2x128xf32, #tpu.memory_space<vmem>>, vector<1x2x128xf32>,
    } else {
    }
    return
  }
  func.func @transform_0(%arg0: i32, %arg1: i32, %arg2: i32) -> (i32, i32) {
    %c0_i32 = arith.constant 0 : i32
    return %arg0, %arg2 : i32, i32
  }
  func.func @transform_1(%arg0: i32, %arg1: i32, %arg2: i32) -> (i32, i32) {
    %c0_i32 = arith.constant 0 : i32
    return %arg2, %arg1 : i32, i32
  }
  func.func @transform_2(%arg0: i32, %arg1: i32, %arg2: i32) -> (i32, i32) {
    %c0_i32 = arith.constant 0 : i32
    return %arg0, %arg1 : i32, i32
  }
  func.func @transform_3(%arg0: i32, %arg1: i32, %arg2: i32) -> (i32, i32, i32) {
    %c0_i32 = arith.constant 0 : i32
    %c0_i32_0 = arith.constant 0 : i32
    return %arg0, %c0_i32, %arg1 : i32, i32, i32
  }
}

module attributes {stable_mosaic.version = 11 : i64} {
  func.func @_bn_add_relu_kernel(%arg0: i32, %arg1: memref<128x128xf32, #tpu.memory_space<vmem>>, %arg2: memref<128x128xf32, #tpu.memory_space<vmem>>, %arg3: memref<1x128xf32, #tpu.memory_space<vmem>>, %arg4: memref<1x128xf32, #tpu.memory_space<vmem>>, %arg5: memref<1x128xf32, #tpu.memory_space<vmem>>, %arg6: memref<1x128xf32, #tpu.memory_space<vmem>>, %arg7: memref<128x128xf32, #tpu.memory_space<vmem>>) attributes {dimension_semantics = [#tpu.dimension_semantics<parallel>], iteration_bounds = array<i64: 1>, scalar_prefetch = 0 : i64, scratch_operands = 0 : i64, tpu.core_type = #tpu.core_type<tc>, window_params = [{transform_indices = @transform_0, window_bounds = array<i64: 128, 128>}, {transform_indices = @transform_1, window_bounds = array<i64: 128, 128>}, {pipeline_mode = #tpu.pipeline_mode<synchronous>, transform_indices = @transform_2, window_bounds = array<i64: 1, 128>}, {pipeline_mode = #tpu.pipeline_mode<synchronous>, transform_indices = @transform_3, window_bounds = array<i64: 1, 128>}, {pipeline_mode = #tpu.pipeline_mode<synchronous>, transform_indices = @transform_4, window_bounds = array<i64: 1, 128>}, {pipeline_mode = #tpu.pipeline_mode<synchronous>, transform_indices = @transform_5, window_bounds = array<i64: 1, 128>}, {transform_indices = @transform_6, window_bounds = array<i64: 128, 128>}]} {
    %c0 = arith.constant 0 : index
    %c0_0 = arith.constant 0 : index
    %0 = vector.load %arg1[%c0, %c0_0] : memref<128x128xf32, #tpu.memory_space<vmem>>, vector<128x128xf32>
    %c0_1 = arith.constant 0 : index
    %c0_2 = arith.constant 0 : index
    %1 = vector.load %arg3[%c0_1, %c0_2] : memref<1x128xf32, #tpu.memory_space<vmem>>, vector<1x128xf32>
    %2 = vector.broadcast %1 : vector<1x128xf32> to vector<128x128xf32>
    %3 = arith.mulf %0, %2 : vector<128x128xf32>
    %c0_3 = arith.constant 0 : index
    %c0_4 = arith.constant 0 : index
    %4 = vector.load %arg4[%c0_3, %c0_4] : memref<1x128xf32, #tpu.memory_space<vmem>>, vector<1x128xf32>
    %5 = vector.broadcast %4 : vector<1x128xf32> to vector<128x128xf32>
    %6 = arith.addf %3, %5 : vector<128x128xf32>
    %c0_5 = arith.constant 0 : index
    %c0_6 = arith.constant 0 : index
    %7 = vector.load %arg2[%c0_5, %c0_6] : memref<128x128xf32, #tpu.memory_space<vmem>>, vector<128x128xf32>
    %c0_7 = arith.constant 0 : index
    %c0_8 = arith.constant 0 : index
    %8 = vector.load %arg5[%c0_7, %c0_8] : memref<1x128xf32, #tpu.memory_space<vmem>>, vector<1x128xf32>
    %9 = vector.broadcast %8 : vector<1x128xf32> to vector<128x128xf32>
    %10 = arith.mulf %7, %9 : vector<128x128xf32>
    %c0_9 = arith.constant 0 : index
    %c0_10 = arith.constant 0 : index
    %11 = vector.load %arg6[%c0_9, %c0_10] : memref<1x128xf32, #tpu.memory_space<vmem>>, vector<1x128xf32>
    %12 = vector.broadcast %11 : vector<1x128xf32> to vector<128x128xf32>
    %13 = arith.addf %10, %12 : vector<128x128xf32>
    %14 = arith.addf %6, %13 : vector<128x128xf32>
    %cst = arith.constant 0.000000e+00 : f32
    %15 = vector.broadcast %cst : f32 to vector<128x128xf32>
    %16 = arith.maximumf %14, %15 : vector<128x128xf32>
    %c0_11 = arith.constant 0 : index
    %c0_12 = arith.constant 0 : index
    %17 = vector.load %arg7[%c0_11, %c0_12] : memref<128x128xf32, #tpu.memory_space<vmem>>, vector<128x128xf32>
    tpu.vector_store %arg7[%c0_11, %c0_12], %16 {strides = array<i32>} : memref<128x128xf32, #tpu.memory_space<vmem>>, vector<128x128xf32>,
    return
  }
  func.func @transform_0(%arg0: i32) -> (i32, i32) {
    %c0_i32 = arith.constant 0 : i32
    %c0_i32_0 = arith.constant 0 : i32
    return %arg0, %c0_i32 : i32, i32
  }
  func.func @transform_1(%arg0: i32) -> (i32, i32) {
    %c0_i32 = arith.constant 0 : i32
    %c0_i32_0 = arith.constant 0 : i32
    return %arg0, %c0_i32 : i32, i32
  }
  func.func @transform_2(%arg0: i32) -> (i32, i32) {
    %c0_i32 = arith.constant 0 : i32
    %c0_i32_0 = arith.constant 0 : i32
    %c0_i32_1 = arith.constant 0 : i32
    return %c0_i32, %c0_i32_0 : i32, i32
  }
  func.func @transform_3(%arg0: i32) -> (i32, i32) {
    %c0_i32 = arith.constant 0 : i32
    %c0_i32_0 = arith.constant 0 : i32
    %c0_i32_1 = arith.constant 0 : i32
    return %c0_i32, %c0_i32_0 : i32, i32
  }
  func.func @transform_4(%arg0: i32) -> (i32, i32) {
    %c0_i32 = arith.constant 0 : i32
    %c0_i32_0 = arith.constant 0 : i32
    %c0_i32_1 = arith.constant 0 : i32
    return %c0_i32, %c0_i32_0 : i32, i32
  }
  func.func @transform_5(%arg0: i32) -> (i32, i32) {
    %c0_i32 = arith.constant 0 : i32
    %c0_i32_0 = arith.constant 0 : i32
    %c0_i32_1 = arith.constant 0 : i32
    return %c0_i32, %c0_i32_0 : i32, i32
  }
  func.func @transform_6(%arg0: i32) -> (i32, i32) {
    %c0_i32 = arith.constant 0 : i32
    %c0_i32_0 = arith.constant 0 : i32
    return %arg0, %c0_i32 : i32, i32
  }
}

</mosaic_0001>

<bundles_post_ra>
// kernel: bottleneck_forward.6
= control target key start
LH: loop header
LB: loop body
LE: loop exit
PB: predicated region body
PF: predicated region fallthrough
CT: control target
= control target key end

     0   :  { %s1242_s12 = smov 0   ;;  %s1244_s13 = smov 0   ;;  %s1484_s0 = inlined_call_operand.vmem [shape: f32[512,128], index: 0, kind: input, shape index: {}]   ;;  %s1485_s1 = inlined_call_operand.vmem [shape: f32[128,128], index: 1, kind: input, shape index: {}]   ;;  %s1486_s2 = inlined_call_operand.vmem [shape: f32[512,128], index: 2, kind: output, shape index: {0}]   ;;  %s1487_s3 = inlined_call_operand.vmem [shape: f32[2,2,128], index: 3, kind: output, shape index: {1}]  }
   0x1   :  { %s1246_s14 = smov 0  }
   0x2 LB: > { %s33_s15 = sadd.s32 1, %s1216_s13  ;;  %p990_p0 = scmp.ge.s32.totalorder %s1220_s14, 1  ;;  %s1220_s14 = sphi %s1246_s14, %s14_s14   ;;  %s1216_s13 = sphi %s1244_s13, %s1489_s13   ;;  %s1212_s12 = sphi %s1242_s12, %s1488_s12  }
   0x3   : > { %p35_p1 = scmp.ge.s32.totalorder %s33_s15, 2  ;;  %p185_p2 = scmp.lt.s32.totalorder %s1220_s14, 3 }
   0x5   : > { %s1491_s15 = smov (%p35_p1, %s33_s15), 0  ;;  %p186_p3 = pnand %p990_p0, %p185_p2 }
   0x6   : > { %v364_v0 = vld [vmem:[%s1485_s1] sm:$0xff] (!%p186_p3)  ;;  %v365_v1 = vld [vmem:[%s1485_s1 + $0x8] sm:$0xff] (!%p186_p3)  ;;  %v366_v2 = vld [vmem:[%s1485_s1 + $0x10] sm:$0xff] (!%p186_p3)  ;;  %s991_s22 = sshll.u32 (!%p186_p3), %s1212_s12, 5  ;;  %p257_p5 = scmp.lt.s32.totalorder (!%p186_p3), %s1212_s12, 1  ;;  %vm842_vm0 = vcmask (!%p186_p3), 1040384  }
   0x7   : > { %189 = sbr.rel (%p186_p3) target bundleno = 334 (0x14e), region = 28  ;;  %v1126_v3 = vpack.c.bf16 (!%p186_p3), %v365_v1, %v364_v0  ;;  %v367_v4 = vld [vmem:[%s1485_s1 + $0x18] sm:$0xff] (!%p186_p3)  ;;  %p231_p4 = scmp.lt.s32.totalorder (!%p186_p3), %s991_s22, 63  ;;  %v368_v6 = vld [vmem:[%s1485_s1 + $0x20] sm:$0xff] (!%p186_p3)  ;;  %v369_v7 = vld [vmem:[%s1485_s1 + $0x28] sm:$0xff] (!%p186_p3) }
   0x8   : > { %v1130_v5 = vpack.c.bf16 (!%p186_p3), %v367_v4, %v366_v2  ;;  %v1134_v8 = vpack.c.bf16 (!%p186_p3), %v369_v7, %v368_v6  ;;  %v370_v9 = vld [vmem:[%s1485_s1 + $0x30] sm:$0xff] (!%p186_p3)  ;;  %v371_v10 = vld [vmem:[%s1485_s1 + $0x38] sm:$0xff] (!%p186_p3)  ;;  %v372_v13 = vld [vmem:[%s1485_s1 + $0x40] sm:$0xff] (!%p186_p3) }
   0x9   : > { %1127 = vmatprep.subr.bf16.mxu0 (!%p186_p3), %v1126_v3  ;;  %1158 = vmatprep.subr.bf16.mxu1 (!%p186_p3), %v1126_v3  ;;  %v1138_v12 = vpack.c.bf16 (!%p186_p3), %v371_v10, %v370_v9  ;;  %v373_v14 = vld [vmem:[%s1485_s1 + $0x48] sm:$0xff] (!%p186_p3)  ;;  %v374_v17 = vld [vmem:[%s1485_s1 + $0x50] sm:$0xff] (!%p186_p3)  ;;  %v375_v18 = vld [vmem:[%s1485_s1 + $0x58] sm:$0xff] (!%p186_p3) }
   0xa   : > { %1129 = vmatpush3.bf16.msra.mxu0 (!%p186_p3), %v1126_v3  ;;  %1166 = vmatpush3.bf16.msra.mxu1 (!%p186_p3), %v1126_v3  ;;  %v1142_v16 = vpack.c.bf16 (!%p186_p3), %v373_v14, %v372_v13  ;;  %v1146_v19 = vpack.c.bf16 (!%p186_p3), %v375_v18, %v374_v17  ;;  %v376_v20 = vld [vmem:[%s1485_s1 + $0x60] sm:$0xff] (!%p186_p3)  ;;  %v377_v21 = vld [vmem:[%s1485_s1 + $0x68] sm:$0xff] (!%p186_p3)  ;;  %v378_v23 = vld [vmem:[%s1485_s1 + $0x70] sm:$0xff] (!%p186_p3) }
   0xb   : > { %1131 = vmatprep.subr.bf16.mxu0 (!%p186_p3), %v1130_v5  ;;  %1159 = vmatprep.subr.bf16.mxu1 (!%p186_p3), %v1130_v5  ;;  %v1150_v22 = vpack.c.bf16 (!%p186_p3), %v377_v21, %v376_v20  ;;  %v379_v24 = vld [vmem:[%s1485_s1 + $0x78] sm:$0xff] (!%p186_p3) }
   0xc   : > { %v1154_v25 = vpack.c.bf16 (!%p186_p3), %v379_v24, %v378_v23 }
   0xe   : > { %s1493_s22 = smov (!%p231_p4, %s991_s22), 63  ;;  %1133 = vmatpush3.bf16.msra.mxu0 %v1130_v5  ;;  %1167 = vmatpush3.bf16.msra.mxu1 %v1130_v5  ;;  %s1495_s12 = smov (!%p257_p5, %s1212_s12), 1 }
   0xf   : > { %s992_s29 = sshll.u32 %s1493_s22, 3  ;;  %1135 = vmatprep.subr.bf16.mxu0 %v1134_v8  ;;  %1160 = vmatprep.subr.bf16.mxu1 %v1134_v8  ;;  %s995_s22 = sshll.u32 %s1495_s12, 1 }
  0x10   : > { %s1295_s9 = scalar_lea.vmem %s1484_s0, %s992_s29  ;;  %s1358_s7 = scalar_lea.vmem %s1486_s2, %s992_s29 }
  0x11   : > { %v300_v11 = vld [vmem:[%s1295_s9] sm:$0xff]  ;;  %v301_v26 = vld [vmem:[%s1295_s9 + $0x8] sm:$0xff]  ;;  %v302_v27 = vld [vmem:[%s1295_s9 + $0x10] sm:$0xff] }
  0x12   : > { %1078 = vmatprep.mubr.f32.mxu0 %v300_v11  ;;  %1137 = vmatpush3.bf16.msra.mxu0 %v1134_v8  ;;  %v316_v15 = vld [vmem:[%s1295_s9 + $0x80] sm:$0xff]  ;;  %v317_v28 = vld [vmem:[%s1295_s9 + $0x88] sm:$0xff]  ;;  %v318_v29 = vld [vmem:[%s1295_s9 + $0x90] sm:$0xff] }
  0x13   : > { %1139 = vmatprep.subr.bf16.mxu0 %v1138_v12  ;;  %1168 = vmatpush3.bf16.msra.mxu1 %v1134_v8  ;;  %v303_v30 = vld [vmem:[%s1295_s9 + $0x18] sm:$0xff]  ;;  %v304_v31 = vld [vmem:[%s1295_s9 + $0x20] sm:$0xff]  ;;  %v305_v34 = vld [vmem:[%s1295_s9 + $0x28] sm:$0xff] }
  0x14   : > { %1161 = vmatprep.subr.bf16.mxu1 %v1138_v12  ;;  %1102 = vmatprep.mubr.f32.mxu1 %v316_v15  ;;  %v319_v32 = vld [vmem:[%s1295_s9 + $0x98] sm:$0xff]  ;;  %v320_v33 = vld [vmem:[%s1295_s9 + $0xa0] sm:$0xff]  ;;  %v306_v35 = vld [vmem:[%s1295_s9 + $0x30] sm:$0xff] }
  0x15   : > { %v321_v36 = vld [vmem:[%s1295_s9 + $0xa8] sm:$0xff]  ;;  %v322_v37 = vld [vmem:[%s1295_s9 + $0xb0] sm:$0xff]  ;;  %v307_v38 = vld [vmem:[%s1295_s9 + $0x38] sm:$0xff] }
  0x16   : > { %1141 = vmatpush3.bf16.msra.mxu0 %v1138_v12  ;;  %v308_v39 = vld [vmem:[%s1295_s9 + $0x40] sm:$0xff]  ;;  %v323_v40 = vld [vmem:[%s1295_s9 + $0xb8] sm:$0xff]  ;;  %v309_v42 = vld [vmem:[%s1295_s9 + $0x48] sm:$0xff] }
  0x17   : > { %1143 = vmatprep.subr.bf16.mxu0 %v1142_v16  ;;  %1169 = vmatpush3.bf16.msra.mxu1 %v1138_v12  ;;  %v324_v41 = vld [vmem:[%s1295_s9 + $0xc0] sm:$0xff]  ;;  %v310_v43 = vld [vmem:[%s1295_s9 + $0x50] sm:$0xff]  ;;  %v325_v44 = vld [vmem:[%s1295_s9 + $0xc8] sm:$0xff] }
  0x18   : > { %1162 = vmatprep.subr.bf16.mxu1 %v1142_v16  ;;  %v326_v45 = vld [vmem:[%s1295_s9 + $0xd0] sm:$0xff]  ;;  %v311_v46 = vld [vmem:[%s1295_s9 + $0x58] sm:$0xff]  ;;  %v312_v47 = vld [vmem:[%s1295_s9 + $0x60] sm:$0xff] }
  0x19   : > { %v327_v48 = vld [vmem:[%s1295_s9 + $0xd8] sm:$0xff]  ;;  %v328_v49 = vld [vmem:[%s1295_s9 + $0xe0] sm:$0xff]  ;;  %v313_v50 = vld [vmem:[%s1295_s9 + $0x68] sm:$0xff] }
  0x1a   : > { %1145 = vmatpush3.bf16.msra.mxu0 %v1142_v16  ;;  %v314_v51 = vld [vmem:[%s1295_s9 + $0x70] sm:$0xff]  ;;  %v329_v52 = vld [vmem:[%s1295_s9 + $0xe8] sm:$0xff]  ;;  %v315_v54 = vld [vmem:[%s1295_s9 + $0x78] sm:$0xff] }
  0x1b   : > { %1147 = vmatprep.subr.bf16.mxu0 %v1146_v19  ;;  %1170 = vmatpush3.bf16.msra.mxu1 %v1142_v16  ;;  %v330_v53 = vld [vmem:[%s1295_s9 + $0xf0] sm:$0xff]  ;;  %v331_v55 = vld [vmem:[%s1295_s9 + $0xf8] sm:$0xff]  ;;  %s263_s9 = scalar_lea.vmem %s1487_s3, %s995_s22 }
  0x1c   : > { %1163 = vmatprep.subr.bf16.mxu1 %v1146_v19 }
  0x1e   : > { %1149 = vmatpush3.bf16.msra.mxu0 %v1146_v19 }
  0x1f   : > { %1151 = vmatprep.subr.bf16.mxu0 %v1150_v22  ;;  %1171 = vmatpush3.bf16.msra.mxu1 %v1146_v19 }
  0x20   : > { %1164 = vmatprep.subr.bf16.mxu1 %v1150_v22 }
  0x22   : > { %1153 = vmatpush3.bf16.msra.mxu0 %v1150_v22 }
  0x23   : > { %1155 = vmatprep.subr.bf16.mxu0 %v1154_v25  ;;  %1172 = vmatpush3.bf16.msra.mxu1 %v1150_v22 }
  0x24   : > { %1165 = vmatprep.subr.bf16.mxu1 %v1154_v25 }
  0x26   : > { %1157 = vmatpush3.bf16.msra.mxu0 %v1154_v25 }
  0x27   : > { %1173 = vmatpush3.bf16.msra.mxu1 %v1154_v25 }
  0x29   : > { %1079 = vmatmul.mubr.f32.vlgmr.msra.gmra.mrb[0].mxu0 %v301_v26 }
  0x2a   : > { %1081 = vmatprep.mubr.f32.mxu0 %v302_v27  ;;  %1103 = vmatmul.mubr.f32.vlgmr.msra.gmra.mrb[0].mxu1 %v317_v28 }
  0x2b   : > { %1105 = vmatprep.mubr.f32.mxu1 %v318_v29 }
  0x2d   : > { %1082 = vmatmul.mubr.f32.gmra.mrb[2].mxu0 %v303_v30 }
  0x2e   : > { %1084 = vmatprep.mubr.f32.mxu0 %v304_v31  ;;  %1106 = vmatmul.mubr.f32.gmra.mrb[2].mxu1 %v319_v32 }
  0x2f   : > { %1108 = vmatprep.mubr.f32.mxu1 %v320_v33 }
  0x31   : > { %1085 = vmatmul.mubr.f32.gmra.mrb[4].mxu0 %v305_v34 }
  0x32   : > { %1087 = vmatprep.mubr.f32.mxu0 %v306_v35  ;;  %1109 = vmatmul.mubr.f32.gmra.mrb[4].mxu1 %v321_v36 }
  0x33   : > { %1111 = vmatprep.mubr.f32.mxu1 %v322_v37 }
  0x35   : > { %1088 = vmatmul.mubr.f32.gmra.mrb[6].mxu0 %v307_v38 }
  0x36   : > { %1090 = vmatprep.mubr.f32.mxu0 %v308_v39  ;;  %1112 = vmatmul.mubr.f32.gmra.mrb[6].mxu1 %v323_v40 }
  0x37   : > { %1114 = vmatprep.mubr.f32.mxu1 %v324_v41 }
  0x39   : > { %1091 = vmatmul.mubr.f32.gmra.mrb[8].mxu0 %v309_v42 }
  0x3a   : > { %1093 = vmatprep.mubr.f32.mxu0 %v310_v43  ;;  %1115 = vmatmul.mubr.f32.gmra.mrb[8].mxu1 %v325_v44 }
  0x3b   : > { %1117 = vmatprep.mubr.f32.mxu1 %v326_v45 }
  0x3d   : > { %1094 = vmatmul.mubr.f32.gmra.mrb[10].mxu0 %v311_v46 }
  0x3e   : > { %1096 = vmatprep.mubr.f32.mxu0 %v312_v47  ;;  %1118 = vmatmul.mubr.f32.gmra.mrb[10].mxu1 %v327_v48 }
  0x3f   : > { %1120 = vmatprep.mubr.f32.mxu1 %v328_v49 }
  0x41   : > { %1097 = vmatmul.mubr.f32.gmra.mrb[12].mxu0 %v313_v50 }
  0x42   : > { %1099 = vmatprep.mubr.f32.mxu0 %v314_v51  ;;  %1121 = vmatmul.mubr.f32.gmra.mrb[12].mxu1 %v329_v52 }
  0x43   : > { %1123 = vmatprep.mubr.f32.mxu1 %v330_v53 }
  0x45   : > { %1100 = vmatmul.mubr.f32.gmra.mrb[14].mxu0 %v315_v54 }
  0x46   : > { %1124 = vmatmul.mubr.f32.gmra.mrb[14].mxu1 %v331_v55 }
  0xfc   : > { %v1080_v56 = vpop.f32.mrb[0].mxu0 }
  0xfd   : > { %705 = vst [vmem:[%s1358_s7 + $0x8] sm:$0xff] %v1080_v56  ;;  %v774_v57 = vmul.f32 %v1080_v56, %v1080_v56  ;;  %v446_v58 = vpop.f32.mrb[1].mxu0  ;;  %v1361_v59 = vpop.f32.mrb[0].mxu1 }
  0xfe   : > { %704 = vst [vmem:[%s1358_s7] sm:$0xff] %v446_v58  ;;  %v736_v60 = vadd.f32 %v1080_v56, %v446_v58  ;;  %v773_v61 = vmul.f32 %v446_v58, %v446_v58  ;;  %721 = vst [vmem:[%s1358_s7 + $0x88] sm:$0xff] %v1361_v59  ;;  %v1366_v62 = vpop.f32.mrb[1].mxu1 }
  0xff   : > { %720 = vst [vmem:[%s1358_s7 + $0x80] sm:$0xff] %v1366_v62 }
 0x100   : > { %v805_v63 = vadd.f32 %v774_v57, %v773_v61  ;;  %v1083_v0 = vpop.f32.mrb[2].mxu0 }
 0x101   : > { %707 = vst [vmem:[%s1358_s7 + $0x18] sm:$0xff] %v1083_v0  ;;  %v456_v1 = vpop.f32.mrb[3].mxu0  ;;  %v1371_v2 = vpop.f32.mrb[2].mxu1  ;;  %v776_v6 = vmul.f32 %v1083_v0, %v1083_v0 }
 0x102   : > { %706 = vst [vmem:[%s1358_s7 + $0x10] sm:$0xff] %v456_v1  ;;  %v737_v3 = vadd.f32 %v736_v60, %v456_v1  ;;  %v775_v4 = vmul.f32 %v456_v1, %v456_v1  ;;  %723 = vst [vmem:[%s1358_s7 + $0x98] sm:$0xff] %v1371_v2  ;;  %v1376_v5 = vpop.f32.mrb[3].mxu1 }
 0x103   : > { %722 = vst [vmem:[%s1358_s7 + $0x90] sm:$0xff] %v1376_v5 }
 0x104   : > { %v806_v7 = vadd.f32 %v805_v63, %v775_v4  ;;  %v1086_v8 = vpop.f32.mrb[4].mxu0  ;;  %v738_v9 = vadd.f32 %v1083_v0, %v737_v3 }
 0x105   : > { %709 = vst [vmem:[%s1358_s7 + $0x28] sm:$0xff] %v1086_v8  ;;  %v466_v10 = vpop.f32.mrb[5].mxu0  ;;  %v1381_v11 = vpop.f32.mrb[4].mxu1  ;;  %v778_v16 = vmul.f32 %v1086_v8, %v1086_v8 }
 0x106   : > { %708 = vst [vmem:[%s1358_s7 + $0x20] sm:$0xff] %v466_v10  ;;  %v739_v12 = vadd.f32 %v738_v9, %v466_v10  ;;  %v777_v13 = vmul.f32 %v466_v10, %v466_v10  ;;  %v807_v14 = vadd.f32 %v806_v7, %v776_v6  ;;  %725 = vst [vmem:[%s1358_s7 + $0xa8] sm:$0xff] %v1381_v11  ;;  %v1386_v15 = vpop.f32.mrb[5].mxu1 }
 0x107   : > { %724 = vst [vmem:[%s1358_s7 + $0xa0] sm:$0xff] %v1386_v15  ;;  %v789_v9 = vmul.f32 %v1366_v62, %v1366_v62 }
 0x108   : > { %v808_v17 = vadd.f32 %v807_v14, %v777_v13  ;;  %v1089_v18 = vpop.f32.mrb[6].mxu0  ;;  %v740_v19 = vadd.f32 %v1086_v8, %v739_v12  ;;  %v790_v13 = vmul.f32 %v1361_v59, %v1361_v59 }
 0x109   : > { %711 = vst [vmem:[%s1358_s7 + $0x38] sm:$0xff] %v1089_v18  ;;  %v476_v20 = vpop.f32.mrb[7].mxu0  ;;  %v1391_v21 = vpop.f32.mrb[6].mxu1  ;;  %v780_v26 = vmul.f32 %v1089_v18, %v1089_v18 }
 0x10a   : > { %710 = vst [vmem:[%s1358_s7 + $0x30] sm:$0xff] %v476_v20  ;;  %v741_v22 = vadd.f32 %v740_v19, %v476_v20  ;;  %v779_v23 = vmul.f32 %v476_v20, %v476_v20  ;;  %v809_v24 = vadd.f32 %v808_v17, %v778_v16  ;;  %727 = vst [vmem:[%s1358_s7 + $0xb8] sm:$0xff] %v1391_v21  ;;  %v1396_v25 = vpop.f32.mrb[7].mxu1 }
 0x10b   : > { %726 = vst [vmem:[%s1358_s7 + $0xb0] sm:$0xff] %v1396_v25  ;;  %v791_v17 = vmul.f32 %v1376_v5, %v1376_v5  ;;  %v792_v20 = vmul.f32 %v1371_v2, %v1371_v2 }
 0x10c   : > { %v810_v27 = vadd.f32 %v809_v24, %v779_v23  ;;  %v1092_v28 = vpop.f32.mrb[8].mxu0  ;;  %v742_v29 = vadd.f32 %v1089_v18, %v741_v22 }
 0x10d   : > { %713 = vst [vmem:[%s1358_s7 + $0x48] sm:$0xff] %v1092_v28  ;;  %v486_v30 = vpop.f32.mrb[9].mxu0  ;;  %v1401_v31 = vpop.f32.mrb[8].mxu1  ;;  %v782_v36 = vmul.f32 %v1092_v28, %v1092_v28 }
 0x10e   : > { %712 = vst [vmem:[%s1358_s7 + $0x40] sm:$0xff] %v486_v30  ;;  %v743_v32 = vadd.f32 %v742_v29, %v486_v30  ;;  %v781_v33 = vmul.f32 %v486_v30, %v486_v30  ;;  %v811_v34 = vadd.f32 %v810_v27, %v780_v26  ;;  %729 = vst [vmem:[%s1358_s7 + $0xc8] sm:$0xff] %v1401_v31  ;;  %v1406_v35 = vpop.f32.mrb[9].mxu1 }
 0x10f   : > { %728 = vst [vmem:[%s1358_s7 + $0xc0] sm:$0xff] %v1406_v35 }
 0x110   : > { %v812_v37 = vadd.f32 %v811_v34, %v781_v33  ;;  %v1095_v38 = vpop.f32.mrb[10].mxu0  ;;  %v744_v39 = vadd.f32 %v1092_v28, %v743_v32 }
 0x111   : > { %715 = vst [vmem:[%s1358_s7 + $0x58] sm:$0xff] %v1095_v38  ;;  %v496_v40 = vpop.f32.mrb[11].mxu0  ;;  %v1411_v41 = vpop.f32.mrb[10].mxu1  ;;  %v784_v46 = vmul.f32 %v1095_v38, %v1095_v38 }
 0x112   : > { %714 = vst [vmem:[%s1358_s7 + $0x50] sm:$0xff] %v496_v40  ;;  %v745_v42 = vadd.f32 %v744_v39, %v496_v40  ;;  %v783_v43 = vmul.f32 %v496_v40, %v496_v40  ;;  %v813_v44 = vadd.f32 %v812_v37, %v782_v36  ;;  %731 = vst [vmem:[%s1358_s7 + $0xd8] sm:$0xff] %v1411_v41  ;;  %v1416_v45 = vpop.f32.mrb[11].mxu1 }
 0x113   : > { %730 = vst [vmem:[%s1358_s7 + $0xd0] sm:$0xff] %v1416_v45 }
 0x114   : > { %v814_v47 = vadd.f32 %v813_v44, %v783_v43  ;;  %v1098_v48 = vpop.f32.mrb[12].mxu0  ;;  %v746_v49 = vadd.f32 %v1095_v38, %v745_v42 }
 0x115   : > { %717 = vst [vmem:[%s1358_s7 + $0x68] sm:$0xff] %v1098_v48  ;;  %v506_v50 = vpop.f32.mrb[13].mxu0  ;;  %v1421_v51 = vpop.f32.mrb[12].mxu1  ;;  %v786_v56 = vmul.f32 %v1098_v48, %v1098_v48 }
 0x116   : > { %716 = vst [vmem:[%s1358_s7 + $0x60] sm:$0xff] %v506_v50  ;;  %v747_v52 = vadd.f32 %v746_v49, %v506_v50  ;;  %v785_v53 = vmul.f32 %v506_v50, %v506_v50  ;;  %v815_v54 = vadd.f32 %v814_v47, %v784_v46  ;;  %733 = vst [vmem:[%s1358_s7 + $0xe8] sm:$0xff] %v1421_v51  ;;  %v586_v55 = vpop.f32.mrb[13].mxu1 }
 0x117   : > { %732 = vst [vmem:[%s1358_s7 + $0xe0] sm:$0xff] %v586_v55  ;;  %v801_v43 = vmul.f32 %v586_v55, %v586_v55  ;;  %v802_v47 = vmul.f32 %v1421_v51, %v1421_v51 }
 0x118   : > { %v816_v57 = vadd.f32 %v815_v54, %v785_v53  ;;  %v1101_v58 = vpop.f32.mrb[14].mxu0  ;;  %v748_v60 = vadd.f32 %v1098_v48, %v747_v52 }
 0x119   : > { %719 = vst [vmem:[%s1358_s7 + $0x78] sm:$0xff] %v1101_v58  ;;  %v516_v61 = vpop.f32.mrb[15].mxu0  ;;  %v1125_v63 = vpop.f32.mrb[14].mxu1  ;;  %v788_v6 = vmul.f32 %v1101_v58, %v1101_v58 }
 0x11a   : > { %718 = vst [vmem:[%s1358_s7 + $0x70] sm:$0xff] %v516_v61  ;;  %v749_v0 = vadd.f32 %v748_v60, %v516_v61  ;;  %v787_v1 = vmul.f32 %v516_v61, %v516_v61  ;;  %v817_v3 = vadd.f32 %v816_v57, %v786_v56  ;;  %735 = vst [vmem:[%s1358_s7 + $0xf8] sm:$0xff] %v1125_v63  ;;  %v596_v4 = vpop.f32.mrb[15].mxu1 }
 0x11b   : > { %734 = vst [vmem:[%s1358_s7 + $0xf0] sm:$0xff] %v596_v4  ;;  %v803_v49 = vmul.f32 %v596_v4, %v596_v4  ;;  %v804_v52 = vmul.f32 %v1125_v63, %v1125_v63 }
 0x11c   : > { %v750_v7 = vadd.f32 %v1101_v58, %v749_v0  ;;  %v818_v8 = vadd.f32 %v817_v3, %v787_v1 }
 0x11e   : > { %v819_v10 = vadd.f32 %v818_v8, %v788_v6  ;;  %v751_v12 = vadd.f32 %v750_v7, %v1366_v62  ;;  %v793_v62 = vmul.f32 %v1386_v15, %v1386_v15 }
 0x120   : > { %v820_v14 = vadd.f32 %v819_v10, %v789_v9  ;;  %v752_v16 = vadd.f32 %v1361_v59, %v751_v12  ;;  %v794_v59 = vmul.f32 %v1381_v11, %v1381_v11 }
 0x122   : > { %v753_v18 = vadd.f32 %v752_v16, %v1376_v5  ;;  %v821_v19 = vadd.f32 %v820_v14, %v790_v13  ;;  %v795_v5 = vmul.f32 %v1396_v25, %v1396_v25 }
 0x124   : > { %v822_v22 = vadd.f32 %v821_v19, %v791_v17  ;;  %v754_v23 = vadd.f32 %v1371_v2, %v753_v18  ;;  %v796_v2 = vmul.f32 %v1391_v21, %v1391_v21 }
 0x126   : > { %v755_v24 = vadd.f32 %v754_v23, %v1386_v15  ;;  %v823_v26 = vadd.f32 %v822_v22, %v792_v20  ;;  %v797_v15 = vmul.f32 %v1406_v35, %v1406_v35 }
 0x128   : > { %v824_v27 = vadd.f32 %v823_v26, %v793_v62  ;;  %v756_v28 = vadd.f32 %v1381_v11, %v755_v24  ;;  %v798_v11 = vmul.f32 %v1401_v31, %v1401_v31 }
 0x12a   : > { %v757_v29 = vadd.f32 %v756_v28, %v1396_v25  ;;  %v825_v30 = vadd.f32 %v824_v27, %v794_v59  ;;  %v799_v25 = vmul.f32 %v1416_v45, %v1416_v45 }
 0x12c   : > { %v826_v32 = vadd.f32 %v825_v30, %v795_v5  ;;  %v758_v33 = vadd.f32 %v1391_v21, %v757_v29  ;;  %v800_v21 = vmul.f32 %v1411_v41, %v1411_v41 }
 0x12e   : > { %v759_v34 = vadd.f32 %v758_v33, %v1406_v35  ;;  %v827_v36 = vadd.f32 %v826_v32, %v796_v2 }
 0x130   : > { %v828_v37 = vadd.f32 %v827_v36, %v797_v15  ;;  %v760_v38 = vadd.f32 %v1401_v31, %v759_v34 }
 0x132   : > { %v761_v39 = vadd.f32 %v760_v38, %v1416_v45  ;;  %v829_v40 = vadd.f32 %v828_v37, %v798_v11 }
 0x134   : > { %v830_v42 = vadd.f32 %v829_v40, %v799_v25  ;;  %v762_v35 = vadd.f32 %v1411_v41, %v761_v39 }
 0x136   : > { %v763_v44 = vadd.f32 %v762_v35, %v586_v55  ;;  %v831_v46 = vadd.f32 %v830_v42, %v800_v21 }
 0x138   : > { %v832_v31 = vadd.f32 %v831_v46, %v801_v43  ;;  %v764_v48 = vadd.f32 %v1421_v51, %v763_v44 }
 0x13a   : > { %v765_v45 = vadd.f32 %v764_v48, %v596_v4  ;;  %v833_v50 = vadd.f32 %v832_v31, %v802_v47 }
 0x13c   : > { %v766_v53 = vadd.f32 %v1125_v63, %v765_v45  ;;  %v834_v54 = vadd.f32 %v833_v50, %v803_v49 }
 0x13e   : > { %v767_v56 = vrot.slane %v766_v53, 4  ;;  %v835_v57 = vadd.f32 %v834_v54, %v804_v52 }
 0x140   : > { %v768_v41 = vadd.f32 %v767_v56, %v766_v53  ;;  %v836_v58 = vrot.slane %v835_v57, 4 }
 0x142   : > { %v769_v55 = vrot.slane %v768_v41, 2  ;;  %v837_v60 = vadd.f32 %v836_v58, %v835_v57 }
 0x144   : > { %v770_v61 = vadd.f32 %v769_v55, %v768_v41  ;;  %v838_v0 = vrot.slane %v837_v60, 2 }
 0x146   : > { %v771_v1 = vrot.slane %v770_v61, 1  ;;  %v839_v3 = vadd.f32 %v838_v0, %v837_v60 }
 0x148   : > { %v840_v51 = vrot.slane %v839_v3, 1  ;;  %v772_v63 = vadd.f32 %v771_v1, %v770_v61 }
 0x14a   : > { %v841_v4 = vadd.f32 %v840_v51, %v839_v3 }
 0x14c   : > { %v843_v6 = vsel %vm842_vm0, %v772_v63, %v841_v4 }
 0x14d   : > { %844 = vst [vmem:[%s263_s9] sm:$0x3] %v843_v6 }
 0x14e PF: > { %s14_s14 = sadd.s32 1, %s1220_s14   ;;  %s1488_s12 = smov %s1216_s13 }
 0x14f   : > { %p11_p6 = scmp.ge.s32.totalorder %s14_s14, 4   ;;  %s1489_s13 = smov %s1491_s15 }
 0x151   :  { %13 = sbr.rel (!%p11_p6) target bundleno = 2 (0x2), region = 81 }

// kernel: bottleneck_forward.7
= control target key start
LH: loop header
LB: loop body
LE: loop exit
PB: predicated region body
PF: predicated region fallthrough
CT: control target
= control target key end

     0   :  { %s453_s12 = smov 0   ;;  %s643_s0 = inlined_call_operand.vmem [shape: f32[512,128], index: 0, kind: input, shape index: {}, may-alias: {0,3}]   ;;  %s644_s1 = inlined_call_operand.vmem [shape: f32[1,128], index: 1, kind: input, shape index: {}]   ;;  %s645_s2 = inlined_call_operand.vmem [shape: f32[1,128], index: 2, kind: input, shape index: {}]   ;;  %s646_s3 = inlined_call_operand.vmem [shape: f32[512,128], index: 3, kind: output, shape index: {}, may-alias: {0,3}]  }
   0x1 LB: > { %s404_s13 = sadd.s32 4294967295, %s431_s12   ;;  %p408_p0 = scmp.ge.s32.totalorder %s431_s12, 1  ;;  %s431_s12 = sphi %s453_s12, %s13_s12  }
   0x2   : > { %p138_p1 = scmp.lt.s32.totalorder %s431_s12, 3 }
   0x4   : > { %p139_p2 = pnand %p408_p0, %p138_p1 }
   0x5   : > { %s409_s14 = sshll.u32 (!%p139_p2), %s404_s13, 5  ;;  %v467_v0 = vld [vmem:[%s644_s1] ss:$0 sm:$0xff] (!%p139_p2) }
   0x6   : > { %142 = sbr.rel (%p139_p2) target bundleno = 46 (0x2e), region = 32  ;;  %p163_p3 = scmp.lt.s32.totalorder (!%p139_p2), %s409_s14, 63  ;;  %v479_v1 = vld [vmem:[%s645_s2] ss:$0 sm:$0xff] (!%p139_p2) }
   0xd   : > { %s648_s14 = smov (!%p163_p3, %s409_s14), 63 }
   0xe   : > { %s410_s15 = sshll.u32 %s648_s14, 3 }
   0xf   : > { %s474_s20 = scalar_lea.vmem %s643_s0, %s410_s15  ;;  %s521_s25 = scalar_lea.vmem %s646_s3, %s410_s15 }
  0x10   : > { %v174_v2 = vld [vmem:[%s474_s20] sm:$0xff]  ;;  %v175_v3 = vld [vmem:[%s474_s20 + $0x8] sm:$0xff]  ;;  %v176_v4 = vld [vmem:[%s474_s20 + $0x10] sm:$0xff] }
  0x11   : > { %v177_v5 = vld [vmem:[%s474_s20 + $0x18] sm:$0xff]  ;;  %v178_v6 = vld [vmem:[%s474_s20 + $0x20] sm:$0xff]  ;;  %v179_v7 = vld [vmem:[%s474_s20 + $0x28] sm:$0xff]  ;;  %v213_v8 = vmul.f32 %v467_v0, %v174_v2  ;;  %v214_v9 = vmul.f32 %v467_v0, %v175_v3  ;;  %v215_v10 = vmul.f32 %v467_v0, %v176_v4 }
  0x12   : > { %v180_v11 = vld [vmem:[%s474_s20 + $0x30] sm:$0xff]  ;;  %v181_v12 = vld [vmem:[%s474_s20 + $0x38] sm:$0xff]  ;;  %v216_v13 = vmul.f32 %v467_v0, %v177_v5  ;;  %v217_v14 = vmul.f32 %v467_v0, %v178_v6  ;;  %v218_v15 = vmul.f32 %v467_v0, %v179_v7  ;;  %v182_v20 = vld [vmem:[%s474_s20 + $0x40] sm:$0xff] }
  0x13   : > { %v252_v16 = vadd.f32 %v479_v1, %v213_v8  ;;  %v253_v17 = vadd.f32 %v479_v1, %v214_v9  ;;  %v254_v18 = vadd.f32 %v479_v1, %v215_v10  ;;  %v219_v19 = vmul.f32 %v467_v0, %v180_v11  ;;  %v183_v21 = vld [vmem:[%s474_s20 + $0x48] sm:$0xff]  ;;  %v184_v22 = vld [vmem:[%s474_s20 + $0x50] sm:$0xff]  ;;  %v185_v27 = vld [vmem:[%s474_s20 + $0x58] sm:$0xff] }
  0x14   : > { %v255_v23 = vadd.f32 %v479_v1, %v216_v13  ;;  %v256_v24 = vadd.f32 %v479_v1, %v217_v14  ;;  %v257_v25 = vadd.f32 %v479_v1, %v218_v15  ;;  %v220_v26 = vmul.f32 %v467_v0, %v181_v12  ;;  %v186_v28 = vld [vmem:[%s474_s20 + $0x60] sm:$0xff]  ;;  %v187_v29 = vld [vmem:[%s474_s20 + $0x68] sm:$0xff]  ;;  %v188_v34 = vld [vmem:[%s474_s20 + $0x70] sm:$0xff] }
  0x15   : > { %v284_v30 = vmax.f32 %v252_v16, 0.0  ;;  %v285_v31 = vmax.f32 %v253_v17, 0.0  ;;  %v286_v32 = vmax.f32 %v254_v18, 0.0  ;;  %v258_v33 = vadd.f32 %v479_v1, %v219_v19  ;;  %v189_v39 = vld [vmem:[%s474_s20 + $0x78] sm:$0xff]  ;;  %v190_v44 = vld [vmem:[%s474_s20 + $0x80] sm:$0xff]  ;;  %v191_v45 = vld [vmem:[%s474_s20 + $0x88] sm:$0xff] }
  0x16   : > { %v287_v35 = vmax.f32 %v255_v23, 0.0  ;;  %v288_v36 = vmax.f32 %v256_v24, 0.0  ;;  %v289_v37 = vmax.f32 %v257_v25, 0.0  ;;  %v259_v38 = vadd.f32 %v479_v1, %v220_v26  ;;  %v192_v46 = vld [vmem:[%s474_s20 + $0x90] sm:$0xff]  ;;  %v193_v47 = vld [vmem:[%s474_s20 + $0x98] sm:$0xff]  ;;  %v194_v48 = vld [vmem:[%s474_s20 + $0xa0] sm:$0xff] }
  0x17   : > { %v290_v40 = vmax.f32 %v258_v33, 0.0  ;;  %v221_v41 = vmul.f32 %v467_v0, %v182_v20  ;;  %v222_v42 = vmul.f32 %v467_v0, %v183_v21  ;;  %v223_v43 = vmul.f32 %v467_v0, %v184_v22  ;;  %v195_v49 = vld [vmem:[%s474_s20 + $0xa8] sm:$0xff]  ;;  %v196_v50 = vld [vmem:[%s474_s20 + $0xb0] sm:$0xff]  ;;  %v197_v51 = vld [vmem:[%s474_s20 + $0xb8] sm:$0xff] }
  0x18   : > { %v532_v52 = vld [vmem:[%s474_s20 + $0xc0] sm:$0xff]  ;;  %v535_v53 = vld [vmem:[%s474_s20 + $0xc8] sm:$0xff]  ;;  %v291_v54 = vmax.f32 %v259_v38, 0.0  ;;  %v224_v55 = vmul.f32 %v467_v0, %v185_v27  ;;  %v225_v56 = vmul.f32 %v467_v0, %v186_v28  ;;  %v226_v57 = vmul.f32 %v467_v0, %v187_v29  ;;  %v541_v58 = vld [vmem:[%s474_s20 + $0xd0] sm:$0xff] }
  0x19   : > { %v544_v59 = vld [vmem:[%s474_s20 + $0xd8] sm:$0xff]  ;;  %v547_v60 = vld [vmem:[%s474_s20 + $0xe0] sm:$0xff]  ;;  %v260_v61 = vadd.f32 %v479_v1, %v221_v41  ;;  %v261_v62 = vadd.f32 %v479_v1, %v222_v42  ;;  %v262_v63 = vadd.f32 %v479_v1, %v223_v43  ;;  %v227_v2 = vmul.f32 %v467_v0, %v188_v34  ;;  %v554_v3 = vld [vmem:[%s474_s20 + $0xe8] sm:$0xff] }
  0x1a   : > { %v557_v4 = vld [vmem:[%s474_s20 + $0xf0] sm:$0xff]  ;;  %v560_v5 = vld [vmem:[%s474_s20 + $0xf8] sm:$0xff]  ;;  %v263_v6 = vadd.f32 %v479_v1, %v224_v55  ;;  %v264_v7 = vadd.f32 %v479_v1, %v225_v56  ;;  %v265_v8 = vadd.f32 %v479_v1, %v226_v57  ;;  %v228_v9 = vmul.f32 %v467_v0, %v189_v39 }
  0x1b   : > { %316 = vst [vmem:[%s521_s25] sm:$0xff] %v284_v30  ;;  %317 = vst [vmem:[%s521_s25 + $0x8] sm:$0xff] %v285_v31  ;;  %v292_v10 = vmax.f32 %v260_v61, 0.0  ;;  %v293_v11 = vmax.f32 %v261_v62, 0.0  ;;  %v294_v12 = vmax.f32 %v262_v63, 0.0  ;;  %v266_v13 = vadd.f32 %v479_v1, %v227_v2 }
  0x1c   : > { %318 = vst [vmem:[%s521_s25 + $0x10] sm:$0xff] %v286_v32  ;;  %319 = vst [vmem:[%s521_s25 + $0x18] sm:$0xff] %v287_v35  ;;  %v295_v14 = vmax.f32 %v263_v6, 0.0  ;;  %v296_v15 = vmax.f32 %v264_v7, 0.0  ;;  %v297_v16 = vmax.f32 %v265_v8, 0.0  ;;  %v267_v17 = vadd.f32 %v479_v1, %v228_v9 }
  0x1d   : > { %320 = vst [vmem:[%s521_s25 + $0x20] sm:$0xff] %v288_v36  ;;  %321 = vst [vmem:[%s521_s25 + $0x28] sm:$0xff] %v289_v37  ;;  %v298_v18 = vmax.f32 %v266_v13, 0.0  ;;  %v229_v19 = vmul.f32 %v467_v0, %v190_v44  ;;  %v230_v20 = vmul.f32 %v467_v0, %v191_v45  ;;  %v231_v21 = vmul.f32 %v467_v0, %v192_v46 }
  0x1e   : > { %322 = vst [vmem:[%s521_s25 + $0x30] sm:$0xff] %v290_v40  ;;  %323 = vst [vmem:[%s521_s25 + $0x38] sm:$0xff] %v291_v54  ;;  %v299_v22 = vmax.f32 %v267_v17, 0.0  ;;  %v232_v23 = vmul.f32 %v467_v0, %v193_v47  ;;  %v233_v24 = vmul.f32 %v467_v0, %v194_v48  ;;  %v234_v25 = vmul.f32 %v467_v0, %v195_v49 }
  0x1f   : > { %324 = vst [vmem:[%s521_s25 + $0x40] sm:$0xff] %v292_v10  ;;  %325 = vst [vmem:[%s521_s25 + $0x48] sm:$0xff] %v293_v11  ;;  %v268_v26 = vadd.f32 %v479_v1, %v229_v19  ;;  %v269_v27 = vadd.f32 %v479_v1, %v230_v20  ;;  %v270_v28 = vadd.f32 %v479_v1, %v231_v21 }
  0x20   : > { %326 = vst [vmem:[%s521_s25 + $0x50] sm:$0xff] %v294_v12  ;;  %327 = vst [vmem:[%s521_s25 + $0x58] sm:$0xff] %v295_v14  ;;  %v235_v29 = vmul.f32 %v467_v0, %v196_v50  ;;  %v271_v30 = vadd.f32 %v479_v1, %v232_v23  ;;  %v272_v31 = vadd.f32 %v479_v1, %v233_v24 }
  0x21   : > { %328 = vst [vmem:[%s521_s25 + $0x60] sm:$0xff] %v296_v15  ;;  %329 = vst [vmem:[%s521_s25 + $0x68] sm:$0xff] %v297_v16  ;;  %v273_v32 = vadd.f32 %v479_v1, %v234_v25  ;;  %v236_v33 = vmul.f32 %v467_v0, %v197_v51  ;;  %v300_v34 = vmax.f32 %v268_v26, 0.0  ;;  %v301_v35 = vmax.f32 %v269_v27, 0.0 }
  0x22   : > { %330 = vst [vmem:[%s521_s25 + $0x70] sm:$0xff] %v298_v18  ;;  %331 = vst [vmem:[%s521_s25 + $0x78] sm:$0xff] %v299_v22  ;;  %v302_v36 = vmax.f32 %v270_v28, 0.0  ;;  %v274_v37 = vadd.f32 %v479_v1, %v235_v29  ;;  %v303_v38 = vmax.f32 %v271_v30, 0.0  ;;  %v304_v39 = vmax.f32 %v272_v31, 0.0 }
  0x23   : > { %v305_v40 = vmax.f32 %v273_v32, 0.0  ;;  %v275_v41 = vadd.f32 %v479_v1, %v236_v33  ;;  %332 = vst [vmem:[%s521_s25 + $0x80] sm:$0xff] %v300_v34  ;;  %333 = vst [vmem:[%s521_s25 + $0x88] sm:$0xff] %v301_v35  ;;  %v237_v43 = vmul.f32 %v467_v0, %v532_v52  ;;  %v238_v44 = vmul.f32 %v467_v0, %v535_v53 }
  0x24   : > { %334 = vst [vmem:[%s521_s25 + $0x90] sm:$0xff] %v302_v36  ;;  %v306_v42 = vmax.f32 %v274_v37, 0.0  ;;  %v239_v45 = vmul.f32 %v467_v0, %v541_v58  ;;  %335 = vst [vmem:[%s521_s25 + $0x98] sm:$0xff] %v303_v38  ;;  %v240_v47 = vmul.f32 %v467_v0, %v544_v59  ;;  %v241_v48 = vmul.f32 %v467_v0, %v547_v60 }
  0x25   : > { %336 = vst [vmem:[%s521_s25 + $0xa0] sm:$0xff] %v304_v39  ;;  %337 = vst [vmem:[%s521_s25 + $0xa8] sm:$0xff] %v305_v40  ;;  %v307_v46 = vmax.f32 %v275_v41, 0.0  ;;  %v242_v49 = vmul.f32 %v467_v0, %v554_v3  ;;  %v276_v50 = vadd.f32 %v479_v1, %v237_v43  ;;  %v277_v51 = vadd.f32 %v479_v1, %v238_v44 }
  0x26   : > { %338 = vst [vmem:[%s521_s25 + $0xb0] sm:$0xff] %v306_v42  ;;  %v278_v52 = vadd.f32 %v479_v1, %v239_v45  ;;  %v243_v53 = vmul.f32 %v467_v0, %v557_v4  ;;  %v279_v54 = vadd.f32 %v479_v1, %v240_v47  ;;  %v280_v55 = vadd.f32 %v479_v1, %v241_v48 }
  0x27   : > { %339 = vst [vmem:[%s521_s25 + $0xb8] sm:$0xff] %v307_v46  ;;  %v281_v56 = vadd.f32 %v479_v1, %v242_v49  ;;  %v244_v57 = vmul.f32 %v467_v0, %v560_v5  ;;  %v308_v58 = vmax.f32 %v276_v50, 0.0  ;;  %v309_v59 = vmax.f32 %v277_v51, 0.0 }
  0x28   : > { %v310_v60 = vmax.f32 %v278_v52, 0.0  ;;  %v282_v61 = vadd.f32 %v479_v1, %v243_v53  ;;  %v311_v62 = vmax.f32 %v279_v54, 0.0  ;;  %v312_v63 = vmax.f32 %v280_v55, 0.0 }
  0x29   : > { %v313_v2 = vmax.f32 %v281_v56, 0.0  ;;  %v283_v3 = vadd.f32 %v479_v1, %v244_v57  ;;  %340 = vst [vmem:[%s521_s25 + $0xc0] sm:$0xff] %v308_v58  ;;  %341 = vst [vmem:[%s521_s25 + $0xc8] sm:$0xff] %v309_v59 }
  0x2a   : > { %342 = vst [vmem:[%s521_s25 + $0xd0] sm:$0xff] %v310_v60  ;;  %v314_v4 = vmax.f32 %v282_v61, 0.0  ;;  %343 = vst [vmem:[%s521_s25 + $0xd8] sm:$0xff] %v311_v62 }
  0x2b   : > { %344 = vst [vmem:[%s521_s25 + $0xe0] sm:$0xff] %v312_v63  ;;  %345 = vst [vmem:[%s521_s25 + $0xe8] sm:$0xff] %v313_v2  ;;  %v315_v0 = vmax.f32 %v283_v3, 0.0 }
  0x2c   : > { %346 = vst [vmem:[%s521_s25 + $0xf0] sm:$0xff] %v314_v4 }
  0x2d   : > { %347 = vst [vmem:[%s521_s25 + $0xf8] sm:$0xff] %v315_v0 }
  0x2e PF: > { %s13_s12 = sadd.s32 1, %s431_s12  }
  0x2f   : > { %p10_p4 = scmp.ge.s32.totalorder %s13_s12, 4  }
  0x31   :  { %12 = sbr.rel (!%p10_p4) target bundleno = 1 (0x1), region = 62 }

// kernel: bottleneck_forward.9
= control target key start
LH: loop header
LB: loop body
LE: loop exit
PB: predicated region body
PF: predicated region fallthrough
CT: control target
= control target key end

     0   :  { %vm419_vm0 = vcmask 1040384   ;;  %s787_s1 = inlined_call_operand.vmem [shape: f32[128,128], index: 1, kind: input, shape index: {}]   ;;  %s788_s0 = inlined_call_operand.vmem [shape: f32[128,128], index: 0, kind: input, shape index: {}]   ;;  %s789_s2 = inlined_call_operand.vmem [shape: f32[1,128], index: 2, kind: input, shape index: {}]   ;;  %s790_s3 = inlined_call_operand.vmem [shape: f32[1,128], index: 3, kind: input, shape index: {}]   ;;  %s791_s4 = inlined_call_operand.vmem [shape: f32[128,128], index: 4, kind: output, shape index: {0}]   ;;  %s792_s5 = inlined_call_operand.vmem [shape: f32[1,2,128], index: 5, kind: output, shape index: {1}]  }
   0x1   :  { %v133_v0 = vld [vmem:[%s787_s1] sm:$0xff]  ;;  %v134_v1 = vld [vmem:[%s787_s1 + $0x8] sm:$0xff]  ;;  %v135_v2 = vld [vmem:[%s787_s1 + $0x10] sm:$0xff] }
   0x2   :  { %v520_v3 = vpack.c.bf16 %v134_v1, %v133_v0  ;;  %v136_v4 = vld [vmem:[%s787_s1 + $0x18] sm:$0xff]  ;;  %v137_v6 = vld [vmem:[%s787_s1 + $0x20] sm:$0xff]  ;;  %v138_v7 = vld [vmem:[%s787_s1 + $0x28] sm:$0xff] }
   0x3   :  { %v524_v5 = vpack.c.bf16 %v136_v4, %v135_v2  ;;  %v528_v8 = vpack.c.bf16 %v138_v7, %v137_v6  ;;  %v39_v9 = vld [vmem:[%s788_s0] sm:$0xff]  ;;  %v139_v11 = vld [vmem:[%s787_s1 + $0x30] sm:$0xff]  ;;  %v140_v12 = vld [vmem:[%s787_s1 + $0x38] sm:$0xff] }
   0x4   :  { %521 = vmatprep.subr.bf16.mxu0 %v520_v3  ;;  %552 = vmatprep.subr.bf16.mxu1 %v520_v3  ;;  %v622_v10 = vld [vmem:[%s789_s2] ss:$0 sm:$0xff]  ;;  %v532_v16 = vpack.c.bf16 %v140_v12, %v139_v11  ;;  %v142_v19 = vld [vmem:[%s787_s1 + $0x48] sm:$0xff]  ;;  %v143_v23 = vld [vmem:[%s787_s1 + $0x50] sm:$0xff] }
   0x5   :  { %523 = vmatpush3.bf16.msra.mxu0 %v520_v3  ;;  %560 = vmatpush3.bf16.msra.mxu1 %v520_v3  ;;  %v62_v13 = vmul.f32 %v622_v10, %v39_v9  ;;  %v634_v14 = vld [vmem:[%s790_s3] ss:$0 sm:$0xff]  ;;  %v144_v24 = vld [vmem:[%s787_s1 + $0x58] sm:$0xff]  ;;  %v146_v29 = vld [vmem:[%s787_s1 + $0x68] sm:$0xff] }
   0x6   :  { %525 = vmatprep.subr.bf16.mxu0 %v524_v5  ;;  %553 = vmatprep.subr.bf16.mxu1 %v524_v5  ;;  %v47_v17 = vld [vmem:[%s788_s0 + $0x40] sm:$0xff]  ;;  %v540_v27 = vpack.c.bf16 %v144_v24, %v143_v23  ;;  %v40_v30 = vld [vmem:[%s788_s0 + $0x8] sm:$0xff]  ;;  %v41_v33 = vld [vmem:[%s788_s0 + $0x10] sm:$0xff] }
   0x7   :  { %v85_v15 = vadd.f32 %v634_v14, %v62_v13  ;;  %v141_v18 = vld [vmem:[%s787_s1 + $0x40] sm:$0xff]  ;;  %v70_v21 = vmul.f32 %v622_v10, %v47_v17  ;;  %v48_v31 = vld [vmem:[%s788_s0 + $0x48] sm:$0xff]  ;;  %v49_v34 = vld [vmem:[%s788_s0 + $0x50] sm:$0xff]  ;;  %v63_v37 = vmul.f32 %v622_v10, %v40_v30  ;;  %v64_v41 = vmul.f32 %v622_v10, %v41_v33 }
   0x8   :  { %v536_v22 = vpack.c.bf16 %v142_v19, %v141_v18  ;;  %v145_v28 = vld [vmem:[%s787_s1 + $0x60] sm:$0xff]  ;;  %v147_v35 = vld [vmem:[%s787_s1 + $0x70] sm:$0xff]  ;;  %v148_v36 = vld [vmem:[%s787_s1 + $0x78] sm:$0xff]  ;;  %v71_v40 = vmul.f32 %v622_v10, %v48_v31  ;;  %v72_v42 = vmul.f32 %v622_v10, %v49_v34 }
   0x9   :  { %527 = vmatpush3.bf16.msra.mxu0 %v524_v5  ;;  %561 = vmatpush3.bf16.msra.mxu1 %v524_v5  ;;  %v101_v20 = vmax.f32 %v85_v15, 0.0  ;;  %v93_v25 = vadd.f32 %v634_v14, %v70_v21  ;;  %v544_v32 = vpack.c.bf16 %v146_v29, %v145_v28  ;;  %v42_v38 = vld [vmem:[%s788_s0 + $0x18] sm:$0xff]  ;;  %v43_v39 = vld [vmem:[%s788_s0 + $0x20] sm:$0xff]  ;;  %v548_v44 = vpack.c.bf16 %v148_v36, %v147_v35  ;;  %v44_v49 = vld [vmem:[%s788_s0 + $0x28] sm:$0xff] }
   0xa   :  { %529 = vmatprep.subr.bf16.mxu0 %v528_v8  ;;  %554 = vmatprep.subr.bf16.mxu1 %v528_v8  ;;  %v50_v43 = vld [vmem:[%s788_s0 + $0x58] sm:$0xff]  ;;  %v51_v45 = vld [vmem:[%s788_s0 + $0x60] sm:$0xff]  ;;  %v65_v46 = vmul.f32 %v622_v10, %v42_v38  ;;  %v66_v47 = vmul.f32 %v622_v10, %v43_v39  ;;  %v86_v48 = vadd.f32 %v634_v14, %v63_v37  ;;  %v45_v50 = vld [vmem:[%s788_s0 + $0x30] sm:$0xff] }
   0xb   :  { %496 = vmatprep.mubr.f32.mxu0 %v101_v20  ;;  %v109_v26 = vmax.f32 %v93_v25, 0.0  ;;  %v94_v51 = vadd.f32 %v634_v14, %v71_v40  ;;  %v73_v52 = vmul.f32 %v622_v10, %v50_v43  ;;  %v87_v53 = vadd.f32 %v634_v14, %v64_v41  ;;  %v52_v56 = vld [vmem:[%s788_s0 + $0x68] sm:$0xff]  ;;  %v53_v57 = vld [vmem:[%s788_s0 + $0x70] sm:$0xff]  ;;  %v46_v63 = vld [vmem:[%s788_s0 + $0x38] sm:$0xff] }
   0xc   :  { %v95_v54 = vadd.f32 %v634_v14, %v72_v42  ;;  %v74_v55 = vmul.f32 %v622_v10, %v51_v45  ;;  %v88_v58 = vadd.f32 %v634_v14, %v65_v46  ;;  %v89_v59 = vadd.f32 %v634_v14, %v66_v47  ;;  %v54_v7 = vld [vmem:[%s788_s0 + $0x78] sm:$0xff] }
   0xd   :  { %531 = vmatpush3.bf16.msra.mxu0 %v528_v8  ;;  %562 = vmatpush3.bf16.msra.mxu1 %v528_v8  ;;  %v67_v60 = vmul.f32 %v622_v10, %v44_v49  ;;  %v68_v61 = vmul.f32 %v622_v10, %v45_v50  ;;  %v102_v62 = vmax.f32 %v86_v48, 0.0  ;;  %v110_v0 = vmax.f32 %v94_v51, 0.0 }
   0xe   :  { %533 = vmatprep.subr.bf16.mxu0 %v532_v16  ;;  %555 = vmatprep.subr.bf16.mxu1 %v532_v16  ;;  %v96_v1 = vadd.f32 %v634_v14, %v73_v52  ;;  %v75_v2 = vmul.f32 %v622_v10, %v52_v56  ;;  %v103_v3 = vmax.f32 %v87_v53, 0.0  ;;  %v111_v4 = vmax.f32 %v95_v54, 0.0 }
   0xf   :  { %508 = vmatprep.mubr.f32.mxu1 %v109_v26  ;;  %v97_v5 = vadd.f32 %v634_v14, %v74_v55  ;;  %v76_v6 = vmul.f32 %v622_v10, %v53_v57  ;;  %v90_v8 = vadd.f32 %v634_v14, %v67_v60  ;;  %v69_v9 = vmul.f32 %v622_v10, %v46_v63 }
  0x10   :  { %v104_v11 = vmax.f32 %v88_v58, 0.0  ;;  %v112_v12 = vmax.f32 %v96_v1, 0.0  ;;  %v98_v13 = vadd.f32 %v634_v14, %v75_v2  ;;  %v77_v15 = vmul.f32 %v622_v10, %v54_v7 }
  0x11   :  { %535 = vmatpush3.bf16.msra.mxu0 %v532_v16  ;;  %563 = vmatpush3.bf16.msra.mxu1 %v532_v16  ;;  %v105_v16 = vmax.f32 %v89_v59, 0.0  ;;  %v91_v17 = vadd.f32 %v634_v14, %v68_v61  ;;  %v113_v18 = vmax.f32 %v97_v5, 0.0  ;;  %v99_v19 = vadd.f32 %v634_v14, %v76_v6 }
  0x12   :  { %537 = vmatprep.subr.bf16.mxu0 %v536_v22  ;;  %556 = vmatprep.subr.bf16.mxu1 %v536_v22  ;;  %v106_v20 = vmax.f32 %v90_v8, 0.0  ;;  %v92_v21 = vadd.f32 %v634_v14, %v69_v9  ;;  %v100_v23 = vadd.f32 %v634_v14, %v77_v15 }
  0x13   :  { %v107_v24 = vmax.f32 %v91_v17, 0.0  ;;  %v115_v10 = vmax.f32 %v99_v19, 0.0 }
  0x14   :  { %v108_v25 = vmax.f32 %v92_v21, 0.0  ;;  %v116_v26 = vmax.f32 %v100_v23, 0.0 }
  0x15   :  { %539 = vmatpush3.bf16.msra.mxu0 %v536_v22  ;;  %564 = vmatpush3.bf16.msra.mxu1 %v536_v22  ;;  %v114_v22 = vmax.f32 %v98_v13, 0.0 }
  0x16   :  { %541 = vmatprep.subr.bf16.mxu0 %v540_v27  ;;  %557 = vmatprep.subr.bf16.mxu1 %v540_v27 }
  0x19   :  { %543 = vmatpush3.bf16.msra.mxu0 %v540_v27  ;;  %565 = vmatpush3.bf16.msra.mxu1 %v540_v27 }
  0x1a   :  { %545 = vmatprep.subr.bf16.mxu0 %v544_v32  ;;  %558 = vmatprep.subr.bf16.mxu1 %v544_v32 }
  0x1d   :  { %547 = vmatpush3.bf16.msra.mxu0 %v544_v32  ;;  %566 = vmatpush3.bf16.msra.mxu1 %v544_v32 }
  0x1e   :  { %549 = vmatprep.subr.bf16.mxu0 %v548_v44  ;;  %559 = vmatprep.subr.bf16.mxu1 %v548_v44 }
  0x21   :  { %551 = vmatpush3.bf16.msra.mxu0 %v548_v44  ;;  %567 = vmatpush3.bf16.msra.mxu1 %v548_v44 }
  0x24   :  { %497 = vmatmul.mubr.f32.vlgmr.msra.gmra.mrb[0].mxu0 %v102_v62  ;;  %509 = vmatmul.mubr.f32.vlgmr.msra.gmra.mrb[0].mxu1 %v110_v0 }
  0x25   :  { %499 = vmatprep.mubr.f32.mxu0 %v103_v3  ;;  %511 = vmatprep.mubr.f32.mxu1 %v111_v4 }
  0x28   :  { %500 = vmatmul.mubr.f32.gmra.mrb[2].mxu0 %v104_v11  ;;  %512 = vmatmul.mubr.f32.gmra.mrb[2].mxu1 %v112_v12 }
  0x29   :  { %502 = vmatprep.mubr.f32.mxu0 %v105_v16  ;;  %514 = vmatprep.mubr.f32.mxu1 %v113_v18 }
  0x2c   :  { %503 = vmatmul.mubr.f32.gmra.mrb[4].mxu0 %v106_v20  ;;  %515 = vmatmul.mubr.f32.gmra.mrb[4].mxu1 %v114_v22 }
  0x2d   :  { %505 = vmatprep.mubr.f32.mxu0 %v107_v24  ;;  %517 = vmatprep.mubr.f32.mxu1 %v115_v10 }
  0x30   :  { %506 = vmatmul.mubr.f32.gmra.mrb[6].mxu0 %v108_v25  ;;  %518 = vmatmul.mubr.f32.gmra.mrb[6].mxu1 %v116_v26 }
  0xf7   :  { %v498_v27 = vpop.f32.mrb[0].mxu0  ;;  %v510_v28 = vpop.f32.mrb[0].mxu1 }
  0xf8   :  { %346 = vst [vmem:[%s791_s4 + $0x8] sm:$0xff] %v498_v27  ;;  %v383_v29 = vmul.f32 %v498_v27, %v498_v27  ;;  %v215_v14 = vpop.f32.mrb[1].mxu0  ;;  %354 = vst [vmem:[%s791_s4 + $0x48] sm:$0xff] %v510_v28  ;;  %v255_v30 = vpop.f32.mrb[1].mxu1  ;;  %v391_v2 = vmul.f32 %v510_v28, %v510_v28 }
  0xf9   :  { %345 = vst [vmem:[%s791_s4] sm:$0xff] %v215_v14  ;;  %v361_v31 = vadd.f32 %v498_v27, %v215_v14  ;;  %v382_v32 = vmul.f32 %v215_v14, %v215_v14  ;;  %353 = vst [vmem:[%s791_s4 + $0x40] sm:$0xff] %v255_v30  ;;  %v390_v63 = vmul.f32 %v255_v30, %v255_v30 }
  0xfb   :  { %v398_v33 = vadd.f32 %v383_v29, %v382_v32  ;;  %v501_v34 = vpop.f32.mrb[2].mxu0  ;;  %v513_v35 = vpop.f32.mrb[2].mxu1 }
  0xfc   :  { %348 = vst [vmem:[%s791_s4 + $0x18] sm:$0xff] %v501_v34  ;;  %v225_v36 = vpop.f32.mrb[3].mxu0  ;;  %356 = vst [vmem:[%s791_s4 + $0x58] sm:$0xff] %v513_v35  ;;  %v265_v37 = vpop.f32.mrb[3].mxu1  ;;  %v385_v40 = vmul.f32 %v501_v34, %v501_v34  ;;  %v393_v8 = vmul.f32 %v513_v35, %v513_v35 }
  0xfd   :  { %347 = vst [vmem:[%s791_s4 + $0x10] sm:$0xff] %v225_v36  ;;  %v362_v38 = vadd.f32 %v361_v31, %v225_v36  ;;  %v384_v39 = vmul.f32 %v225_v36, %v225_v36  ;;  %355 = vst [vmem:[%s791_s4 + $0x50] sm:$0xff] %v265_v37  ;;  %v392_v5 = vmul.f32 %v265_v37, %v265_v37 }
  0xff   :  { %v399_v41 = vadd.f32 %v398_v33, %v384_v39  ;;  %v504_v42 = vpop.f32.mrb[4].mxu0  ;;  %v363_v43 = vadd.f32 %v501_v34, %v362_v38  ;;  %v516_v44 = vpop.f32.mrb[4].mxu1 }
 0x100   :  { %350 = vst [vmem:[%s791_s4 + $0x28] sm:$0xff] %v504_v42  ;;  %v235_v45 = vpop.f32.mrb[5].mxu0  ;;  %358 = vst [vmem:[%s791_s4 + $0x68] sm:$0xff] %v516_v44  ;;  %v275_v46 = vpop.f32.mrb[5].mxu1  ;;  %v387_v50 = vmul.f32 %v504_v42, %v504_v42  ;;  %v395_v16 = vmul.f32 %v516_v44, %v516_v44 }
 0x101   :  { %349 = vst [vmem:[%s791_s4 + $0x20] sm:$0xff] %v235_v45  ;;  %v364_v47 = vadd.f32 %v363_v43, %v235_v45  ;;  %v386_v48 = vmul.f32 %v235_v45, %v235_v45  ;;  %v400_v49 = vadd.f32 %v399_v41, %v385_v40  ;;  %357 = vst [vmem:[%s791_s4 + $0x60] sm:$0xff] %v275_v46 }
 0x102   :  { %v394_v12 = vmul.f32 %v275_v46, %v275_v46 }
 0x103   :  { %v401_v51 = vadd.f32 %v400_v49, %v386_v48  ;;  %v507_v52 = vpop.f32.mrb[6].mxu0  ;;  %v365_v53 = vadd.f32 %v504_v42, %v364_v47  ;;  %v519_v54 = vpop.f32.mrb[6].mxu1 }
 0x104   :  { %352 = vst [vmem:[%s791_s4 + $0x38] sm:$0xff] %v507_v52  ;;  %v245_v55 = vpop.f32.mrb[7].mxu0  ;;  %360 = vst [vmem:[%s791_s4 + $0x78] sm:$0xff] %v519_v54  ;;  %v285_v56 = vpop.f32.mrb[7].mxu1  ;;  %v389_v60 = vmul.f32 %v507_v52, %v507_v52  ;;  %v397_v22 = vmul.f32 %v519_v54, %v519_v54 }
 0x105   :  { %351 = vst [vmem:[%s791_s4 + $0x30] sm:$0xff] %v245_v55  ;;  %v366_v57 = vadd.f32 %v365_v53, %v245_v55  ;;  %v388_v58 = vmul.f32 %v245_v55, %v245_v55  ;;  %v402_v59 = vadd.f32 %v401_v51, %v387_v50  ;;  %359 = vst [vmem:[%s791_s4 + $0x70] sm:$0xff] %v285_v56 }
 0x106   :  { %v396_v19 = vmul.f32 %v285_v56, %v285_v56 }
 0x107   :  { %v367_v61 = vadd.f32 %v507_v52, %v366_v57  ;;  %v403_v62 = vadd.f32 %v402_v59, %v388_v58 }
 0x109   :  { %v404_v0 = vadd.f32 %v403_v62, %v389_v60  ;;  %v368_v1 = vadd.f32 %v367_v61, %v255_v30 }
 0x10b   :  { %v405_v3 = vadd.f32 %v404_v0, %v390_v63  ;;  %v369_v4 = vadd.f32 %v510_v28, %v368_v1 }
 0x10d   :  { %v370_v6 = vadd.f32 %v369_v4, %v265_v37  ;;  %v406_v7 = vadd.f32 %v405_v3, %v391_v2 }
 0x10f   :  { %v407_v9 = vadd.f32 %v406_v7, %v392_v5  ;;  %v371_v11 = vadd.f32 %v513_v35, %v370_v6 }
 0x111   :  { %v372_v13 = vadd.f32 %v371_v11, %v275_v46  ;;  %v408_v15 = vadd.f32 %v407_v9, %v393_v8 }
 0x113   :  { %v409_v17 = vadd.f32 %v408_v15, %v394_v12  ;;  %v373_v18 = vadd.f32 %v516_v44, %v372_v13 }
 0x115   :  { %v374_v20 = vadd.f32 %v373_v18, %v285_v56  ;;  %v410_v21 = vadd.f32 %v409_v17, %v395_v16 }
 0x117   :  { %v375_v23 = vadd.f32 %v519_v54, %v374_v20  ;;  %v411_v24 = vadd.f32 %v410_v21, %v396_v19 }
 0x119   :  { %v376_v10 = vrot.slane %v375_v23, 4  ;;  %v412_v25 = vadd.f32 %v411_v24, %v397_v22 }
 0x11b   :  { %v377_v26 = vadd.f32 %v376_v10, %v375_v23  ;;  %v413_v27 = vrot.slane %v412_v25, 4 }
 0x11d   :  { %v378_v28 = vrot.slane %v377_v26, 2  ;;  %v414_v29 = vadd.f32 %v413_v27, %v412_v25 }
 0x11f   :  { %v379_v14 = vadd.f32 %v378_v28, %v377_v26  ;;  %v415_v30 = vrot.slane %v414_v29, 2 }
 0x121   :  { %v380_v31 = vrot.slane %v379_v14, 1  ;;  %v416_v32 = vadd.f32 %v415_v30, %v414_v29 }
 0x123   :  { %v417_v33 = vrot.slane %v416_v32, 1  ;;  %v381_v34 = vadd.f32 %v380_v31, %v379_v14 }
 0x125   :  { %v418_v35 = vadd.f32 %v417_v33, %v416_v32 }
 0x127   :  { %v420_v36 = vsel %vm419_vm0, %v381_v34, %v418_v35 }
 0x128   :  { %421 = vst [vmem:[%s792_s5] sm:$0x3] %v420_v36 }

// kernel: bottleneck_forward.8
= control target key start
LH: loop header
LB: loop body
LE: loop exit
PB: predicated region body
PF: predicated region fallthrough
CT: control target
= control target key end

     0   :  { %s2763_s12 = smov 0   ;;  %s3358_s0 = inlined_call_operand.vmem [shape: f32[8,9,9,128], index: 0, kind: input, shape index: {}]   ;;  %s3359_s1 = inlined_call_operand.vmem [shape: f32[9,128,128], index: 1, kind: input, shape index: {}]   ;;  %s3360_s2 = inlined_call_operand.vmem [shape: f32[128,128], index: 2, kind: output, shape index: {0}]   ;;  %s3361_s3 = inlined_call_operand.vmem [shape: f32[2,2,128], index: 3, kind: output, shape index: {1}]  }
   0x1 LB: > { %s2769_s13 = sadd.s32 4294967295, %s2741_s12   ;;  %p1554_p0 = scmp.ge.s32.totalorder %s2741_s12, 1  ;;  %s2741_s12 = sphi %s2763_s12, %s14_s12  }
   0x2   : > { %p142_p1 = scmp.lt.s32.totalorder %s2741_s12, 3 }
   0x4   : > { %p143_p2 = pnand %p1554_p0, %p142_p1 }
   0x5   : > { %v1568_v0 = vld [vmem:[%s3359_s1 + $0x80] sm:$0xff] (!%p143_p2)  ;;  %v1569_v1 = vld [vmem:[%s3359_s1 + $0x88] sm:$0xff] (!%p143_p2)  ;;  %s1555_s20 = sshll.u32 (!%p143_p2), %s2769_s13, 2  ;;  %v1570_v5 = vld [vmem:[%s3359_s1 + $0x90] sm:$0xff] (!%p143_p2)  ;;  %p184_p5 = scmp.lt.s32.totalorder (!%p143_p2), %s2769_s13, 1  ;;  %vm1460_vm0 = vcmask (!%p143_p2), 1040384  }
   0x6   : > { %146 = sbr.rel (%p143_p2) target bundleno = 416 (0x1a0), region = 28  ;;  %v1632_v2 = vld [vmem:[%s3359_s1 + $0x200] sm:$0xff] (!%p143_p2)  ;;  %v2358_v3 = vpack.c.bf16 (!%p143_p2), %v1569_v1, %v1568_v0  ;;  %v1633_v4 = vld [vmem:[%s3359_s1 + $0x208] sm:$0xff] (!%p143_p2)  ;;  %v1571_v6 = vld [vmem:[%s3359_s1 + $0x98] sm:$0xff] (!%p143_p2)  ;;  %p172_p3 = scmp.lt.s32.totalorder (!%p143_p2), %s1555_s20, 7 }
   0x7   : > { %v2486_v7 = vpack.c.bf16 (!%p143_p2), %v1633_v4, %v1632_v2  ;;  %v2362_v8 = vpack.c.bf16 (!%p143_p2), %v1571_v6, %v1570_v5  ;;  %v1634_v9 = vld [vmem:[%s3359_s1 + $0x210] sm:$0xff] (!%p143_p2)  ;;  %v1635_v10 = vld [vmem:[%s3359_s1 + $0x218] sm:$0xff] (!%p143_p2)  ;;  %v1572_v11 = vld [vmem:[%s3359_s1 + $0xa0] sm:$0xff] (!%p143_p2) }
   0x8   : > { %2359 = vmatprep.subr.bf16.mxu1 (!%p143_p2), %v2358_v3  ;;  %v2490_v12 = vpack.c.bf16 (!%p143_p2), %v1635_v10, %v1634_v9  ;;  %v1573_v13 = vld [vmem:[%s3359_s1 + $0xa8] sm:$0xff] (!%p143_p2)  ;;  %v1636_v14 = vld [vmem:[%s3359_s1 + $0x220] sm:$0xff] (!%p143_p2)  ;;  %v1574_v18 = vld [vmem:[%s3359_s1 + $0xb0] sm:$0xff] (!%p143_p2) }
   0x9   : > { %v1637_v15 = vld [vmem:[%s3359_s1 + $0x228] sm:$0xff] (!%p143_p2)  ;;  %2487 = vmatprep.subr.bf16.mxu0 (!%p143_p2), %v2486_v7  ;;  %2361 = vmatpush3.bf16.msra.mxu1 (!%p143_p2), %v2358_v3  ;;  %v2366_v16 = vpack.c.bf16 (!%p143_p2), %v1573_v13, %v1572_v11  ;;  %v1575_v19 = vld [vmem:[%s3359_s1 + $0xb8] sm:$0xff] (!%p143_p2)  ;;  %v1638_v20 = vld [vmem:[%s3359_s1 + $0x230] sm:$0xff] (!%p143_p2) }
   0xa   : > { %2489 = vmatpush3.bf16.msra.mxu0 (!%p143_p2), %v2486_v7  ;;  %2363 = vmatprep.subr.bf16.mxu1 (!%p143_p2), %v2362_v8  ;;  %v2494_v17 = vpack.c.bf16 (!%p143_p2), %v1637_v15, %v1636_v14  ;;  %v1639_v21 = vld [vmem:[%s3359_s1 + $0x238] sm:$0xff] (!%p143_p2)  ;;  %v2370_v22 = vpack.c.bf16 (!%p143_p2), %v1575_v19, %v1574_v18  ;;  %v1576_v24 = vld [vmem:[%s3359_s1 + $0xc0] sm:$0xff] (!%p143_p2)  ;;  %v1577_v25 = vld [vmem:[%s3359_s1 + $0xc8] sm:$0xff] (!%p143_p2) }
   0xb   : > { %2491 = vmatprep.subr.bf16.mxu0 (!%p143_p2), %v2490_v12  ;;  %v2498_v23 = vpack.c.bf16 (!%p143_p2), %v1639_v21, %v1638_v20  ;;  %v1640_v27 = vld [vmem:[%s3359_s1 + $0x240] sm:$0xff] (!%p143_p2)  ;;  %v1641_v28 = vld [vmem:[%s3359_s1 + $0x248] sm:$0xff] (!%p143_p2)  ;;  %v2374_v30 = vpack.c.bf16 (!%p143_p2), %v1577_v25, %v1576_v24  ;;  %v1578_v32 = vld [vmem:[%s3359_s1 + $0xd0] sm:$0xff] (!%p143_p2) }
   0xc   : > { %v2502_v31 = vpack.c.bf16 (!%p143_p2), %v1641_v28, %v1640_v27  ;;  %v1579_v33 = vld [vmem:[%s3359_s1 + $0xd8] sm:$0xff] (!%p143_p2)  ;;  %v1642_v34 = vld [vmem:[%s3359_s1 + $0x250] sm:$0xff] (!%p143_p2)  ;;  %v1580_v38 = vld [vmem:[%s3359_s1 + $0xe0] sm:$0xff] (!%p143_p2) }
   0xd   : > { %s3363_s20 = smov (!%p172_p3, %s1555_s20), 7  ;;  %2365 = vmatpush3.bf16.msra.mxu1 %v2362_v8  ;;  %v1643_v35 = vld [vmem:[%s3359_s1 + $0x258] sm:$0xff]  ;;  %v2378_v36 = vpack.c.bf16 %v1579_v33, %v1578_v32  ;;  %v1581_v39 = vld [vmem:[%s3359_s1 + $0xe8] sm:$0xff]  ;;  %v1644_v40 = vld [vmem:[%s3359_s1 + $0x260] sm:$0xff] }
   0xe   : > { %s2726_s14 = smul.u32 144, %s3363_s20  ;;  %2493 = vmatpush3.bf16.msra.mxu0 %v2490_v12  ;;  %2367 = vmatprep.subr.bf16.mxu1 %v2366_v16  ;;  %v2506_v37 = vpack.c.bf16 %v1643_v35, %v1642_v34  ;;  %v1645_v41 = vld [vmem:[%s3359_s1 + $0x268] sm:$0xff]  ;;  %v2382_v42 = vpack.c.bf16 %v1581_v39, %v1580_v38  ;;  %v1582_v44 = vld [vmem:[%s3359_s1 + $0xf0] sm:$0xff]  ;;  %v1583_v45 = vld [vmem:[%s3359_s1 + $0xf8] sm:$0xff] }
   0xf   : > { %2495 = vmatprep.subr.bf16.mxu0 %v2494_v17  ;;  %v2510_v43 = vpack.c.bf16 %v1645_v41, %v1644_v40  ;;  %v1646_v46 = vld [vmem:[%s3359_s1 + $0x270] sm:$0xff]  ;;  %v1647_v47 = vld [vmem:[%s3359_s1 + $0x278] sm:$0xff]  ;;  %v2386_v48 = vpack.c.bf16 %v1583_v45, %v1582_v44  ;;  %v196_v50 = vld [vmem:[%s3359_s1] sm:$0xff] }
  0x10   : > { %s2825_s25 = scalar_lea.vmem %s3358_s0, %s2726_s14  ;;  %v2514_v49 = vpack.c.bf16 %v1647_v47, %v1646_v46  ;;  %v197_v51 = vld [vmem:[%s3359_s1 + $0x8] sm:$0xff]  ;;  %v1656_v52 = vld [vmem:[%s3359_s1 + $0x280] sm:$0xff]  ;;  %v198_v56 = vld [vmem:[%s3359_s1 + $0x10] sm:$0xff] }
  0x11   : > { %v1560_v26 = vld [vmem:[%s2825_s25 + $0x90] sm:$0xff]  ;;  %2369 = vmatpush3.bf16.msra.mxu1 %v2366_v16  ;;  %v1657_v53 = vld [vmem:[%s3359_s1 + $0x288] sm:$0xff]  ;;  %v2390_v54 = vpack.c.bf16 %v197_v51, %v196_v50  ;;  %v199_v57 = vld [vmem:[%s3359_s1 + $0x18] sm:$0xff] }
  0x12   : > { %1994 = vmatprep.mubr.f32.mxu1 %v1560_v26  ;;  %v1624_v29 = vld [vmem:[%s2825_s25 + $0x1b0] sm:$0xff]  ;;  %2497 = vmatpush3.bf16.msra.mxu0 %v2494_v17  ;;  %v2518_v55 = vpack.c.bf16 %v1657_v53, %v1656_v52  ;;  %v1659_v59 = vld [vmem:[%s3359_s1 + $0x298] sm:$0xff]  ;;  %v2902_v60 = vld [vmem:[%s2825_s25 + $0xa0] sm:$0xff]  ;;  %v2394_v62 = vpack.c.bf16 %v199_v57, %v198_v56 }
  0x13   : > { %2170 = vmatprep.mubr.f32.mxu0 %v1624_v29  ;;  %2371 = vmatprep.subr.bf16.mxu1 %v2370_v22  ;;  %v1658_v58 = vld [vmem:[%s3359_s1 + $0x290] sm:$0xff]  ;;  %v1625_v61 = vld [vmem:[%s2825_s25 + $0x1c0] sm:$0xff]  ;;  %v201_v1 = vld [vmem:[%s3359_s1 + $0x28] sm:$0xff] }
  0x14   : > { %2499 = vmatprep.subr.bf16.mxu0 %v2498_v23  ;;  %v2522_v63 = vpack.c.bf16 %v1659_v59, %v1658_v58  ;;  %v200_v0 = vld [vmem:[%s3359_s1 + $0x20] sm:$0xff]  ;;  %v1661_v3 = vld [vmem:[%s3359_s1 + $0x2a8] sm:$0xff]  ;;  %v2919_v4 = vld [vmem:[%s2825_s25 + $0xb0] sm:$0xff] }
  0x15   : > { %2373 = vmatpush3.bf16.msra.mxu1 %v2370_v22  ;;  %v1660_v2 = vld [vmem:[%s3359_s1 + $0x2a0] sm:$0xff]  ;;  %v1626_v5 = vld [vmem:[%s2825_s25 + $0x1d0] sm:$0xff]  ;;  %v2398_v7 = vpack.c.bf16 %v201_v1, %v200_v0  ;;  %v203_v11 = vld [vmem:[%s3359_s1 + $0x38] sm:$0xff] }
  0x16   : > { %2501 = vmatpush3.bf16.msra.mxu0 %v2498_v23  ;;  %2375 = vmatprep.subr.bf16.mxu1 %v2374_v30  ;;  %v2923_v6 = vld [vmem:[%s2825_s25 + $0xc0] sm:$0xff]  ;;  %v2526_v9 = vpack.c.bf16 %v1661_v3, %v1660_v2  ;;  %v202_v10 = vld [vmem:[%s3359_s1 + $0x30] sm:$0xff]  ;;  %v1663_v13 = vld [vmem:[%s3359_s1 + $0x2b8] sm:$0xff] }
  0x17   : > { %2503 = vmatprep.subr.bf16.mxu0 %v2502_v31  ;;  %v1627_v8 = vld [vmem:[%s2825_s25 + $0x1e0] sm:$0xff]  ;;  %v1662_v12 = vld [vmem:[%s3359_s1 + $0x2b0] sm:$0xff]  ;;  %v2402_v17 = vpack.c.bf16 %v203_v11, %v202_v10  ;;  %v205_v21 = vld [vmem:[%s3359_s1 + $0x48] sm:$0xff] }
  0x18   : > { %v2941_v14 = vld [vmem:[%s2825_s25 + $0xd0] sm:$0xff]  ;;  %v2945_v16 = vld [vmem:[%s2825_s25 + $0xe0] sm:$0xff]  ;;  %v2530_v19 = vpack.c.bf16 %v1663_v13, %v1662_v12  ;;  %v1665_v23 = vld [vmem:[%s3359_s1 + $0x2c8] sm:$0xff] }
  0x19   : > { %2377 = vmatpush3.bf16.msra.mxu1 %v2374_v30  ;;  %v1628_v15 = vld [vmem:[%s2825_s25 + $0x1f0] sm:$0xff]  ;;  %v1629_v18 = vld [vmem:[%s2825_s25 + $0x200] sm:$0xff]  ;;  %v1667_v33 = vld [vmem:[%s3359_s1 + $0x2d8] sm:$0xff] }
  0x1a   : > { %2505 = vmatpush3.bf16.msra.mxu0 %v2502_v31  ;;  %2379 = vmatprep.subr.bf16.mxu1 %v2378_v36  ;;  %v204_v20 = vld [vmem:[%s3359_s1 + $0x40] sm:$0xff]  ;;  %v2963_v24 = vld [vmem:[%s2825_s25 + $0xf0] sm:$0xff]  ;;  %v207_v31 = vld [vmem:[%s3359_s1 + $0x58] sm:$0xff] }
  0x1b   : > { %2507 = vmatprep.subr.bf16.mxu0 %v2506_v37  ;;  %v1664_v22 = vld [vmem:[%s3359_s1 + $0x2c0] sm:$0xff]  ;;  %v1630_v25 = vld [vmem:[%s2825_s25 + $0x210] sm:$0xff]  ;;  %v2406_v27 = vpack.c.bf16 %v205_v21, %v204_v20  ;;  %v209_v39 = vld [vmem:[%s3359_s1 + $0x68] sm:$0xff] }
  0x1c   : > { %v2967_v26 = vld [vmem:[%s2825_s25 + $0x100] sm:$0xff]  ;;  %v2534_v29 = vpack.c.bf16 %v1665_v23, %v1664_v22  ;;  %v206_v30 = vld [vmem:[%s3359_s1 + $0x50] sm:$0xff]  ;;  %v1669_v41 = vld [vmem:[%s3359_s1 + $0x2e8] sm:$0xff] }
  0x1d   : > { %2381 = vmatpush3.bf16.msra.mxu1 %v2378_v36  ;;  %v1631_v28 = vld [vmem:[%s2825_s25 + $0x220] sm:$0xff]  ;;  %v1666_v32 = vld [vmem:[%s3359_s1 + $0x2d0] sm:$0xff]  ;;  %v2410_v36 = vpack.c.bf16 %v207_v31, %v206_v30  ;;  %v211_v45 = vld [vmem:[%s3359_s1 + $0x78] sm:$0xff] }
  0x1e   : > { %2509 = vmatpush3.bf16.msra.mxu0 %v2506_v37  ;;  %2383 = vmatprep.subr.bf16.mxu1 %v2382_v42  ;;  %v188_v34 = vld [vmem:[%s2825_s25] sm:$0xff]  ;;  %v2538_v37 = vpack.c.bf16 %v1667_v33, %v1666_v32  ;;  %v210_v44 = vld [vmem:[%s3359_s1 + $0x70] sm:$0xff]  ;;  %v1671_v47 = vld [vmem:[%s3359_s1 + $0x2f8] sm:$0xff] }
  0x1f   : > { %2511 = vmatprep.subr.bf16.mxu0 %v2510_v43  ;;  %v1648_v35 = vld [vmem:[%s2825_s25 + $0x121] sm:$0xff]  ;;  %v1670_v46 = vld [vmem:[%s3359_s1 + $0x2f0] sm:$0xff]  ;;  %v1587_v57 = vld [vmem:[%s3359_s1 + $0x118] sm:$0xff] }
  0x20   : > { %v208_v38 = vld [vmem:[%s3359_s1 + $0x60] sm:$0xff]  ;;  %v1585_v51 = vld [vmem:[%s3359_s1 + $0x108] sm:$0xff]  ;;  %v1586_v56 = vld [vmem:[%s3359_s1 + $0x110] sm:$0xff] }
  0x21   : > { %2385 = vmatpush3.bf16.msra.mxu1 %v2382_v42  ;;  %v1668_v40 = vld [vmem:[%s3359_s1 + $0x2e0] sm:$0xff]  ;;  %v2414_v42 = vpack.c.bf16 %v209_v39, %v208_v38  ;;  %v1681_v53 = vld [vmem:[%s3359_s1 + $0x308] sm:$0xff]  ;;  %v1682_v58 = vld [vmem:[%s3359_s1 + $0x310] sm:$0xff] }
  0x22   : > { %2513 = vmatpush3.bf16.msra.mxu0 %v2510_v43  ;;  %2387 = vmatprep.subr.bf16.mxu1 %v2386_v48  ;;  %v2542_v43 = vpack.c.bf16 %v1669_v41, %v1668_v40  ;;  %v1584_v50 = vld [vmem:[%s3359_s1 + $0x100] sm:$0xff]  ;;  %v1683_v59 = vld [vmem:[%s3359_s1 + $0x318] sm:$0xff]  ;;  %v1589_v2 = vld [vmem:[%s3359_s1 + $0x128] sm:$0xff] }
  0x23   : > { %2515 = vmatprep.subr.bf16.mxu0 %v2514_v49  ;;  %v1680_v52 = vld [vmem:[%s3359_s1 + $0x300] sm:$0xff]  ;;  %v2554_v0 = vpack.c.bf16 %v1683_v59, %v1682_v58  ;;  %v1651_v11 = vld [vmem:[%s2825_s25 + $0x151] sm:$0xff]  ;;  %v1689_v30 = vld [vmem:[%s3359_s1 + $0x348] sm:$0xff] }
  0x24   : > { %v1588_v1 = vld [vmem:[%s3359_s1 + $0x120] sm:$0xff]  ;;  %v1590_v13 = vld [vmem:[%s3359_s1 + $0x130] sm:$0xff]  ;;  %v1595_v38 = vld [vmem:[%s3359_s1 + $0x158] sm:$0xff] }
  0x25   : > { %2389 = vmatpush3.bf16.msra.mxu1 %v2386_v48  ;;  %v2418_v48 = vpack.c.bf16 %v211_v45, %v210_v44  ;;  %v1684_v3 = vld [vmem:[%s3359_s1 + $0x320] sm:$0xff]  ;;  %v2430_v10 = vpack.c.bf16 %v1589_v2, %v1588_v1  ;;  %v3078_v21 = vld [vmem:[%s2825_s25 + $0x50] sm:$0xff]  ;;  %v1691_v40 = vld [vmem:[%s3359_s1 + $0x358] sm:$0xff] }
  0x26   : > { %2517 = vmatpush3.bf16.msra.mxu0 %v2514_v49  ;;  %2391 = vmatprep.subr.bf16.mxu1 %v2390_v54  ;;  %v2546_v49 = vpack.c.bf16 %v1671_v47, %v1670_v46  ;;  %v1652_v20 = vld [vmem:[%s2825_s25 + $0x161] sm:$0xff]  ;;  %v1653_v23 = vld [vmem:[%s2825_s25 + $0x171] sm:$0xff] }
  0x27   : > { %2519 = vmatprep.subr.bf16.mxu0 %v2518_v55  ;;  %v3096_v31 = vld [vmem:[%s2825_s25 + $0x60] sm:$0xff]  ;;  %v3100_v33 = vld [vmem:[%s2825_s25 + $0x70] sm:$0xff]  ;;  %v1597_v45 = vld [vmem:[%s3359_s1 + $0x168] sm:$0xff] }
  0x28   : > { %1995 = vmatmul.mubr.f32.vlgmr.msra.gmra.mrb[0].mxu1 %v2902_v60  ;;  %v1654_v32 = vld [vmem:[%s2825_s25 + $0x181] sm:$0xff]  ;;  %v1690_v39 = vld [vmem:[%s3359_s1 + $0x350] sm:$0xff]  ;;  %v1707_v2 = vld [vmem:[%s3359_s1 + $0x398] sm:$0xff] }
  0x29   : > { %2393 = vmatpush3.bf16.msra.mxu1 %v2390_v54  ;;  %2171 = vmatmul.mubr.f32.vlgmr.msra.gmra.mrb[0].mxu0 %v1625_v61  ;;  %v2422_v54 = vpack.c.bf16 %v1585_v51, %v1584_v50  ;;  %v3035_v61 = vld [vmem:[%s2825_s25 + $0x10] sm:$0xff]  ;;  %v448_v41 = vld [vmem:[%s2825_s25 + $0x1] sm:$0xff]  ;;  %v1599_v51 = vld [vmem:[%s3359_s1 + $0x178] sm:$0xff] }
  0x2a   : > { %2521 = vmatpush3.bf16.msra.mxu0 %v2518_v55  ;;  %2395 = vmatprep.subr.bf16.mxu1 %v2394_v62  ;;  %v2550_v55 = vpack.c.bf16 %v1681_v53, %v1680_v52  ;;  %v1596_v44 = vld [vmem:[%s3359_s1 + $0x160] sm:$0xff]  ;;  %v1693_v47 = vld [vmem:[%s3359_s1 + $0x368] sm:$0xff]  ;;  %v1598_v50 = vld [vmem:[%s3359_s1 + $0x170] sm:$0xff] }
  0x2b   : > { %2523 = vmatprep.subr.bf16.mxu0 %v2522_v63  ;;  %1997 = vmatprep.mubr.f32.mxu1 %v2919_v4  ;;  %v1692_v46 = vld [vmem:[%s3359_s1 + $0x360] sm:$0xff]  ;;  %v1694_v52 = vld [vmem:[%s3359_s1 + $0x370] sm:$0xff]  ;;  %v1695_v53 = vld [vmem:[%s3359_s1 + $0x378] sm:$0xff] }
  0x2c   : > { %2173 = vmatprep.mubr.f32.mxu0 %v1626_v5  ;;  %1998 = vmatmul.mubr.f32.gmra.mrb[2].mxu1 %v2923_v6  ;;  %v1685_v5 = vld [vmem:[%s3359_s1 + $0x328] sm:$0xff]  ;;  %v1704_v58 = vld [vmem:[%s3359_s1 + $0x380] sm:$0xff]  ;;  %v1706_v1 = vld [vmem:[%s3359_s1 + $0x390] sm:$0xff] }
  0x2d   : > { %2397 = vmatpush3.bf16.msra.mxu1 %v2394_v62  ;;  %2174 = vmatmul.mubr.f32.gmra.mrb[2].mxu0 %v1627_v8  ;;  %v1649_v62 = vld [vmem:[%s2825_s25 + $0x131] sm:$0xff]  ;;  %v1650_v8 = vld [vmem:[%s2825_s25 + $0x141] sm:$0xff]  ;;  %v2558_v12 = vpack.c.bf16 %v1685_v5, %v1684_v3 }
  0x2e   : > { %2525 = vmatpush3.bf16.msra.mxu0 %v2522_v63  ;;  %2399 = vmatprep.subr.bf16.mxu1 %v2398_v7  ;;  %v2426_v63 = vpack.c.bf16 %v1587_v57, %v1586_v56  ;;  %v1608_v56 = vld [vmem:[%s3359_s1 + $0x180] sm:$0xff]  ;;  %v1609_v57 = vld [vmem:[%s3359_s1 + $0x188] sm:$0xff]  ;;  %v3168_v3 = vld [vmem:[%s2825_s25 + $0x11] sm:$0xff] }
  0x2f   : > { %2527 = vmatprep.subr.bf16.mxu0 %v2526_v9  ;;  %2000 = vmatprep.mubr.f32.mxu1 %v2941_v14  ;;  %v1705_v59 = vld [vmem:[%s3359_s1 + $0x388] sm:$0xff] }
  0x30   : > { %2176 = vmatprep.mubr.f32.mxu0 %v1628_v15  ;;  %2001 = vmatmul.mubr.f32.gmra.mrb[4].mxu1 %v2945_v16  ;;  %v1591_v15 = vld [vmem:[%s3359_s1 + $0x138] sm:$0xff] }
  0x31   : > { %2401 = vmatpush3.bf16.msra.mxu1 %v2398_v7  ;;  %2177 = vmatmul.mubr.f32.gmra.mrb[4].mxu0 %v1629_v18  ;;  %v3052_v7 = vld [vmem:[%s2825_s25 + $0x20] sm:$0xff]  ;;  %v1687_v18 = vld [vmem:[%s3359_s1 + $0x338] sm:$0xff]  ;;  %v2434_v22 = vpack.c.bf16 %v1591_v15, %v1590_v13  ;;  %v1709_v13 = vld [vmem:[%s3359_s1 + $0x3a8] sm:$0xff] }
  0x32   : > { %2529 = vmatpush3.bf16.msra.mxu0 %v2526_v9  ;;  %2403 = vmatprep.subr.bf16.mxu1 %v2402_v17  ;;  %v3056_v9 = vld [vmem:[%s2825_s25 + $0x30] sm:$0xff]  ;;  %v3184_v15 = vld [vmem:[%s2825_s25 + $0x21] sm:$0xff] }
  0x33   : > { %2531 = vmatprep.subr.bf16.mxu0 %v2530_v19  ;;  %2003 = vmatprep.mubr.f32.mxu1 %v2963_v24 }
  0x34   : > { %2179 = vmatprep.mubr.f32.mxu0 %v1630_v25  ;;  %2004 = vmatmul.mubr.f32.gmra.mrb[6].mxu1 %v2967_v26 }
  0x35   : > { %2405 = vmatpush3.bf16.msra.mxu1 %v2402_v17  ;;  %2180 = vmatmul.mubr.f32.gmra.mrb[6].mxu0 %v1631_v28  ;;  %v1686_v17 = vld [vmem:[%s3359_s1 + $0x330] sm:$0xff]  ;;  %v1593_v28 = vld [vmem:[%s3359_s1 + $0x148] sm:$0xff] }
  0x36   : > { %2533 = vmatpush3.bf16.msra.mxu0 %v2530_v19  ;;  %2407 = vmatprep.subr.bf16.mxu1 %v2406_v27  ;;  %v3074_v19 = vld [vmem:[%s2825_s25 + $0x40] sm:$0xff]  ;;  %v2562_v25 = vpack.c.bf16 %v1687_v18, %v1686_v17  ;;  %v3188_v17 = vld [vmem:[%s2825_s25 + $0x31] sm:$0xff] }
  0x37   : > { %2535 = vmatprep.subr.bf16.mxu0 %v2534_v29  ;;  %2038 = vmatprep.mubr.f32.mxu1 %v188_v34 }
  0x38   : > { %2214 = vmatprep.mubr.f32.mxu0 %v1648_v35  ;;  %v1655_v35 = vld [vmem:[%s2825_s25 + $0x191] sm:$0xff] }
  0x39   : > { %2409 = vmatpush3.bf16.msra.mxu1 %v2406_v27  ;;  %v1592_v27 = vld [vmem:[%s3359_s1 + $0x140] sm:$0xff] }
  0x3a   : > { %2537 = vmatpush3.bf16.msra.mxu0 %v2534_v29  ;;  %2411 = vmatprep.subr.bf16.mxu1 %v2410_v36  ;;  %v1688_v29 = vld [vmem:[%s3359_s1 + $0x340] sm:$0xff]  ;;  %v2438_v34 = vpack.c.bf16 %v1593_v28, %v1592_v27  ;;  %v3210_v28 = vld [vmem:[%s2825_s25 + $0x51] sm:$0xff] }
  0x3b   : > { %2539 = vmatprep.subr.bf16.mxu0 %v2538_v37  ;;  %v3206_v27 = vld [vmem:[%s2825_s25 + $0x41] sm:$0xff] }
  0x3d   : > { %2413 = vmatpush3.bf16.msra.mxu1 %v2410_v36  ;;  %v2566_v36 = vpack.c.bf16 %v1689_v30, %v1688_v29 }
  0x3e   : > { %2541 = vmatpush3.bf16.msra.mxu0 %v2538_v37  ;;  %2415 = vmatprep.subr.bf16.mxu1 %v2414_v42  ;;  %v1594_v37 = vld [vmem:[%s3359_s1 + $0x150] sm:$0xff] }
  0x3f   : > { %2543 = vmatprep.subr.bf16.mxu0 %v2542_v43 }
  0x41   : > { %2417 = vmatpush3.bf16.msra.mxu1 %v2414_v42  ;;  %v2442_v42 = vpack.c.bf16 %v1595_v38, %v1594_v37  ;;  %v1679_v38 = vld [vmem:[%s2825_s25 + $0x80] sm:$0xff] }
  0x42   : > { %2545 = vmatpush3.bf16.msra.mxu0 %v2542_v43  ;;  %2419 = vmatprep.subr.bf16.mxu1 %v2418_v48  ;;  %v2570_v43 = vpack.c.bf16 %v1691_v40, %v1690_v39  ;;  %v1619_v40 = vld [vmem:[%s3359_s1 + $0x1d8] sm:$0xff] }
  0x43   : > { %2547 = vmatprep.subr.bf16.mxu0 %v2546_v49 }
  0x45   : > { %2421 = vmatpush3.bf16.msra.mxu1 %v2418_v48  ;;  %v2446_v48 = vpack.c.bf16 %v1597_v45, %v1596_v44  ;;  %v1620_v45 = vld [vmem:[%s3359_s1 + $0x1e0] sm:$0xff] }
  0x46   : > { %2549 = vmatpush3.bf16.msra.mxu0 %v2546_v49  ;;  %2423 = vmatprep.subr.bf16.mxu1 %v2422_v54  ;;  %v2574_v49 = vpack.c.bf16 %v1693_v47, %v1692_v46  ;;  %v1621_v46 = vld [vmem:[%s3359_s1 + $0x1e8] sm:$0xff] }
  0x47   : > { %2551 = vmatprep.subr.bf16.mxu0 %v2550_v55  ;;  %v1717_v47 = vld [vmem:[%s3359_s1 + $0x3e8] sm:$0xff] }
  0x48   : > { %2039 = vmatmul.mubr.f32.vlgmr.msra.gmra.mrb[0].mxu1 %v3035_v61 }
  0x49   : > { %2425 = vmatpush3.bf16.msra.mxu1 %v2422_v54  ;;  %2215 = vmatmul.mubr.f32.vlgmr.msra.gmra.mrb[0].mxu0 %v1649_v62  ;;  %v2450_v54 = vpack.c.bf16 %v1599_v51, %v1598_v50  ;;  %v2582_v62 = vpack.c.bf16 %v1705_v59, %v1704_v58  ;;  %v1622_v50 = vld [vmem:[%s3359_s1 + $0x1f0] sm:$0xff]  ;;  %v1623_v51 = vld [vmem:[%s3359_s1 + $0x1f8] sm:$0xff] }
  0x4a   : > { %2553 = vmatpush3.bf16.msra.mxu0 %v2550_v55  ;;  %2427 = vmatprep.subr.bf16.mxu1 %v2426_v63  ;;  %v2578_v55 = vpack.c.bf16 %v1695_v53, %v1694_v52  ;;  %v1718_v52 = vld [vmem:[%s3359_s1 + $0x3f0] sm:$0xff]  ;;  %v2482_v53 = vpack.c.bf16 %v1623_v51, %v1622_v50  ;;  %v1731_v59 = vld [vmem:[%s3359_s1 + $0x418] sm:$0xff] }
  0x4b   : > { %2555 = vmatprep.subr.bf16.mxu0 %v2554_v0  ;;  %2041 = vmatprep.mubr.f32.mxu1 %v3052_v7  ;;  %v1730_v58 = vld [vmem:[%s3359_s1 + $0x410] sm:$0xff] }
  0x4c   : > { %2217 = vmatprep.mubr.f32.mxu0 %v1650_v8  ;;  %2042 = vmatmul.mubr.f32.gmra.mrb[2].mxu1 %v3056_v9  ;;  %v2586_v8 = vpack.c.bf16 %v1707_v2, %v1706_v1  ;;  %v1733_v1 = vld [vmem:[%s3359_s1 + $0x428] sm:$0xff]  ;;  %v1603_v2 = vld [vmem:[%s2825_s25 + $0x150] sm:$0xff] }
  0x4d   : > { %2429 = vmatpush3.bf16.msra.mxu1 %v2426_v63  ;;  %2218 = vmatmul.mubr.f32.gmra.mrb[2].mxu0 %v1651_v11  ;;  %v1610_v63 = vld [vmem:[%s3359_s1 + $0x190] sm:$0xff]  ;;  %v1613_v11 = vld [vmem:[%s3359_s1 + $0x1a8] sm:$0xff] }
  0x4e   : > { %2557 = vmatpush3.bf16.msra.mxu0 %v2554_v0  ;;  %2431 = vmatprep.subr.bf16.mxu1 %v2430_v10  ;;  %v1611_v0 = vld [vmem:[%s3359_s1 + $0x198] sm:$0xff] }
  0x4f   : > { %2559 = vmatprep.subr.bf16.mxu0 %v2558_v12  ;;  %2044 = vmatprep.mubr.f32.mxu1 %v3074_v19  ;;  %v2458_v5 = vpack.c.bf16 %v1611_v0, %v1610_v63  ;;  %v2618_v63 = vpack.c.bf16 %v1731_v59, %v1730_v58  ;;  %v1732_v0 = vld [vmem:[%s3359_s1 + $0x420] sm:$0xff] }
  0x50   : > { %2220 = vmatprep.mubr.f32.mxu0 %v1652_v20  ;;  %2045 = vmatmul.mubr.f32.gmra.mrb[4].mxu1 %v3078_v21 }
  0x51   : > { %2433 = vmatpush3.bf16.msra.mxu1 %v2430_v10  ;;  %2221 = vmatmul.mubr.f32.gmra.mrb[4].mxu0 %v1653_v23  ;;  %v1612_v10 = vld [vmem:[%s3359_s1 + $0x1a0] sm:$0xff]  ;;  %v1615_v23 = vld [vmem:[%s3359_s1 + $0x1b8] sm:$0xff] }
  0x52   : > { %2561 = vmatpush3.bf16.msra.mxu0 %v2558_v12  ;;  %2435 = vmatprep.subr.bf16.mxu1 %v2434_v22  ;;  %v1708_v12 = vld [vmem:[%s3359_s1 + $0x3a0] sm:$0xff]  ;;  %v2462_v18 = vpack.c.bf16 %v1613_v11, %v1612_v10  ;;  %v1734_v10 = vld [vmem:[%s3359_s1 + $0x430] sm:$0xff] }
  0x53   : > { %2563 = vmatprep.subr.bf16.mxu0 %v2562_v25  ;;  %2047 = vmatprep.mubr.f32.mxu1 %v3096_v31  ;;  %v2590_v20 = vpack.c.bf16 %v1709_v13, %v1708_v12  ;;  %v1605_v11 = vld [vmem:[%s2825_s25 + $0x170] sm:$0xff]  ;;  %v1736_v13 = vld [vmem:[%s3359_s1 + $0x440] sm:$0xff] }
  0x54   : > { %2223 = vmatprep.mubr.f32.mxu0 %v1654_v32  ;;  %2048 = vmatmul.mubr.f32.gmra.mrb[6].mxu1 %v3100_v33  ;;  %v1617_v32 = vld [vmem:[%s3359_s1 + $0x1c8] sm:$0xff] }
  0x55   : > { %2437 = vmatpush3.bf16.msra.mxu1 %v2434_v22  ;;  %2224 = vmatmul.mubr.f32.gmra.mrb[6].mxu0 %v1655_v35  ;;  %v1614_v22 = vld [vmem:[%s3359_s1 + $0x1b0] sm:$0xff]  ;;  %v3228_v35 = vld [vmem:[%s2825_s25 + $0x61] sm:$0xff] }
  0x56   : > { %2565 = vmatpush3.bf16.msra.mxu0 %v2562_v25  ;;  %2439 = vmatprep.subr.bf16.mxu1 %v2438_v34  ;;  %v1711_v25 = vld [vmem:[%s3359_s1 + $0x3b8] sm:$0xff]  ;;  %v2466_v29 = vpack.c.bf16 %v1615_v23, %v1614_v22  ;;  %v1738_v22 = vld [vmem:[%s3359_s1 + $0x450] sm:$0xff] }
  0x57   : > { %2567 = vmatprep.subr.bf16.mxu0 %v2566_v36  ;;  %2082 = vmatprep.mubr.f32.mxu1 %v448_v41  ;;  %v1715_v41 = vld [vmem:[%s3359_s1 + $0x3d8] sm:$0xff] }
  0x58   : > { %2258 = vmatprep.mubr.f32.mxu0 %v3035_v61  ;;  %v2454_v61 = vpack.c.bf16 %v1609_v57, %v1608_v56  ;;  %v1729_v56 = vld [vmem:[%s3359_s1 + $0x408] sm:$0xff]  ;;  %v1739_v23 = vld [vmem:[%s3359_s1 + $0x458] sm:$0xff] }
  0x59   : > { %2441 = vmatpush3.bf16.msra.mxu1 %v2438_v34  ;;  %v1713_v34 = vld [vmem:[%s3359_s1 + $0x3c8] sm:$0xff] }
  0x5a   : > { %2569 = vmatpush3.bf16.msra.mxu0 %v2566_v36  ;;  %2443 = vmatprep.subr.bf16.mxu1 %v2442_v42  ;;  %v3232_v36 = vld [vmem:[%s2825_s25 + $0x71] sm:$0xff] }
  0x5b   : > { %2571 = vmatprep.subr.bf16.mxu0 %v2570_v43 }
  0x5d   : > { %2445 = vmatpush3.bf16.msra.mxu1 %v2442_v42  ;;  %v1600_v42 = vld [vmem:[%s2825_s25 + $0x120] sm:$0xff] }
  0x5e   : > { %2573 = vmatpush3.bf16.msra.mxu0 %v2570_v43  ;;  %2447 = vmatprep.subr.bf16.mxu1 %v2446_v48 }
  0x5f   : > { %2575 = vmatprep.subr.bf16.mxu0 %v2574_v49 }
  0x61   : > { %2449 = vmatpush3.bf16.msra.mxu1 %v2446_v48  ;;  %v2478_v48 = vpack.c.bf16 %v1621_v46, %v1620_v45 }
  0x62   : > { %2577 = vmatpush3.bf16.msra.mxu0 %v2574_v49  ;;  %2451 = vmatprep.subr.bf16.mxu1 %v2450_v54 }
  0x63   : > { %2579 = vmatprep.subr.bf16.mxu0 %v2578_v55 }
  0x65   : > { %2453 = vmatpush3.bf16.msra.mxu1 %v2450_v54 }
  0x66   : > { %2581 = vmatpush3.bf16.msra.mxu0 %v2578_v55  ;;  %2455 = vmatprep.subr.bf16.mxu1 %v2454_v61  ;;  %v1728_v55 = vld [vmem:[%s3359_s1 + $0x400] sm:$0xff] }
  0x67   : > { %2583 = vmatprep.subr.bf16.mxu0 %v2582_v62  ;;  %v2614_v57 = vpack.c.bf16 %v1729_v56, %v1728_v55 }
  0x68   : > { %2083 = vmatmul.mubr.f32.vlgmr.msra.gmra.mrb[0].mxu1 %v3168_v3 }
  0x69   : > { %2457 = vmatpush3.bf16.msra.mxu1 %v2454_v61  ;;  %2259 = vmatmul.mubr.f32.vlgmr.msra.gmra.mrb[0].mxu0 %v3052_v7  ;;  %v1710_v7 = vld [vmem:[%s3359_s1 + $0x3b0] sm:$0xff] }
  0x6a   : > { %2585 = vmatpush3.bf16.msra.mxu0 %v2582_v62  ;;  %2459 = vmatprep.subr.bf16.mxu1 %v2458_v5  ;;  %v2594_v30 = vpack.c.bf16 %v1711_v25, %v1710_v7  ;;  %v1601_v61 = vld [vmem:[%s2825_s25 + $0x130] sm:$0xff]  ;;  %v1602_v62 = vld [vmem:[%s2825_s25 + $0x140] sm:$0xff]  ;;  %v1741_v7 = vld [vmem:[%s3359_s1 + $0x468] sm:$0xff] }
  0x6b   : > { %2587 = vmatprep.subr.bf16.mxu0 %v2586_v8  ;;  %2085 = vmatprep.mubr.f32.mxu1 %v3184_v15 }
  0x6c   : > { %2261 = vmatprep.mubr.f32.mxu0 %v3056_v9  ;;  %2086 = vmatmul.mubr.f32.gmra.mrb[2].mxu1 %v3188_v17  ;;  %v1616_v9 = vld [vmem:[%s3359_s1 + $0x1c0] sm:$0xff] }
  0x6d   : > { %2461 = vmatpush3.bf16.msra.mxu1 %v2458_v5  ;;  %2262 = vmatmul.mubr.f32.gmra.mrb[2].mxu0 %v3074_v19  ;;  %v1712_v19 = vld [vmem:[%s3359_s1 + $0x3c0] sm:$0xff]  ;;  %v2470_v37 = vpack.c.bf16 %v1617_v32, %v1616_v9 }
  0x6e   : > { %2589 = vmatpush3.bf16.msra.mxu0 %v2586_v8  ;;  %2463 = vmatprep.subr.bf16.mxu1 %v2462_v18  ;;  %v2598_v39 = vpack.c.bf16 %v1713_v34, %v1712_v19  ;;  %v1604_v5 = vld [vmem:[%s2825_s25 + $0x160] sm:$0xff]  ;;  %v2622_v8 = vpack.c.bf16 %v1733_v1, %v1732_v0 }
  0x6f   : > { %2591 = vmatprep.subr.bf16.mxu0 %v2590_v20  ;;  %2088 = vmatprep.mubr.f32.mxu1 %v3206_v27 }
  0x70   : > { %2264 = vmatprep.mubr.f32.mxu0 %v3078_v21  ;;  %2089 = vmatmul.mubr.f32.gmra.mrb[4].mxu1 %v3210_v28  ;;  %v1618_v21 = vld [vmem:[%s3359_s1 + $0x1d0] sm:$0xff] }
  0x71   : > { %2465 = vmatpush3.bf16.msra.mxu1 %v2462_v18  ;;  %2265 = vmatmul.mubr.f32.gmra.mrb[4].mxu0 %v3096_v31  ;;  %v1714_v31 = vld [vmem:[%s3359_s1 + $0x3d0] sm:$0xff]  ;;  %v2474_v43 = vpack.c.bf16 %v1619_v40, %v1618_v21  ;;  %v1737_v18 = vld [vmem:[%s3359_s1 + $0x448] sm:$0xff] }
  0x72   : > { %2593 = vmatpush3.bf16.msra.mxu0 %v2590_v20  ;;  %2467 = vmatprep.subr.bf16.mxu1 %v2466_v29  ;;  %v2602_v44 = vpack.c.bf16 %v1715_v41, %v1714_v31  ;;  %v2630_v20 = vpack.c.bf16 %v1737_v18, %v1736_v13 }
  0x73   : > { %2595 = vmatprep.subr.bf16.mxu0 %v2594_v30  ;;  %2091 = vmatprep.mubr.f32.mxu1 %v3228_v35 }
  0x74   : > { %2267 = vmatprep.mubr.f32.mxu0 %v3100_v33  ;;  %2092 = vmatmul.mubr.f32.gmra.mrb[6].mxu1 %v3232_v36  ;;  %v1716_v33 = vld [vmem:[%s3359_s1 + $0x3e0] sm:$0xff] }
  0x75   : > { %2469 = vmatpush3.bf16.msra.mxu1 %v2466_v29  ;;  %2268 = vmatmul.mubr.f32.gmra.mrb[6].mxu0 %v1679_v38  ;;  %v2606_v49 = vpack.c.bf16 %v1717_v47, %v1716_v33  ;;  %v1742_v29 = vld [vmem:[%s3359_s1 + $0x470] sm:$0xff] }
  0x76   : > { %2597 = vmatpush3.bf16.msra.mxu0 %v2594_v30  ;;  %2471 = vmatprep.subr.bf16.mxu1 %v2470_v37  ;;  %v1743_v30 = vld [vmem:[%s3359_s1 + $0x478] sm:$0xff] }
  0x77   : > { %2599 = vmatprep.subr.bf16.mxu0 %v2598_v39  ;;  %2126 = vmatprep.mubr.f32.mxu1 %v1600_v42 }
  0x78   : > { %2302 = vmatprep.mubr.f32.mxu0 %v2902_v60  ;;  %v1719_v60 = vld [vmem:[%s3359_s1 + $0x3f8] sm:$0xff] }
  0x79   : > { %2473 = vmatpush3.bf16.msra.mxu1 %v2470_v37  ;;  %v2610_v54 = vpack.c.bf16 %v1719_v60, %v1718_v52 }
  0x7a   : > { %2601 = vmatpush3.bf16.msra.mxu0 %v2598_v39  ;;  %2475 = vmatprep.subr.bf16.mxu1 %v2474_v43 }
  0x7b   : > { %2603 = vmatprep.subr.bf16.mxu0 %v2602_v44 }
  0x7d   : > { %2477 = vmatpush3.bf16.msra.mxu1 %v2474_v43 }
  0x7e   : > { %2605 = vmatpush3.bf16.msra.mxu0 %v2602_v44  ;;  %2479 = vmatprep.subr.bf16.mxu1 %v2478_v48 }
  0x7f   : > { %2607 = vmatprep.subr.bf16.mxu0 %v2606_v49 }
  0x81   : > { %2481 = vmatpush3.bf16.msra.mxu1 %v2478_v48 }
  0x82   : > { %2609 = vmatpush3.bf16.msra.mxu0 %v2606_v49  ;;  %2483 = vmatprep.subr.bf16.mxu1 %v2482_v53 }
  0x83   : > { %2611 = vmatprep.subr.bf16.mxu0 %v2610_v54 }
  0x85   : > { %2485 = vmatpush3.bf16.msra.mxu1 %v2482_v53 }
  0x86   : > { %2613 = vmatpush3.bf16.msra.mxu0 %v2610_v54  ;;  %2646 = vmatprep.subr.bf16.mxu1 %v2614_v57 }
  0x87   : > { %2615 = vmatprep.subr.bf16.mxu0 %v2614_v57 }
  0x88   : > { %2127 = vmatmul.mubr.f32.vlgmr.msra.gmra.mrb[0].mxu1 %v1601_v61 }
  0x89   : > { %2303 = vmatmul.mubr.f32.vlgmr.msra.gmra.mrb[0].mxu0 %v2919_v4  ;;  %2654 = vmatpush3.bf16.msra.mxu1 %v2614_v57  ;;  %v1735_v4 = vld [vmem:[%s3359_s1 + $0x438] sm:$0xff] }
  0x8a   : > { %2617 = vmatpush3.bf16.msra.mxu0 %v2614_v57  ;;  %2129 = vmatprep.mubr.f32.mxu1 %v1602_v62  ;;  %v2626_v12 = vpack.c.bf16 %v1735_v4, %v1734_v10 }
  0x8b   : > { %2305 = vmatprep.mubr.f32.mxu0 %v2923_v6  ;;  %2619 = vmatprep.subr.bf16.mxu0 %v2618_v63  ;;  %v1606_v6 = vld [vmem:[%s2825_s25 + $0x180] sm:$0xff] }
  0x8c   : > { %2130 = vmatmul.mubr.f32.gmra.mrb[2].mxu1 %v1603_v2  ;;  %2647 = vmatprep.subr.bf16.mxu1 %v2618_v63 }
  0x8d   : > { %2306 = vmatmul.mubr.f32.gmra.mrb[2].mxu0 %v2941_v14  ;;  %2655 = vmatpush3.bf16.msra.mxu1 %v2618_v63  ;;  %v1607_v14 = vld [vmem:[%s2825_s25 + $0x190] sm:$0xff] }
  0x8e   : > { %2621 = vmatpush3.bf16.msra.mxu0 %v2618_v63  ;;  %2132 = vmatprep.mubr.f32.mxu1 %v1604_v5 }
  0x8f   : > { %2308 = vmatprep.mubr.f32.mxu0 %v2945_v16  ;;  %2623 = vmatprep.subr.bf16.mxu0 %v2622_v8  ;;  %v1703_v16 = vld [vmem:[%s2825_s25 + $0x110] sm:$0xff] }
  0x90   : > { %2133 = vmatmul.mubr.f32.gmra.mrb[4].mxu1 %v1605_v11  ;;  %2648 = vmatprep.subr.bf16.mxu1 %v2622_v8 }
  0x91   : > { %2309 = vmatmul.mubr.f32.gmra.mrb[4].mxu0 %v2963_v24  ;;  %2656 = vmatpush3.bf16.msra.mxu1 %v2622_v8  ;;  %v2634_v24 = vpack.c.bf16 %v1739_v23, %v1738_v22 }
  0x92   : > { %2625 = vmatpush3.bf16.msra.mxu0 %v2622_v8  ;;  %2135 = vmatprep.mubr.f32.mxu1 %v1606_v6 }
  0x93   : > { %2311 = vmatprep.mubr.f32.mxu0 %v2967_v26  ;;  %2627 = vmatprep.subr.bf16.mxu0 %v2626_v12  ;;  %v1740_v26 = vld [vmem:[%s3359_s1 + $0x460] sm:$0xff] }
  0x94   : > { %2136 = vmatmul.mubr.f32.gmra.mrb[6].mxu1 %v1607_v14  ;;  %2649 = vmatprep.subr.bf16.mxu1 %v2626_v12  ;;  %v2638_v25 = vpack.c.bf16 %v1741_v7, %v1740_v26 }
  0x95   : > { %2312 = vmatmul.mubr.f32.gmra.mrb[6].mxu0 %v1703_v16  ;;  %2657 = vmatpush3.bf16.msra.mxu1 %v2626_v12 }
  0x96   : > { %2629 = vmatpush3.bf16.msra.mxu0 %v2626_v12  ;;  %2650 = vmatprep.subr.bf16.mxu1 %v2630_v20 }
  0x97   : > { %2631 = vmatprep.subr.bf16.mxu0 %v2630_v20  ;;  %2346 = vmatprep.mubr.f32.mxu0 %v3168_v3  ;;  %v2642_v3 = vpack.c.bf16 %v1743_v30, %v1742_v29 }
  0x98   : > { %2352 = vmatprep.mubr.f32.mxu1 %v3210_v28  ;;  %v1727_v28 = vld [vmem:[%s2825_s25 + $0x81] sm:$0xff]  ;;  %s1557_s25 = sshll.u32 %s2769_s13, 3  ;;  %s3367_s13 = smov (!%p184_p5, %s2769_s13), 1 }
  0x99   : > { %2658 = vmatpush3.bf16.msra.mxu1 %v2630_v20  ;;  %p179_p4 = scmp.lt.s32.totalorder %s1557_s25, 15  ;;  %s1559_s22 = sshll.u32 %s3367_s13, 1 }
  0x9a   : > { %2633 = vmatpush3.bf16.msra.mxu0 %v2630_v20  ;;  %2651 = vmatprep.subr.bf16.mxu1 %v2634_v24  ;;  %s187_s20 = scalar_lea.vmem %s3361_s3, %s1559_s22 }
  0x9b   : > { %2635 = vmatprep.subr.bf16.mxu0 %v2634_v24  ;;  %s3365_s25 = smov (!%p179_p4, %s1557_s25), 15 }
  0x9c   : > { %s1558_s17 = sshll.u32 %s3365_s25, 3 }
  0x9d   : > { %2659 = vmatpush3.bf16.msra.mxu1 %v2634_v24  ;;  %s182_s21 = scalar_lea.vmem %s3360_s2, %s1558_s17 }
  0x9e   : > { %2637 = vmatpush3.bf16.msra.mxu0 %v2634_v24  ;;  %2652 = vmatprep.subr.bf16.mxu1 %v2638_v25 }
  0x9f   : > { %2639 = vmatprep.subr.bf16.mxu0 %v2638_v25 }
  0xa1   : > { %2660 = vmatpush3.bf16.msra.mxu1 %v2638_v25 }
  0xa2   : > { %2641 = vmatpush3.bf16.msra.mxu0 %v2638_v25  ;;  %2653 = vmatprep.subr.bf16.mxu1 %v2642_v3 }
  0xa3   : > { %2643 = vmatprep.subr.bf16.mxu0 %v2642_v3 }
  0xa5   : > { %2661 = vmatpush3.bf16.msra.mxu1 %v2642_v3 }
  0xa6   : > { %2645 = vmatpush3.bf16.msra.mxu0 %v2642_v3 }
  0xa8   : > { %2353 = vmatmul.mubr.f32.vlgmr.msra.gmra.mrb[8].mxu1 %v3228_v35 }
  0xa9   : > { %2347 = vmatmul.mubr.f32.vlgmr.msra.gmra.mrb[0].mxu0 %v3184_v15  ;;  %2355 = vmatprep.mubr.f32.mxu1 %v3232_v36 }
  0xaa   : > { %2349 = vmatprep.mubr.f32.mxu0 %v3188_v17 }
  0xac   : > { %2356 = vmatmul.mubr.f32.gmra.mrb[10].mxu1 %v1727_v28 }
  0xad   : > { %2350 = vmatmul.mubr.f32.gmra.mrb[2].mxu0 %v3206_v27 }
 0x15b   : > { %v2128_v9 = vpop.f32.mrb[0].mxu1 }
 0x15c   : > { %v678_v32 = vpop.f32.mrb[1].mxu1 }
 0x15f   : > { %v2131_v19 = vpop.f32.mrb[2].mxu1 }
 0x160   : > { %v688_v34 = vpop.f32.mrb[3].mxu1 }
 0x163   : > { %v2134_v37 = vpop.f32.mrb[4].mxu1 }
 0x164   : > { %v2310_v38 = vpop.f32.mrb[4].mxu0  ;;  %v698_v39 = vpop.f32.mrb[5].mxu1 }
 0x165   : > { %v2666_v21 = vadd.f32 %v2310_v38, %v2134_v37  ;;  %v1253_v35 = vpop.f32.mrb[5].mxu0 }
 0x166   : > { %v2668_v40 = vadd.f32 %v1253_v35, %v698_v39 }
 0x167   : > { %v2137_v15 = vpop.f32.mrb[6].mxu1 }
 0x168   : > { %v2313_v31 = vpop.f32.mrb[6].mxu0  ;;  %v708_v36 = vpop.f32.mrb[7].mxu1 }
 0x169   : > { %v2670_v41 = vadd.f32 %v2313_v31, %v2137_v15  ;;  %v1263_v42 = vpop.f32.mrb[7].mxu0 }
 0x16a   : > { %v2672_v17 = vadd.f32 %v1263_v42, %v708_v36 }
 0x17b   : > { %v2354_v27 = vpop.f32.mrb[8].mxu1 }
 0x17c   : > { %v2348_v43 = vpop.f32.mrb[0].mxu0  ;;  %v2667_v44 = vadd.f32 %v2666_v21, %v2354_v27  ;;  %v1391_v45 = vpop.f32.mrb[9].mxu1 }
 0x17d   : > { %v2662_v46 = vadd.f32 %v2348_v43, %v2128_v9  ;;  %v1371_v33 = vpop.f32.mrb[1].mxu0  ;;  %v2669_v47 = vadd.f32 %v2668_v40, %v1391_v45 }
 0x17e   : > { %1423 = vst [vmem:[%s182_s21 + $0x28] sm:$0xff] %v2667_v44  ;;  %v2663_v48 = vadd.f32 %v1371_v33, %v678_v32  ;;  %v1444_v10 = vmul.f32 %v2667_v44, %v2667_v44 }
 0x17f   : > { %1419 = vst [vmem:[%s182_s21 + $0x8] sm:$0xff] %v2662_v46  ;;  %v1440_v49 = vmul.f32 %v2662_v46, %v2662_v46  ;;  %1422 = vst [vmem:[%s182_s21 + $0x20] sm:$0xff] %v2669_v47  ;;  %v2357_v50 = vpop.f32.mrb[10].mxu1  ;;  %v1443_v2 = vmul.f32 %v2669_v47, %v2669_v47 }
 0x180   : > { %1418 = vst [vmem:[%s182_s21] sm:$0xff] %v2663_v48  ;;  %v1426_v51 = vadd.f32 %v2663_v48, %v2662_v46  ;;  %v1439_v52 = vmul.f32 %v2663_v48, %v2663_v48  ;;  %v2351_v60 = vpop.f32.mrb[2].mxu0  ;;  %v2671_v53 = vadd.f32 %v2670_v41, %v2357_v50  ;;  %v1401_v54 = vpop.f32.mrb[11].mxu1 }
 0x181   : > { %v2664_v55 = vadd.f32 %v2351_v60, %v2131_v19  ;;  %v1381_v56 = vpop.f32.mrb[3].mxu0  ;;  %v2673_v57 = vadd.f32 %v2672_v17, %v1401_v54 }
 0x182   : > { %v1447_v58 = vadd.f32 %v1440_v49, %v1439_v52  ;;  %1425 = vst [vmem:[%s182_s21 + $0x38] sm:$0xff] %v2671_v53  ;;  %v2665_v59 = vadd.f32 %v1381_v56, %v688_v34  ;;  %v1446_v18 = vmul.f32 %v2671_v53, %v2671_v53 }
 0x183   : > { %1421 = vst [vmem:[%s182_s21 + $0x18] sm:$0xff] %v2664_v55  ;;  %1424 = vst [vmem:[%s182_s21 + $0x30] sm:$0xff] %v2673_v57  ;;  %v1442_v63 = vmul.f32 %v2664_v55, %v2664_v55  ;;  %v1445_v12 = vmul.f32 %v2673_v57, %v2673_v57 }
 0x184   : > { %1420 = vst [vmem:[%s182_s21 + $0x10] sm:$0xff] %v2665_v59  ;;  %v1427_v61 = vadd.f32 %v2665_v59, %v1426_v51  ;;  %v1441_v62 = vmul.f32 %v2665_v59, %v2665_v59 }
 0x186   : > { %v1428_v0 = vadd.f32 %v2664_v55, %v1427_v61  ;;  %v1448_v1 = vadd.f32 %v1447_v58, %v1441_v62 }
 0x188   : > { %v1449_v5 = vadd.f32 %v1448_v1, %v1442_v63  ;;  %v1429_v8 = vadd.f32 %v2669_v47, %v1428_v0 }
 0x18a   : > { %v1430_v4 = vadd.f32 %v2667_v44, %v1429_v8  ;;  %v1450_v11 = vadd.f32 %v1449_v5, %v1443_v2 }
 0x18c   : > { %v1431_v6 = vadd.f32 %v2673_v57, %v1430_v4  ;;  %v1451_v13 = vadd.f32 %v1450_v11, %v1444_v10 }
 0x18e   : > { %v1432_v14 = vadd.f32 %v2671_v53, %v1431_v6  ;;  %v1452_v16 = vadd.f32 %v1451_v13, %v1445_v12 }
 0x190   : > { %v1433_v20 = vrot.slane %v1432_v14, 4  ;;  %v1453_v22 = vadd.f32 %v1452_v16, %v1446_v18 }
 0x192   : > { %v1434_v23 = vadd.f32 %v1433_v20, %v1432_v14  ;;  %v1454_v24 = vrot.slane %v1453_v22, 4 }
 0x194   : > { %v1435_v26 = vrot.slane %v1434_v23, 2  ;;  %v1455_v7 = vadd.f32 %v1454_v24, %v1453_v22 }
 0x196   : > { %v1436_v25 = vadd.f32 %v1435_v26, %v1434_v23  ;;  %v1456_v29 = vrot.slane %v1455_v7, 2 }
 0x198   : > { %v1437_v30 = vrot.slane %v1436_v25, 1  ;;  %v1457_v3 = vadd.f32 %v1456_v29, %v1455_v7 }
 0x19a   : > { %v1458_v28 = vrot.slane %v1457_v3, 1  ;;  %v1438_v9 = vadd.f32 %v1437_v30, %v1436_v25 }
 0x19c   : > { %v1459_v32 = vadd.f32 %v1458_v28, %v1457_v3 }
 0x19e   : > { %v1461_v19 = vsel %vm1460_vm0, %v1438_v9, %v1459_v32 }
 0x19f   : > { %1462 = vst [vmem:[%s187_s20] sm:$0x3] %v1461_v19 }
 0x1a0 PF: > { %s14_s12 = sadd.s32 1, %s2741_s12  }
 0x1a1   : > { %p11_p6 = scmp.ge.s32.totalorder %s14_s12, 4  }
 0x1a3   :  { %13 = sbr.rel (!%p11_p6) target bundleno = 1 (0x1), region = 83 }

// kernel: bottleneck_forward.10
= control target key start
LH: loop header
LB: loop body
LE: loop exit
PB: predicated region body
PF: predicated region fallthrough
CT: control target
= control target key end

     0   :  { %vm351_vm0 = vcmask 1040384   ;;  %s665_s1 = inlined_call_operand.vmem [shape: f32[128,128], index: 1, kind: input, shape index: {}]   ;;  %s666_s0 = inlined_call_operand.vmem [shape: f32[128,128], index: 0, kind: input, shape index: {}]   ;;  %s667_s2 = inlined_call_operand.vmem [shape: f32[128,128], index: 2, kind: output, shape index: {0}]   ;;  %s668_s3 = inlined_call_operand.vmem [shape: f32[1,2,128], index: 3, kind: output, shape index: {1}]  }
   0x1   :  { %v65_v0 = vld [vmem:[%s665_s1] sm:$0xff]  ;;  %v66_v1 = vld [vmem:[%s665_s1 + $0x8] sm:$0xff]  ;;  %v67_v2 = vld [vmem:[%s665_s1 + $0x10] sm:$0xff] }
   0x2   :  { %v450_v3 = vpack.c.bf16 %v66_v1, %v65_v0  ;;  %v68_v4 = vld [vmem:[%s665_s1 + $0x18] sm:$0xff]  ;;  %v69_v6 = vld [vmem:[%s665_s1 + $0x20] sm:$0xff]  ;;  %v70_v7 = vld [vmem:[%s665_s1 + $0x28] sm:$0xff] }
   0x3   :  { %v454_v5 = vpack.c.bf16 %v68_v4, %v67_v2  ;;  %v458_v8 = vpack.c.bf16 %v70_v7, %v69_v6  ;;  %v33_v9 = vld [vmem:[%s666_s0] sm:$0xff]  ;;  %v71_v10 = vld [vmem:[%s665_s1 + $0x30] sm:$0xff]  ;;  %v72_v11 = vld [vmem:[%s665_s1 + $0x38] sm:$0xff] }
   0x4   :  { %451 = vmatprep.subr.bf16.mxu0 %v450_v3  ;;  %482 = vmatprep.subr.bf16.mxu1 %v450_v3  ;;  %v41_v12 = vld [vmem:[%s666_s0 + $0x40] sm:$0xff]  ;;  %v462_v13 = vpack.c.bf16 %v72_v11, %v71_v10  ;;  %v74_v15 = vld [vmem:[%s665_s1 + $0x48] sm:$0xff]  ;;  %v75_v17 = vld [vmem:[%s665_s1 + $0x50] sm:$0xff] }
   0x5   :  { %453 = vmatpush3.bf16.msra.mxu0 %v450_v3  ;;  %490 = vmatpush3.bf16.msra.mxu1 %v450_v3  ;;  %v73_v14 = vld [vmem:[%s665_s1 + $0x40] sm:$0xff]  ;;  %v76_v18 = vld [vmem:[%s665_s1 + $0x58] sm:$0xff]  ;;  %v78_v21 = vld [vmem:[%s665_s1 + $0x68] sm:$0xff] }
   0x6   :  { %455 = vmatprep.subr.bf16.mxu0 %v454_v5  ;;  %483 = vmatprep.subr.bf16.mxu1 %v454_v5  ;;  %v466_v16 = vpack.c.bf16 %v74_v15, %v73_v14  ;;  %v470_v19 = vpack.c.bf16 %v76_v18, %v75_v17  ;;  %v77_v20 = vld [vmem:[%s665_s1 + $0x60] sm:$0xff]  ;;  %v79_v23 = vld [vmem:[%s665_s1 + $0x70] sm:$0xff]  ;;  %v80_v24 = vld [vmem:[%s665_s1 + $0x78] sm:$0xff] }
   0x7   :  { %426 = vmatprep.mubr.f32.mxu0 %v33_v9  ;;  %438 = vmatprep.mubr.f32.mxu1 %v41_v12  ;;  %v474_v22 = vpack.c.bf16 %v78_v21, %v77_v20  ;;  %v478_v25 = vpack.c.bf16 %v80_v24, %v79_v23  ;;  %v34_v26 = vld [vmem:[%s666_s0 + $0x8] sm:$0xff]  ;;  %v35_v28 = vld [vmem:[%s666_s0 + $0x10] sm:$0xff]  ;;  %v36_v30 = vld [vmem:[%s666_s0 + $0x18] sm:$0xff] }
   0x8   :  { %v42_v27 = vld [vmem:[%s666_s0 + $0x48] sm:$0xff]  ;;  %v43_v29 = vld [vmem:[%s666_s0 + $0x50] sm:$0xff]  ;;  %v44_v31 = vld [vmem:[%s666_s0 + $0x58] sm:$0xff] }
   0x9   :  { %457 = vmatpush3.bf16.msra.mxu0 %v454_v5  ;;  %491 = vmatpush3.bf16.msra.mxu1 %v454_v5  ;;  %v37_v32 = vld [vmem:[%s666_s0 + $0x20] sm:$0xff]  ;;  %v38_v34 = vld [vmem:[%s666_s0 + $0x28] sm:$0xff]  ;;  %v39_v36 = vld [vmem:[%s666_s0 + $0x30] sm:$0xff] }
   0xa   :  { %459 = vmatprep.subr.bf16.mxu0 %v458_v8  ;;  %484 = vmatprep.subr.bf16.mxu1 %v458_v8  ;;  %v45_v33 = vld [vmem:[%s666_s0 + $0x60] sm:$0xff]  ;;  %v46_v35 = vld [vmem:[%s666_s0 + $0x68] sm:$0xff]  ;;  %v47_v37 = vld [vmem:[%s666_s0 + $0x70] sm:$0xff] }
   0xb   :  { %v40_v38 = vld [vmem:[%s666_s0 + $0x38] sm:$0xff] }
   0xc   :  { %v48_v39 = vld [vmem:[%s666_s0 + $0x78] sm:$0xff] }
   0xd   :  { %461 = vmatpush3.bf16.msra.mxu0 %v458_v8  ;;  %492 = vmatpush3.bf16.msra.mxu1 %v458_v8 }
   0xe   :  { %463 = vmatprep.subr.bf16.mxu0 %v462_v13  ;;  %485 = vmatprep.subr.bf16.mxu1 %v462_v13 }
  0x11   :  { %465 = vmatpush3.bf16.msra.mxu0 %v462_v13  ;;  %493 = vmatpush3.bf16.msra.mxu1 %v462_v13 }
  0x12   :  { %467 = vmatprep.subr.bf16.mxu0 %v466_v16  ;;  %486 = vmatprep.subr.bf16.mxu1 %v466_v16 }
  0x15   :  { %469 = vmatpush3.bf16.msra.mxu0 %v466_v16  ;;  %494 = vmatpush3.bf16.msra.mxu1 %v466_v16 }
  0x16   :  { %471 = vmatprep.subr.bf16.mxu0 %v470_v19  ;;  %487 = vmatprep.subr.bf16.mxu1 %v470_v19 }
  0x19   :  { %473 = vmatpush3.bf16.msra.mxu0 %v470_v19  ;;  %495 = vmatpush3.bf16.msra.mxu1 %v470_v19 }
  0x1a   :  { %475 = vmatprep.subr.bf16.mxu0 %v474_v22  ;;  %488 = vmatprep.subr.bf16.mxu1 %v474_v22 }
  0x1d   :  { %477 = vmatpush3.bf16.msra.mxu0 %v474_v22  ;;  %496 = vmatpush3.bf16.msra.mxu1 %v474_v22 }
  0x1e   :  { %479 = vmatprep.subr.bf16.mxu0 %v478_v25  ;;  %489 = vmatprep.subr.bf16.mxu1 %v478_v25 }
  0x21   :  { %481 = vmatpush3.bf16.msra.mxu0 %v478_v25  ;;  %497 = vmatpush3.bf16.msra.mxu1 %v478_v25 }
  0x24   :  { %427 = vmatmul.mubr.f32.vlgmr.msra.gmra.mrb[0].mxu0 %v34_v26  ;;  %439 = vmatmul.mubr.f32.vlgmr.msra.gmra.mrb[0].mxu1 %v42_v27 }
  0x25   :  { %429 = vmatprep.mubr.f32.mxu0 %v35_v28  ;;  %441 = vmatprep.mubr.f32.mxu1 %v43_v29 }
  0x28   :  { %430 = vmatmul.mubr.f32.gmra.mrb[2].mxu0 %v36_v30  ;;  %442 = vmatmul.mubr.f32.gmra.mrb[2].mxu1 %v44_v31 }
  0x29   :  { %432 = vmatprep.mubr.f32.mxu0 %v37_v32  ;;  %444 = vmatprep.mubr.f32.mxu1 %v45_v33 }
  0x2c   :  { %433 = vmatmul.mubr.f32.gmra.mrb[4].mxu0 %v38_v34  ;;  %445 = vmatmul.mubr.f32.gmra.mrb[4].mxu1 %v46_v35 }
  0x2d   :  { %435 = vmatprep.mubr.f32.mxu0 %v39_v36  ;;  %447 = vmatprep.mubr.f32.mxu1 %v47_v37 }
  0x30   :  { %436 = vmatmul.mubr.f32.gmra.mrb[6].mxu0 %v40_v38  ;;  %448 = vmatmul.mubr.f32.gmra.mrb[6].mxu1 %v48_v39 }
  0xf7   :  { %v428_v40 = vpop.f32.mrb[0].mxu0  ;;  %v440_v41 = vpop.f32.mrb[0].mxu1 }
  0xf8   :  { %278 = vst [vmem:[%s667_s2 + $0x8] sm:$0xff] %v428_v40  ;;  %v315_v42 = vmul.f32 %v428_v40, %v428_v40  ;;  %v147_v43 = vpop.f32.mrb[1].mxu0  ;;  %286 = vst [vmem:[%s667_s2 + $0x48] sm:$0xff] %v440_v41  ;;  %v187_v44 = vpop.f32.mrb[1].mxu1  ;;  %v323_v16 = vmul.f32 %v440_v41, %v440_v41 }
  0xf9   :  { %277 = vst [vmem:[%s667_s2] sm:$0xff] %v147_v43  ;;  %v293_v45 = vadd.f32 %v428_v40, %v147_v43  ;;  %v314_v46 = vmul.f32 %v147_v43, %v147_v43  ;;  %285 = vst [vmem:[%s667_s2 + $0x40] sm:$0xff] %v187_v44  ;;  %v322_v13 = vmul.f32 %v187_v44, %v187_v44 }
  0xfb   :  { %v330_v47 = vadd.f32 %v315_v42, %v314_v46  ;;  %v431_v48 = vpop.f32.mrb[2].mxu0  ;;  %v443_v49 = vpop.f32.mrb[2].mxu1 }
  0xfc   :  { %280 = vst [vmem:[%s667_s2 + $0x18] sm:$0xff] %v431_v48  ;;  %v157_v50 = vpop.f32.mrb[3].mxu0  ;;  %288 = vst [vmem:[%s667_s2 + $0x58] sm:$0xff] %v443_v49  ;;  %v197_v51 = vpop.f32.mrb[3].mxu1  ;;  %v317_v54 = vmul.f32 %v431_v48, %v431_v48  ;;  %v325_v22 = vmul.f32 %v443_v49, %v443_v49 }
  0xfd   :  { %279 = vst [vmem:[%s667_s2 + $0x10] sm:$0xff] %v157_v50  ;;  %v294_v52 = vadd.f32 %v293_v45, %v157_v50  ;;  %v316_v53 = vmul.f32 %v157_v50, %v157_v50  ;;  %287 = vst [vmem:[%s667_s2 + $0x50] sm:$0xff] %v197_v51  ;;  %v324_v19 = vmul.f32 %v197_v51, %v197_v51 }
  0xff   :  { %v331_v55 = vadd.f32 %v330_v47, %v316_v53  ;;  %v434_v56 = vpop.f32.mrb[4].mxu0  ;;  %v295_v57 = vadd.f32 %v431_v48, %v294_v52  ;;  %v446_v58 = vpop.f32.mrb[4].mxu1 }
 0x100   :  { %282 = vst [vmem:[%s667_s2 + $0x28] sm:$0xff] %v434_v56  ;;  %v167_v59 = vpop.f32.mrb[5].mxu0  ;;  %290 = vst [vmem:[%s667_s2 + $0x68] sm:$0xff] %v446_v58  ;;  %v207_v60 = vpop.f32.mrb[5].mxu1  ;;  %v319_v0 = vmul.f32 %v434_v56, %v434_v56  ;;  %v327_v28 = vmul.f32 %v446_v58, %v446_v58 }
 0x101   :  { %281 = vst [vmem:[%s667_s2 + $0x20] sm:$0xff] %v167_v59  ;;  %v296_v61 = vadd.f32 %v295_v57, %v167_v59  ;;  %v318_v62 = vmul.f32 %v167_v59, %v167_v59  ;;  %v332_v63 = vadd.f32 %v331_v55, %v317_v54  ;;  %289 = vst [vmem:[%s667_s2 + $0x60] sm:$0xff] %v207_v60 }
 0x102   :  { %v326_v25 = vmul.f32 %v207_v60, %v207_v60 }
 0x103   :  { %v333_v1 = vadd.f32 %v332_v63, %v318_v62  ;;  %v437_v2 = vpop.f32.mrb[6].mxu0  ;;  %v297_v3 = vadd.f32 %v434_v56, %v296_v61  ;;  %v449_v4 = vpop.f32.mrb[6].mxu1 }
 0x104   :  { %284 = vst [vmem:[%s667_s2 + $0x38] sm:$0xff] %v437_v2  ;;  %v177_v5 = vpop.f32.mrb[7].mxu0  ;;  %292 = vst [vmem:[%s667_s2 + $0x78] sm:$0xff] %v449_v4  ;;  %v217_v6 = vpop.f32.mrb[7].mxu1  ;;  %v321_v10 = vmul.f32 %v437_v2, %v437_v2  ;;  %v329_v34 = vmul.f32 %v449_v4, %v449_v4 }
 0x105   :  { %283 = vst [vmem:[%s667_s2 + $0x30] sm:$0xff] %v177_v5  ;;  %v298_v7 = vadd.f32 %v297_v3, %v177_v5  ;;  %v320_v8 = vmul.f32 %v177_v5, %v177_v5  ;;  %v334_v9 = vadd.f32 %v333_v1, %v319_v0  ;;  %291 = vst [vmem:[%s667_s2 + $0x70] sm:$0xff] %v217_v6 }
 0x106   :  { %v328_v31 = vmul.f32 %v217_v6, %v217_v6 }
 0x107   :  { %v299_v11 = vadd.f32 %v437_v2, %v298_v7  ;;  %v335_v12 = vadd.f32 %v334_v9, %v320_v8 }
 0x109   :  { %v336_v14 = vadd.f32 %v335_v12, %v321_v10  ;;  %v300_v15 = vadd.f32 %v299_v11, %v187_v44 }
 0x10b   :  { %v337_v17 = vadd.f32 %v336_v14, %v322_v13  ;;  %v301_v18 = vadd.f32 %v440_v41, %v300_v15 }
 0x10d   :  { %v302_v20 = vadd.f32 %v301_v18, %v197_v51  ;;  %v338_v21 = vadd.f32 %v337_v17, %v323_v16 }
 0x10f   :  { %v339_v23 = vadd.f32 %v338_v21, %v324_v19  ;;  %v303_v24 = vadd.f32 %v443_v49, %v302_v20 }
 0x111   :  { %v304_v26 = vadd.f32 %v303_v24, %v207_v60  ;;  %v340_v27 = vadd.f32 %v339_v23, %v325_v22 }
 0x113   :  { %v341_v29 = vadd.f32 %v340_v27, %v326_v25  ;;  %v305_v30 = vadd.f32 %v446_v58, %v304_v26 }
 0x115   :  { %v306_v32 = vadd.f32 %v305_v30, %v217_v6  ;;  %v342_v33 = vadd.f32 %v341_v29, %v327_v28 }
 0x117   :  { %v307_v35 = vadd.f32 %v449_v4, %v306_v32  ;;  %v343_v36 = vadd.f32 %v342_v33, %v328_v31 }
 0x119   :  { %v308_v37 = vrot.slane %v307_v35, 4  ;;  %v344_v38 = vadd.f32 %v343_v36, %v329_v34 }
 0x11b   :  { %v309_v39 = vadd.f32 %v308_v37, %v307_v35  ;;  %v345_v40 = vrot.slane %v344_v38, 4 }
 0x11d   :  { %v310_v41 = vrot.slane %v309_v39, 2  ;;  %v346_v42 = vadd.f32 %v345_v40, %v344_v38 }
 0x11f   :  { %v311_v43 = vadd.f32 %v310_v41, %v309_v39  ;;  %v347_v44 = vrot.slane %v346_v42, 2 }
 0x121   :  { %v312_v45 = vrot.slane %v311_v43, 1  ;;  %v348_v46 = vadd.f32 %v347_v44, %v346_v42 }
 0x123   :  { %v349_v47 = vrot.slane %v348_v46, 1  ;;  %v313_v48 = vadd.f32 %v312_v45, %v311_v43 }
 0x125   :  { %v350_v49 = vadd.f32 %v349_v47, %v348_v46 }
 0x127   :  { %v352_v50 = vsel %vm351_vm0, %v313_v48, %v350_v49 }
 0x128   :  { %353 = vst [vmem:[%s668_s3] sm:$0x3] %v352_v50 }

// kernel: bottleneck_forward.11
= control target key start
LH: loop header
LB: loop body
LE: loop exit
PB: predicated region body
PF: predicated region fallthrough
CT: control target
= control target key end

     0   :  { %s466_s0 = inlined_call_operand.vmem [shape: f32[128,128], index: 0, kind: input, shape index: {}, may-alias: {0,6}]   ;;  %s467_s1 = inlined_call_operand.vmem [shape: f32[128,128], index: 1, kind: input, shape index: {}]   ;;  %s468_s2 = inlined_call_operand.vmem [shape: f32[1,128], index: 2, kind: input, shape index: {}]   ;;  %s469_s3 = inlined_call_operand.vmem [shape: f32[1,128], index: 3, kind: input, shape index: {}]   ;;  %s470_s4 = inlined_call_operand.vmem [shape: f32[1,128], index: 4, kind: input, shape index: {}]   ;;  %s471_s5 = inlined_call_operand.vmem [shape: f32[1,128], index: 5, kind: input, shape index: {}]   ;;  %s472_s6 = inlined_call_operand.vmem [shape: f32[128,128], index: 6, kind: output, shape index: {}, may-alias: {0,6}]  }
   0x1   :  { %v23_v0 = vld [vmem:[%s466_s0] sm:$0xff]  ;;  %v24_v8 = vld [vmem:[%s466_s0 + $0x8] sm:$0xff]  ;;  %v25_v10 = vld [vmem:[%s466_s0 + $0x10] sm:$0xff] }
   0x2   :  { %v244_v1 = vld [vmem:[%s468_s2] ss:$0 sm:$0xff]  ;;  %v86_v9 = vld [vmem:[%s467_s1 + $0x8] sm:$0xff]  ;;  %v87_v15 = vld [vmem:[%s467_s1 + $0x10] sm:$0xff] }
   0x3   :  { %v249_v2 = vld [vmem:[%s469_s3] ss:$0 sm:$0xff]  ;;  %v46_v3 = vmul.f32 %v244_v1, %v23_v0  ;;  %v47_v12 = vmul.f32 %v244_v1, %v24_v8  ;;  %v48_v14 = vmul.f32 %v244_v1, %v25_v10  ;;  %v26_v16 = vld [vmem:[%s466_s0 + $0x18] sm:$0xff]  ;;  %v28_v24 = vld [vmem:[%s466_s0 + $0x28] sm:$0xff] }
   0x4   :  { %v85_v4 = vld [vmem:[%s467_s1] sm:$0xff]  ;;  %v88_v17 = vld [vmem:[%s467_s1 + $0x18] sm:$0xff]  ;;  %v49_v20 = vmul.f32 %v244_v1, %v26_v16  ;;  %v90_v29 = vld [vmem:[%s467_s1 + $0x28] sm:$0xff]  ;;  %v51_v38 = vmul.f32 %v244_v1, %v28_v24 }
   0x5   :  { %v258_v5 = vld [vmem:[%s470_s4] ss:$0 sm:$0xff]  ;;  %v69_v11 = vadd.f32 %v249_v2, %v46_v3  ;;  %v70_v25 = vadd.f32 %v249_v2, %v47_v12  ;;  %v71_v27 = vadd.f32 %v249_v2, %v48_v14  ;;  %v29_v34 = vld [vmem:[%s466_s0 + $0x30] sm:$0xff]  ;;  %v30_v44 = vld [vmem:[%s466_s0 + $0x38] sm:$0xff] }
   0x6   :  { %v263_v6 = vld [vmem:[%s471_s5] ss:$0 sm:$0xff]  ;;  %v108_v7 = vmul.f32 %v258_v5, %v85_v4  ;;  %v109_v13 = vmul.f32 %v258_v5, %v86_v9  ;;  %v110_v19 = vmul.f32 %v258_v5, %v87_v15  ;;  %v111_v21 = vmul.f32 %v258_v5, %v88_v17  ;;  %v91_v39 = vld [vmem:[%s467_s1 + $0x30] sm:$0xff]  ;;  %v92_v45 = vld [vmem:[%s467_s1 + $0x38] sm:$0xff] }
   0x7   :  { %v27_v22 = vld [vmem:[%s466_s0 + $0x20] sm:$0xff]  ;;  %v72_v32 = vadd.f32 %v249_v2, %v49_v20  ;;  %v113_v43 = vmul.f32 %v258_v5, %v90_v29  ;;  %v74_v48 = vadd.f32 %v249_v2, %v51_v38  ;;  %v52_v49 = vmul.f32 %v244_v1, %v29_v34  ;;  %v94_v3 = vld [vmem:[%s467_s1 + $0x48] sm:$0xff]  ;;  %v96_v17 = vld [vmem:[%s467_s1 + $0x58] sm:$0xff] }
   0x8   :  { %v131_v18 = vadd.f32 %v263_v6, %v108_v7  ;;  %v89_v23 = vld [vmem:[%s467_s1 + $0x20] sm:$0xff]  ;;  %v132_v26 = vadd.f32 %v263_v6, %v109_v13  ;;  %v50_v28 = vmul.f32 %v244_v1, %v27_v22  ;;  %v133_v31 = vadd.f32 %v263_v6, %v110_v19 }
   0x9   :  { %v134_v33 = vadd.f32 %v263_v6, %v111_v21  ;;  %v112_v37 = vmul.f32 %v258_v5, %v89_v23  ;;  %v31_v50 = vld [vmem:[%s466_s0 + $0x40] sm:$0xff]  ;;  %v136_v54 = vadd.f32 %v263_v6, %v113_v43  ;;  %v114_v55 = vmul.f32 %v258_v5, %v91_v39  ;;  %v99_v43 = vld [vmem:[%s467_s1 + $0x70] sm:$0xff] }
   0xa   :  { %v147_v30 = vadd.f32 %v131_v18, %v69_v11  ;;  %v148_v35 = vadd.f32 %v132_v26, %v70_v25  ;;  %v73_v36 = vadd.f32 %v249_v2, %v50_v28  ;;  %v149_v41 = vadd.f32 %v133_v31, %v71_v27  ;;  %v93_v51 = vld [vmem:[%s467_s1 + $0x40] sm:$0xff]  ;;  %v95_v11 = vld [vmem:[%s467_s1 + $0x50] sm:$0xff] }
   0xb   :  { %v150_v42 = vadd.f32 %v134_v33, %v72_v32  ;;  %v135_v47 = vadd.f32 %v263_v6, %v112_v37  ;;  %v75_v58 = vadd.f32 %v249_v2, %v52_v49  ;;  %v53_v59 = vmul.f32 %v244_v1, %v30_v44  ;;  %v97_v27 = vld [vmem:[%s467_s1 + $0x60] sm:$0xff]  ;;  %v98_v33 = vld [vmem:[%s467_s1 + $0x68] sm:$0xff]  ;;  %v100_v49 = vld [vmem:[%s467_s1 + $0x78] sm:$0xff] }
   0xc   :  { %v163_v40 = vmax.f32 %v147_v30, 0.0  ;;  %v164_v46 = vmax.f32 %v148_v35, 0.0  ;;  %v165_v52 = vmax.f32 %v149_v41, 0.0  ;;  %v115_v60 = vmul.f32 %v258_v5, %v92_v45 }
   0xd   :  { %v166_v53 = vmax.f32 %v150_v42, 0.0  ;;  %v151_v57 = vadd.f32 %v135_v47, %v73_v36  ;;  %v152_v61 = vadd.f32 %v136_v54, %v74_v48  ;;  %v137_v62 = vadd.f32 %v263_v6, %v114_v55 }
   0xe   :  { %179 = vst [vmem:[%s472_s6] sm:$0xff] %v163_v40  ;;  %v54_v63 = vmul.f32 %v244_v1, %v31_v50  ;;  %v116_v0 = vmul.f32 %v258_v5, %v93_v51  ;;  %v76_v8 = vadd.f32 %v249_v2, %v53_v59  ;;  %v138_v9 = vadd.f32 %v263_v6, %v115_v60 }
   0xf   :  { %v167_v7 = vmax.f32 %v151_v57, 0.0  ;;  %v168_v13 = vmax.f32 %v152_v61, 0.0  ;;  %v153_v14 = vadd.f32 %v137_v62, %v75_v58  ;;  %v117_v20 = vmul.f32 %v258_v5, %v94_v3 }
  0x10   :  { %v77_v15 = vadd.f32 %v249_v2, %v54_v63  ;;  %v139_v16 = vadd.f32 %v263_v6, %v116_v0  ;;  %v154_v18 = vadd.f32 %v138_v9, %v76_v8  ;;  %v118_v25 = vmul.f32 %v258_v5, %v95_v11 }
  0x11   :  { %v169_v23 = vmax.f32 %v153_v14, 0.0  ;;  %v140_v30 = vadd.f32 %v263_v6, %v117_v20  ;;  %v119_v32 = vmul.f32 %v258_v5, %v96_v17  ;;  %v120_v41 = vmul.f32 %v258_v5, %v97_v27 }
  0x12   :  { %v155_v24 = vadd.f32 %v139_v16, %v77_v15  ;;  %v170_v29 = vmax.f32 %v154_v18, 0.0  ;;  %v141_v36 = vadd.f32 %v263_v6, %v118_v25  ;;  %v122_v57 = vmul.f32 %v258_v5, %v99_v43 }
  0x13   :  { %v142_v40 = vadd.f32 %v263_v6, %v119_v32  ;;  %v123_v61 = vmul.f32 %v258_v5, %v100_v49 }
  0x14   :  { %v171_v35 = vmax.f32 %v155_v24, 0.0  ;;  %v145_v63 = vadd.f32 %v263_v6, %v122_v57 }
  0x15   :  { %v32_v56 = vld [vmem:[%s466_s0 + $0x48] sm:$0xff] }
  0x16   :  { %180 = vst [vmem:[%s472_s6 + $0x8] sm:$0xff] %v164_v46  ;;  %181 = vst [vmem:[%s472_s6 + $0x10] sm:$0xff] %v165_v52  ;;  %v55_v10 = vmul.f32 %v244_v1, %v32_v56  ;;  %v121_v46 = vmul.f32 %v258_v5, %v98_v33  ;;  %v143_v52 = vadd.f32 %v263_v6, %v120_v41 }
  0x17   :  { %182 = vst [vmem:[%s472_s6 + $0x18] sm:$0xff] %v166_v53 }
  0x18   :  { %v78_v19 = vadd.f32 %v249_v2, %v55_v10  ;;  %v144_v55 = vadd.f32 %v263_v6, %v121_v46 }
  0x1a   :  { %v156_v39 = vadd.f32 %v140_v30, %v78_v19 }
  0x1c   :  { %v172_v50 = vmax.f32 %v156_v39, 0.0 }
  0x1e   :  { %v33_v4 = vld [vmem:[%s466_s0 + $0x50] sm:$0xff]  ;;  %v34_v12 = vld [vmem:[%s466_s0 + $0x58] sm:$0xff] }
  0x1f   :  { %183 = vst [vmem:[%s472_s6 + $0x20] sm:$0xff] %v167_v7  ;;  %v56_v21 = vmul.f32 %v244_v1, %v33_v4  ;;  %v57_v26 = vmul.f32 %v244_v1, %v34_v12  ;;  %v146_v4 = vadd.f32 %v263_v6, %v123_v61 }
  0x21   :  { %v79_v31 = vadd.f32 %v249_v2, %v56_v21  ;;  %v80_v37 = vadd.f32 %v249_v2, %v57_v26 }
  0x23   :  { %v157_v44 = vadd.f32 %v141_v36, %v79_v31  ;;  %v158_v51 = vadd.f32 %v142_v40, %v80_v37 }
  0x25   :  { %v173_v54 = vmax.f32 %v157_v44, 0.0  ;;  %v174_v58 = vmax.f32 %v158_v51, 0.0 }
  0x26   :  { %v35_v22 = vld [vmem:[%s466_s0 + $0x60] sm:$0xff] }
  0x27   :  { %184 = vst [vmem:[%s472_s6 + $0x28] sm:$0xff] %v168_v13  ;;  %v58_v38 = vmul.f32 %v244_v1, %v35_v22 }
  0x29   :  { %v81_v45 = vadd.f32 %v249_v2, %v58_v38 }
  0x2b   :  { %v159_v59 = vadd.f32 %v143_v52, %v81_v45 }
  0x2d   :  { %v175_v0 = vmax.f32 %v159_v59, 0.0 }
  0x2e   :  { %v36_v28 = vld [vmem:[%s466_s0 + $0x68] sm:$0xff]  ;;  %v37_v34 = vld [vmem:[%s466_s0 + $0x70] sm:$0xff] }
  0x2f   :  { %185 = vst [vmem:[%s472_s6 + $0x30] sm:$0xff] %v169_v23  ;;  %186 = vst [vmem:[%s472_s6 + $0x38] sm:$0xff] %v170_v29  ;;  %v59_v42 = vmul.f32 %v244_v1, %v36_v28  ;;  %v60_v47 = vmul.f32 %v244_v1, %v37_v34 }
  0x30   :  { %187 = vst [vmem:[%s472_s6 + $0x40] sm:$0xff] %v171_v35 }
  0x31   :  { %v82_v53 = vadd.f32 %v249_v2, %v59_v42  ;;  %v83_v56 = vadd.f32 %v249_v2, %v60_v47 }
  0x33   :  { %v160_v62 = vadd.f32 %v144_v55, %v82_v53 }
  0x35   :  { %v176_v7 = vmax.f32 %v160_v62, 0.0 }
  0x37   :  { %v38_v48 = vld [vmem:[%s466_s0 + $0x78] sm:$0xff] }
  0x38   :  { %188 = vst [vmem:[%s472_s6 + $0x48] sm:$0xff] %v172_v50  ;;  %v61_v60 = vmul.f32 %v244_v1, %v38_v48  ;;  %189 = vst [vmem:[%s472_s6 + $0x50] sm:$0xff] %v173_v54  ;;  %v161_v1 = vadd.f32 %v145_v63, %v83_v56 }
  0x39   :  { %190 = vst [vmem:[%s472_s6 + $0x58] sm:$0xff] %v174_v58  ;;  %191 = vst [vmem:[%s472_s6 + $0x60] sm:$0xff] %v175_v0 }
  0x3a   :  { %v84_v3 = vadd.f32 %v249_v2, %v61_v60  ;;  %192 = vst [vmem:[%s472_s6 + $0x68] sm:$0xff] %v176_v7  ;;  %v177_v8 = vmax.f32 %v161_v1, 0.0 }
  0x3c   :  { %v162_v5 = vadd.f32 %v146_v4, %v84_v3  ;;  %193 = vst [vmem:[%s472_s6 + $0x70] sm:$0xff] %v177_v8 }
  0x3e   :  { %v178_v9 = vmax.f32 %v162_v5, 0.0 }
  0x40   :  { %194 = vst [vmem:[%s472_s6 + $0x78] sm:$0xff] %v178_v9 }

</bundles_post_ra>
